<compile_context>
chip_gen: v5e
topology: v5e:2x2
jax: 0.10.0
libtpu: 0.0.40
codegen_flags: <defaults>
</compile_context>

<pallas_src>
import functools

import jax
import jax.numpy as jnp
import numpy as np
from jax.experimental import pallas as pl
from jax.experimental.pallas import tpu as pltpu

STATE_DIM = 64
AUX_DIM = 32
LOG_BOUND_MIN = -10.0
LOG_BOUND_MAX = 1.0


# --------------------------------------------------------------------------- #
# Kernel
# --------------------------------------------------------------------------- #
def _policy_kernel(
    obs_ref,      # (STATE_DIM, Bt)  obs, transposed (batch on lanes)
    aux_ref,      # (AUX_DIM,   Bt)  auxiliary features, transposed
    w_enc_ref,    # (H, STATE_DIM)
    b_enc_ref,    # (H, 1)
    w_ih_ref,     # (3H, H)  stacked GRU input weights, gate order [r; z; n]
    b_gate_ref,   # (3H, 1)  fused biases: [b_ir+b_hr; b_iz+b_hz; b_in]
    b_hn_ref,     # (H, 1)   hidden bias of the n-gate (needed as r * b_hn)
    w0a_f_ref,    # (H, H)       residual block 0 / layer A, feature part
    w0a_x_ref,    # (H, AUX_DIM) residual block 0 / layer A, aux part
    b0a_ref,      # (H, 1)
    w0b_ref,      # (H, H)
    b0b_ref,      # (H, 1)
    w1a_ref,      # (H, H)
    b1a_ref,      # (H, 1)
    w1b_ref,      # (H, H)
    b1b_ref,      # (H, 1)
    w_head_ref,   # (1, H)
    b_head_ref,   # (1, 1)
    std_ref,      # (1, 1)   precomputed exp(clamp(log_std))
    out_ref,      # (2, Bt)  row 0 = mean, row 1 = std   (lane-dense)
    *,
    max_action: float,
):
    f32 = jnp.float32
    H = b_hn_ref.shape[0]

    def leaky_relu(v):            # nn.LeakyReLU default slope 0.01 (VPU)
        return jnp.where(v > 0, v, 0.01 * v)

    # --- encoder: Linear(STATE_DIM -> H) + ReLU
    # (obs * state_preprocessor dropped: preprocessor is a frozen ones vector)
    x = obs_ref[...]
    h = jnp.dot(w_enc_ref[...], x, preferred_element_type=f32) + b_enc_ref[...]
    h = jnp.maximum(h, 0.0)                                   # (H, Bt)

    # --- GRU, one step, h0 == 0:
    #   r = sigmoid(W_ir x + b_ir + b_hr)
    #   z = sigmoid(W_iz x + b_iz + b_hz)
    #   n = tanh(W_in x + b_in + r * b_hn)
    #   h' = (1 - z) * n
    gates = jnp.dot(w_ih_ref[...], h, preferred_element_type=f32) + b_gate_ref[...]
    r = jax.nn.sigmoid(gates[0:H, :])
    z = jax.nn.sigmoid(gates[H:2 * H, :])
    n = jnp.tanh(gates[2 * H:3 * H, :] + r * b_hn_ref[...])
    feat = (1.0 - z) * n                                      # (H, Bt)

    # --- residual block 0: Linear(H+32 -> H) as split dots (no concat),
    #     LeakyReLU, Linear(H -> H), LeakyReLU, + skip
    t = (jnp.dot(w0a_f_ref[...], feat, preferred_element_type=f32)
         + jnp.dot(w0a_x_ref[...], aux_ref[...], preferred_element_type=f32)
         + b0a_ref[...])
    t = leaky_relu(t)
    t = jnp.dot(w0b_ref[...], t, preferred_element_type=f32) + b0b_ref[...]
    t = leaky_relu(t)
    feat = t + feat

    # --- residual block 1: Linear, LeakyReLU, Linear, LeakyReLU, + skip
    t = jnp.dot(w1a_ref[...], feat, preferred_element_type=f32) + b1a_ref[...]
    t = leaky_relu(t)
    t = jnp.dot(w1b_ref[...], t, preferred_element_type=f32) + b1b_ref[...]
    t = leaky_relu(t)
    feat = t + feat

    # --- output head: Linear(H -> 1) + Tanh, then * max_action, clamp(min=0.01)
    mean = jnp.dot(w_head_ref[...], feat, preferred_element_type=f32) + b_head_ref[...]
    mean = jnp.tanh(mean) * max_action
    mean = jnp.maximum(mean, 0.01)                            # (1, Bt)

    out_ref[0:1, :] = mean
    out_ref[1:2, :] = jnp.broadcast_to(std_ref[...], mean.shape)


# --------------------------------------------------------------------------- #
# Wrapper
# --------------------------------------------------------------------------- #
def policy_forward(params, obs, auxiliary_features, hidden_state, cell_state,
                   *, max_action, block_b=128):
    """Pallas implementation of PolicyNetwork.forward.

    Returns (output, hidden_state, cell_state) with output shaped (1, B, 2):
    output[..., 0] = clamped mean, output[..., 1] = std.
    """
    # mirror torch's dimension handling
    if obs.ndim == 3:
        obs = obs[:, 0, :]                       # .squeeze(1)
    if auxiliary_features.ndim == 3:
        auxiliary_features = auxiliary_features[0]   # .squeeze(0)

    obs = obs.astype(jnp.float32)
    aux = auxiliary_features.astype(jnp.float32)

    B = obs.shape[0]
    H = params["enc_w"].shape[0]
    state_dim = params["enc_w"].shape[1]
    aux_dim = aux.shape[1]

    # pad batch to a multiple of the batch tile; transpose so batch -> lane axis
    b_pad = max(block_b, ((B + block_b - 1) // block_b) * block_b)
    pad = b_pad - B
    obs_t = jnp.pad(obs, ((0, pad), (0, 0))).T           # (state_dim, b_pad)
    aux_t = jnp.pad(aux, ((0, pad), (0, 0))).T           # (aux_dim,  b_pad)

    # ---- trace-time parameter packing (weight fusion / splitting) ----------
    def col(v):
        return v.reshape(-1, 1).astype(jnp.float32)

    w_enc = params["enc_w"]
    b_enc = col(params["enc_b"])
    w_ih = params["gru_w_ih"]                            # (3H, H), gates [r; z; n]
    b_ih, b_hh = params["gru_b_ih"], params["gru_b_hh"]
    b_gate = col(jnp.concatenate([b_ih[:2 * H] + b_hh[:2 * H], b_ih[2 * H:]]))
    b_hn = col(b_hh[2 * H:])
    w0a = params["res0a_w"]                              # (H, H + aux_dim)
    w0a_f, w0a_x = w0a[:, :H], w0a[:, H:]
    b0a = col(params["res0a_b"])
    w0b, b0b = params["res0b_w"], col(params["res0b_b"])
    w1a, b1a = params["res1a_w"], col(params["res1a_b"])
    w1b, b1b = params["res1b_w"], col(params["res1b_b"])
    w_head = params["head_w"]                            # (1, H)
    b_head = col(params["head_b"])                       # (1, 1)
    std = jnp.exp(jnp.clip(params["log_std"], LOG_BOUND_MIN, LOG_BOUND_MAX))
    std = std.reshape(1, 1).astype(jnp.float32)          # scalar, computed once

    weights = (w_enc, b_enc, w_ih, b_gate, b_hn,
               w0a_f, w0a_x, b0a, w0b, b0b,
               w1a, b1a, w1b, b1b, w_head, b_head, std)

    def tile_spec(rows):          # batch-tiled inputs (batch on lanes)
        return pl.BlockSpec((rows, block_b), lambda i: (0, i))

    def const_spec(shape):        # VMEM-resident weights: constant block index
        zeros = (0,) * len(shape)
        return pl.BlockSpec(shape, lambda i: zeros)

    grid = (b_pad // block_b,)
    kernel = functools.partial(_policy_kernel, max_action=float(max_action))

    out = pl.pallas_call(
        kernel,
        grid=grid,
        in_specs=[tile_spec(state_dim), tile_spec(aux_dim)]
                 + [const_spec(w.shape) for w in weights],
        out_specs=pl.BlockSpec((2, block_b), lambda i: (0, i)),
        out_shape=jax.ShapeDtypeStruct((2, b_pad), jnp.float32),
        compiler_params=pltpu.CompilerParams(dimension_semantics=("parallel",)),
    )(obs_t, aux_t, *weights)

    output = out[:, :B].T[None]                          # (1, B, 2)
    # hidden_state / cell_state are untouched by forward(): pass through directly.
    return output, hidden_state, cell_state


# --------------------------------------------------------------------------- #
# Parameter construction (mirrors the torch module layout)
# --------------------------------------------------------------------------- #
def init_params(key, state_dim=STATE_DIM, aux_dim=AUX_DIM, hidden_dim=128,
                action_dim=1):
    ks = jax.random.split(key, 8)
    H = hidden_dim

    def lin(k, out_d, in_d):
        scale = 1.0 / np.sqrt(in_d)
        kw, kb = jax.random.split(k)
        w = jax.random.uniform(kw, (out_d, in_d), jnp.float32, -scale, scale)
        b = jax.random.uniform(kb, (out_d,), jnp.float32, -scale, scale)
        return w, b

    p = {}
    p["enc_w"], p["enc_b"] = lin(ks[0], H, state_dim)
    p["gru_w_ih"], p["gru_b_ih"] = lin(ks[1], 3 * H, H)
    # W_hh is unused in this forward (h0 == 0); only its bias survives.
    _, p["gru_b_hh"] = lin(ks[2], 3 * H, H)
    p["res0a_w"], p["res0a_b"] = lin(ks[3], H, H + aux_dim)
    p["res0b_w"], p["res0b_b"] = lin(ks[4], H, H)
    p["res1a_w"], p["res1a_b"] = lin(ks[5], H, H)
    p["res1b_w"], p["res1b_b"] = lin(ks[6], H, H)
    p["head_w"], p["head_b"] = lin(ks[7], action_dim, H)
    p["log_std"] = jnp.zeros((action_dim,), jnp.float32)   # torch init: zeros
    return p


# --------------------------------------------------------------------------- #
# Pure-JAX reference (same math, batch-major) for a correctness check
# --------------------------------------------------------------------------- #
def _reference_forward(params, obs, aux, max_action):
    hp = jax.lax.Precision.HIGHEST
    H = params["enc_w"].shape[0]
    lrelu = lambda v: jnp.where(v > 0, v, 0.01 * v)

    h = jnp.maximum(jnp.dot(obs, params["enc_w"].T, precision=hp)
                    + params["enc_b"], 0.0)
    gi = jnp.dot(h, params["gru_w_ih"].T, precision=hp) + params["gru_b_ih"]
    gh = params["gru_b_hh"]                                   # h0 == 0
    r = jax.nn.sigmoid(gi[:, :H] + gh[:H])
    z = jax.nn.sigmoid(gi[:, H:2 * H] + gh[H:2 * H])
    n = jnp.tanh(gi[:, 2 * H:] + r * gh[2 * H:])
    feat = (1.0 - z) * n

    comb = jnp.concatenate([feat, aux], axis=1)
    t = lrelu(jnp.dot(comb, params["res0a_w"].T, precision=hp) + params["res0a_b"])
    t = lrelu(jnp.dot(t, params["res0b_w"].T, precision=hp) + params["res0b_b"])
    feat = t + feat
    t = lrelu(jnp.dot(feat, params["res1a_w"].T, precision=hp) + params["res1a_b"])
    t = lrelu(jnp.dot(t, params["res1b_w"].T, precision=hp) + params["res1b_b"])
    feat = t + feat

    mean = jnp.tanh(jnp.dot(feat, params["head_w"].T, precision=hp)
                    + params["head_b"])
    mean = jnp.maximum(mean * max_action, 0.01)
    std = jnp.exp(jnp.clip(params["log_std"], LOG_BOUND_MIN, LOG_BOUND_MAX))
    std = jnp.broadcast_to(std.reshape(1, 1), (mean.shape[0], 1))
    return jnp.concatenate([mean, std], axis=1)[None]


# --------------------------------------------------------------------------- #
if __name__ == "__main__":
    key = jax.random.PRNGKey(0)
    k_params, k_obs, k_aux = jax.random.split(key, 3)

    H = 128            # torch default hidden_dim
    B = 200            # not a multiple of the 128-wide batch tile -> exercises padding
    MAX_ACTION = 2.0

    params = init_params(k_params, hidden_dim=H)
    obs = jax.random.normal(k_obs, (B, STATE_DIM), jnp.float32)
    aux = jax.random.normal(k_aux, (B, AUX_DIM), jnp.float32)
    hidden_state = jnp.zeros((1, B, H), jnp.float32)
    cell_state = jnp.zeros((1, B, H), jnp.float32)

    fwd = jax.jit(policy_forward, static_argnames=("max_action", "block_b"))
    out, h_out, c_out = fwd(params, obs, aux, hidden_state, cell_state,
                            max_action=MAX_ACTION, block_b=128)
    out = jax.block_until_ready(out)
    assert out.shape == (1, B, 2)

    ref = np.asarray(_reference_forward(params, obs, aux, MAX_ACTION))
    got = np.asarray(out)
    if not np.allclose(got, ref, atol=1e-3, rtol=1e-3):
        err = float(np.max(np.abs(got - ref)))
        raise AssertionError(f"Pallas output mismatch vs reference, max abs err={err:.3e}")

    print("KERNEL_OK")
</pallas_src>

<mosaic_0001>
module attributes {stable_mosaic.version = 11 : i64} {
  func.func @_policy_kernel(%arg0: i32, %arg1: memref<64x128xf32, #tpu.memory_space<vmem>>, %arg2: memref<32x128xf32, #tpu.memory_space<vmem>>, %arg3: memref<128x64xf32, #tpu.memory_space<vmem>>, %arg4: memref<128x1xf32, #tpu.memory_space<vmem>>, %arg5: memref<384x128xf32, #tpu.memory_space<vmem>>, %arg6: memref<384x1xf32, #tpu.memory_space<vmem>>, %arg7: memref<128x1xf32, #tpu.memory_space<vmem>>, %arg8: memref<128x128xf32, #tpu.memory_space<vmem>>, %arg9: memref<128x32xf32, #tpu.memory_space<vmem>>, %arg10: memref<128x1xf32, #tpu.memory_space<vmem>>, %arg11: memref<128x128xf32, #tpu.memory_space<vmem>>, %arg12: memref<128x1xf32, #tpu.memory_space<vmem>>, %arg13: memref<128x128xf32, #tpu.memory_space<vmem>>, %arg14: memref<128x1xf32, #tpu.memory_space<vmem>>, %arg15: memref<128x128xf32, #tpu.memory_space<vmem>>, %arg16: memref<128x1xf32, #tpu.memory_space<vmem>>, %arg17: memref<1x128xf32, #tpu.memory_space<vmem>>, %arg18: memref<1x1xf32, #tpu.memory_space<vmem>>, %arg19: memref<1x1xf32, #tpu.memory_space<vmem>>, %arg20: memref<2x128xf32, #tpu.memory_space<vmem>>) attributes {dimension_semantics = [#tpu.dimension_semantics<parallel>], iteration_bounds = array<i64: 2>, scalar_prefetch = 0 : i64, scratch_operands = 0 : i64, tpu.core_type = #tpu.core_type<tc>, window_params = [{transform_indices = @transform_0, window_bounds = array<i64: 64, 128>}, {transform_indices = @transform_1, window_bounds = array<i64: 32, 128>}, {pipeline_mode = #tpu.pipeline_mode<synchronous>, transform_indices = @transform_2, window_bounds = array<i64: 128, 64>}, {pipeline_mode = #tpu.pipeline_mode<synchronous>, transform_indices = @transform_3, window_bounds = array<i64: 128, 1>}, {pipeline_mode = #tpu.pipeline_mode<synchronous>, transform_indices = @transform_4, window_bounds = array<i64: 384, 128>}, {pipeline_mode = #tpu.pipeline_mode<synchronous>, transform_indices = @transform_5, window_bounds = array<i64: 384, 1>}, {pipeline_mode = #tpu.pipeline_mode<synchronous>, transform_indices = @transform_6, window_bounds = array<i64: 128, 1>}, {pipeline_mode = #tpu.pipeline_mode<synchronous>, transform_indices = @transform_7, window_bounds = array<i64: 128, 128>}, {pipeline_mode = #tpu.pipeline_mode<synchronous>, transform_indices = @transform_8, window_bounds = array<i64: 128, 32>}, {pipeline_mode = #tpu.pipeline_mode<synchronous>, transform_indices = @transform_9, window_bounds = array<i64: 128, 1>}, {pipeline_mode = #tpu.pipeline_mode<synchronous>, transform_indices = @transform_10, window_bounds = array<i64: 128, 128>}, {pipeline_mode = #tpu.pipeline_mode<synchronous>, transform_indices = @transform_11, window_bounds = array<i64: 128, 1>}, {pipeline_mode = #tpu.pipeline_mode<synchronous>, transform_indices = @transform_12, window_bounds = array<i64: 128, 128>}, {pipeline_mode = #tpu.pipeline_mode<synchronous>, transform_indices = @transform_13, window_bounds = array<i64: 128, 1>}, {pipeline_mode = #tpu.pipeline_mode<synchronous>, transform_indices = @transform_14, window_bounds = array<i64: 128, 128>}, {pipeline_mode = #tpu.pipeline_mode<synchronous>, transform_indices = @transform_15, window_bounds = array<i64: 128, 1>}, {pipeline_mode = #tpu.pipeline_mode<synchronous>, transform_indices = @transform_16, window_bounds = array<i64: 1, 128>}, {pipeline_mode = #tpu.pipeline_mode<synchronous>, transform_indices = @transform_17, window_bounds = array<i64: 1, 1>}, {pipeline_mode = #tpu.pipeline_mode<synchronous>, transform_indices = @transform_18, window_bounds = array<i64: 1, 1>}, {transform_indices = @transform_19, window_bounds = array<i64: 2, 128>}]} {
    %c0 = arith.constant 0 : index
    %c0_0 = arith.constant 0 : index
    %0 = vector.load %arg1[%c0, %c0_0] : memref<64x128xf32, #tpu.memory_space<vmem>>, vector<64x128xf32>
    %c0_1 = arith.constant 0 : index
    %c0_2 = arith.constant 0 : index
    %1 = vector.load %arg3[%c0_1, %c0_2] : memref<128x64xf32, #tpu.memory_space<vmem>>, vector<128x64xf32>
    %cst = arith.constant dense<0.000000e+00> : vector<128x128xf32>
    %2 = tpu.matmul %1, %0, %cst {dimension_numbers = #tpu.dot_dimension_numbers<[1], [0], [0], [1], [0, 0, 1, 1], [], []>} : vector<128x64xf32>, vector<64x128xf32>, vector<128x128xf32> -> vector<128x128xf32>
    %c0_3 = arith.constant 0 : index
    %c0_4 = arith.constant 0 : index
    %3 = vector.load %arg4[%c0_3, %c0_4] : memref<128x1xf32, #tpu.memory_space<vmem>>, vector<128x1xf32>
    %4 = vector.broadcast %3 : vector<128x1xf32> to vector<128x128xf32>
    %5 = arith.addf %2, %4 : vector<128x128xf32>
    %cst_5 = arith.constant 0.000000e+00 : f32
    %6 = vector.broadcast %cst_5 : f32 to vector<128x128xf32>
    %7 = arith.maximumf %5, %6 : vector<128x128xf32>
    %c0_6 = arith.constant 0 : index
    %c0_7 = arith.constant 0 : index
    %8 = vector.load %arg5[%c0_6, %c0_7] : memref<384x128xf32, #tpu.memory_space<vmem>>, vector<384x128xf32>
    %cst_8 = arith.constant dense<0.000000e+00> : vector<384x128xf32>
    %9 = tpu.matmul %8, %7, %cst_8 {dimension_numbers = #tpu.dot_dimension_numbers<[1], [0], [0], [1], [0, 0, 1, 1], [], []>} : vector<384x128xf32>, vector<128x128xf32>, vector<384x128xf32> -> vector<384x128xf32>
    %c0_9 = arith.constant 0 : index
    %c0_10 = arith.constant 0 : index
    %10 = vector.load %arg6[%c0_9, %c0_10] : memref<384x1xf32, #tpu.memory_space<vmem>>, vector<384x1xf32>
    %11 = vector.broadcast %10 : vector<384x1xf32> to vector<384x128xf32>
    %12 = arith.addf %9, %11 : vector<384x128xf32>
    %13 = vector.extract_strided_slice %12 {offsets = [0, 0], sizes = [128, 128], strides = [1, 1]} : vector<384x128xf32> to vector<128x128xf32>
    %14 = arith.negf %13 : vector<128x128xf32>
    %15 = math.exp %14 : vector<128x128xf32>
    %cst_11 = arith.constant 1.000000e+00 : f32
    %16 = vector.broadcast %cst_11 : f32 to vector<128x128xf32>
    %17 = arith.addf %16, %15 : vector<128x128xf32>
    %18 = arith.divf %16, %17 : vector<128x128xf32>
    %19 = vector.extract_strided_slice %12 {offsets = [128, 0], sizes = [128, 128], strides = [1, 1]} : vector<384x128xf32> to vector<128x128xf32>
    %20 = arith.negf %19 : vector<128x128xf32>
    %21 = math.exp %20 : vector<128x128xf32>
    %cst_12 = arith.constant 1.000000e+00 : f32
    %22 = vector.broadcast %cst_12 : f32 to vector<128x128xf32>
    %23 = arith.addf %22, %21 : vector<128x128xf32>
    %24 = arith.divf %22, %23 : vector<128x128xf32>
    %25 = vector.extract_strided_slice %12 {offsets = [256, 0], sizes = [128, 128], strides = [1, 1]} : vector<384x128xf32> to vector<128x128xf32>
    %c0_13 = arith.constant 0 : index
    %c0_14 = arith.constant 0 : index
    %26 = vector.load %arg7[%c0_13, %c0_14] : memref<128x1xf32, #tpu.memory_space<vmem>>, vector<128x1xf32>
    %27 = vector.broadcast %26 : vector<128x1xf32> to vector<128x128xf32>
    %28 = arith.mulf %18, %27 : vector<128x128xf32>
    %29 = arith.addf %25, %28 : vector<128x128xf32>
    %30 = math.tanh %29 : vector<128x128xf32>
    %cst_15 = arith.constant 1.000000e+00 : f32
    %31 = vector.broadcast %cst_15 : f32 to vector<128x128xf32>
    %32 = arith.subf %31, %24 : vector<128x128xf32>
    %33 = arith.mulf %32, %30 : vector<128x128xf32>
    %c0_16 = arith.constant 0 : index
    %c0_17 = arith.constant 0 : index
    %34 = vector.load %arg8[%c0_16, %c0_17] : memref<128x128xf32, #tpu.memory_space<vmem>>, vector<128x128xf32>
    %cst_18 = arith.constant dense<0.000000e+00> : vector<128x128xf32>
    %35 = tpu.matmul %34, %33, %cst_18 {dimension_numbers = #tpu.dot_dimension_numbers<[1], [0], [0], [1], [0, 0, 1, 1], [], []>} : vector<128x128xf32>, vector<128x128xf32>, vector<128x128xf32> -> vector<128x128xf32>
    %c0_19 = arith.constant 0 : index
    %c0_20 = arith.constant 0 : index
    %36 = vector.load %arg9[%c0_19, %c0_20] : memref<128x32xf32, #tpu.memory_space<vmem>>, vector<128x32xf32>
    %c0_21 = arith.constant 0 : index
    %c0_22 = arith.constant 0 : index
    %37 = vector.load %arg2[%c0_21, %c0_22] : memref<32x128xf32, #tpu.memory_space<vmem>>, vector<32x128xf32>
    %cst_23 = arith.constant dense<0.000000e+00> : vector<128x128xf32>
    %38 = tpu.matmul %36, %37, %cst_23 {dimension_numbers = #tpu.dot_dimension_numbers<[1], [0], [0], [1], [0, 0, 1, 1], [], []>} : vector<128x32xf32>, vector<32x128xf32>, vector<128x128xf32> -> vector<128x128xf32>
    %39 = arith.addf %35, %38 : vector<128x128xf32>
    %c0_24 = arith.constant 0 : index
    %c0_25 = arith.constant 0 : index
    %40 = vector.load %arg10[%c0_24, %c0_25] : memref<128x1xf32, #tpu.memory_space<vmem>>, vector<128x1xf32>
    %41 = vector.broadcast %40 : vector<128x1xf32> to vector<128x128xf32>
    %42 = arith.addf %39, %41 : vector<128x128xf32>
    %cst_26 = arith.constant 0.000000e+00 : f32
    %43 = vector.broadcast %cst_26 : f32 to vector<128x128xf32>
    %44 = arith.cmpf ogt, %42, %43 : vector<128x128xf32>
    %cst_27 = arith.constant 0.00999999977 : f32
    %45 = vector.broadcast %cst_27 : f32 to vector<128x128xf32>
    %46 = arith.mulf %45, %42 : vector<128x128xf32>
    %47 = arith.select %44, %42, %46 : vector<128x128xi1>, vector<128x128xf32>
    %c0_28 = arith.constant 0 : index
    %c0_29 = arith.constant 0 : index
    %48 = vector.load %arg11[%c0_28, %c0_29] : memref<128x128xf32, #tpu.memory_space<vmem>>, vector<128x128xf32>
    %cst_30 = arith.constant dense<0.000000e+00> : vector<128x128xf32>
    %49 = tpu.matmul %48, %47, %cst_30 {dimension_numbers = #tpu.dot_dimension_numbers<[1], [0], [0], [1], [0, 0, 1, 1], [], []>} : vector<128x128xf32>, vector<128x128xf32>, vector<128x128xf32> -> vector<128x128xf32>
    %c0_31 = arith.constant 0 : index
    %c0_32 = arith.constant 0 : index
    %50 = vector.load %arg12[%c0_31, %c0_32] : memref<128x1xf32, #tpu.memory_space<vmem>>, vector<128x1xf32>
    %51 = vector.broadcast %50 : vector<128x1xf32> to vector<128x128xf32>
    %52 = arith.addf %49, %51 : vector<128x128xf32>
    %cst_33 = arith.constant 0.000000e+00 : f32
    %53 = vector.broadcast %cst_33 : f32 to vector<128x128xf32>
    %54 = arith.cmpf ogt, %52, %53 : vector<128x128xf32>
    %cst_34 = arith.constant 0.00999999977 : f32
    %55 = vector.broadcast %cst_34 : f32 to vector<128x128xf32>
    %56 = arith.mulf %55, %52 : vector<128x128xf32>
    %57 = arith.select %54, %52, %56 : vector<128x128xi1>, vector<128x128xf32>
    %58 = arith.addf %57, %33 : vector<128x128xf32>
    %c0_35 = arith.constant 0 : index
    %c0_36 = arith.constant 0 : index
    %59 = vector.load %arg13[%c0_35, %c0_36] : memref<128x128xf32, #tpu.memory_space<vmem>>, vector<128x128xf32>
    %cst_37 = arith.constant dense<0.000000e+00> : vector<128x128xf32>
    %60 = tpu.matmul %59, %58, %cst_37 {dimension_numbers = #tpu.dot_dimension_numbers<[1], [0], [0], [1], [0, 0, 1, 1], [], []>} : vector<128x128xf32>, vector<128x128xf32>, vector<128x128xf32> -> vector<128x128xf32>
    %c0_38 = arith.constant 0 : index
    %c0_39 = arith.constant 0 : index
    %61 = vector.load %arg14[%c0_38, %c0_39] : memref<128x1xf32, #tpu.memory_space<vmem>>, vector<128x1xf32>
    %62 = vector.broadcast %61 : vector<128x1xf32> to vector<128x128xf32>
    %63 = arith.addf %60, %62 : vector<128x128xf32>
    %cst_40 = arith.constant 0.000000e+00 : f32
    %64 = vector.broadcast %cst_40 : f32 to vector<128x128xf32>
    %65 = arith.cmpf ogt, %63, %64 : vector<128x128xf32>
    %cst_41 = arith.constant 0.00999999977 : f32
    %66 = vector.broadcast %cst_41 : f32 to vector<128x128xf32>
    %67 = arith.mulf %66, %63 : vector<128x128xf32>
    %68 = arith.select %65, %63, %67 : vector<128x128xi1>, vector<128x128xf32>
    %c0_42 = arith.constant 0 : index
    %c0_43 = arith.constant 0 : index
    %69 = vector.load %arg15[%c0_42, %c0_43] : memref<128x128xf32, #tpu.memory_space<vmem>>, vector<128x128xf32>
    %cst_44 = arith.constant dense<0.000000e+00> : vector<128x128xf32>
    %70 = tpu.matmul %69, %68, %cst_44 {dimension_numbers = #tpu.dot_dimension_numbers<[1], [0], [0], [1], [0, 0, 1, 1], [], []>} : vector<128x128xf32>, vector<128x128xf32>, vector<128x128xf32> -> vector<128x128xf32>
    %c0_45 = arith.constant 0 : index
    %c0_46 = arith.constant 0 : index
    %71 = vector.load %arg16[%c0_45, %c0_46] : memref<128x1xf32, #tpu.memory_space<vmem>>, vector<128x1xf32>
    %72 = vector.broadcast %71 : vector<128x1xf32> to vector<128x128xf32>
    %73 = arith.addf %70, %72 : vector<128x128xf32>
    %cst_47 = arith.constant 0.000000e+00 : f32
    %74 = vector.broadcast %cst_47 : f32 to vector<128x128xf32>
    %75 = arith.cmpf ogt, %73, %74 : vector<128x128xf32>
    %cst_48 = arith.constant 0.00999999977 : f32
    %76 = vector.broadcast %cst_48 : f32 to vector<128x128xf32>
    %77 = arith.mulf %76, %73 : vector<128x128xf32>
    %78 = arith.select %75, %73, %77 : vector<128x128xi1>, vector<128x128xf32>
    %79 = arith.addf %78, %58 : vector<128x128xf32>
    %c0_49 = arith.constant 0 : index
    %c0_50 = arith.constant 0 : index
    %80 = vector.load %arg17[%c0_49, %c0_50] : memref<1x128xf32, #tpu.memory_space<vmem>>, vector<1x128xf32>
    %cst_51 = arith.constant dense<0.000000e+00> : vector<1x128xf32>
    %81 = tpu.matmul %80, %79, %cst_51 {dimension_numbers = #tpu.dot_dimension_numbers<[1], [0], [0], [1], [0, 0, 1, 1], [], []>} : vector<1x128xf32>, vector<128x128xf32>, vector<1x128xf32> -> vector<1x128xf32>
    %c0_52 = arith.constant 0 : index
    %c0_53 = arith.constant 0 : index
    %82 = vector.load %arg18[%c0_52, %c0_53] : memref<1x1xf32, #tpu.memory_space<vmem>>, vector<1x1xf32>
    %83 = vector.broadcast %82 : vector<1x1xf32> to vector<1x128xf32>
    %84 = arith.addf %81, %83 : vector<1x128xf32>
    %85 = math.tanh %84 : vector<1x128xf32>
    %cst_54 = arith.constant 2.000000e+00 : f32
    %86 = vector.broadcast %cst_54 : f32 to vector<1x128xf32>
    %87 = arith.mulf %85, %86 : vector<1x128xf32>
    %cst_55 = arith.constant 0.00999999977 : f32
    %88 = vector.broadcast %cst_55 : f32 to vector<1x128xf32>
    %89 = arith.maximumf %87, %88 : vector<1x128xf32>
    %c0_56 = arith.constant 0 : index
    %c0_57 = arith.constant 0 : index
    %90 = vector.load %arg20[%c0_56, %c0_57] : memref<2x128xf32, #tpu.memory_space<vmem>>, vector<1x128xf32>
    tpu.vector_store %arg20[%c0_56, %c0_57], %89 {strides = array<i32>} : memref<2x128xf32, #tpu.memory_space<vmem>>, vector<1x128xf32>,
    %c0_58 = arith.constant 0 : index
    %c0_59 = arith.constant 0 : index
    %91 = vector.load %arg19[%c0_58, %c0_59] : memref<1x1xf32, #tpu.memory_space<vmem>>, vector<1x1xf32>
    %92 = vector.shape_cast %91 : vector<1x1xf32> to vector<1x1xf32>
    %93 = vector.broadcast %92 : vector<1x1xf32> to vector<1x128xf32>
    %c1 = arith.constant 1 : index
    %c0_60 = arith.constant 0 : index
    %94 = vector.load %arg20[%c1, %c0_60] : memref<2x128xf32, #tpu.memory_space<vmem>>, vector<1x128xf32>
    tpu.vector_store %arg20[%c1, %c0_60], %93 {strides = array<i32>} : memref<2x128xf32, #tpu.memory_space<vmem>>, vector<1x128xf32>,
    return
  }
  func.func @transform_0(%arg0: i32) -> (i32, i32) {
    %c0_i32 = arith.constant 0 : i32
    %c0_i32_0 = arith.constant 0 : i32
    return %c0_i32, %arg0 : i32, i32
  }
  func.func @transform_1(%arg0: i32) -> (i32, i32) {
    %c0_i32 = arith.constant 0 : i32
    %c0_i32_0 = arith.constant 0 : i32
    return %c0_i32, %arg0 : i32, i32
  }
  func.func @transform_2(%arg0: i32) -> (i32, i32) {
    %c0_i32 = arith.constant 0 : i32
    %c0_i32_0 = arith.constant 0 : i32
    %c0_i32_1 = arith.constant 0 : i32
    return %c0_i32, %c0_i32_0 : i32, i32
  }
  func.func @transform_3(%arg0: i32) -> (i32, i32) {
    %c0_i32 = arith.constant 0 : i32
    %c0_i32_0 = arith.constant 0 : i32
    %c0_i32_1 = arith.constant 0 : i32
    return %c0_i32, %c0_i32_0 : i32, i32
  }
  func.func @transform_4(%arg0: i32) -> (i32, i32) {
    %c0_i32 = arith.constant 0 : i32
    %c0_i32_0 = arith.constant 0 : i32
    %c0_i32_1 = arith.constant 0 : i32
    return %c0_i32, %c0_i32_0 : i32, i32
  }
  func.func @transform_5(%arg0: i32) -> (i32, i32) {
    %c0_i32 = arith.constant 0 : i32
    %c0_i32_0 = arith.constant 0 : i32
    %c0_i32_1 = arith.constant 0 : i32
    return %c0_i32, %c0_i32_0 : i32, i32
  }
  func.func @transform_6(%arg0: i32) -> (i32, i32) {
    %c0_i32 = arith.constant 0 : i32
    %c0_i32_0 = arith.constant 0 : i32
    %c0_i32_1 = arith.constant 0 : i32
    return %c0_i32, %c0_i32_0 : i32, i32
  }
  func.func @transform_7(%arg0: i32) -> (i32, i32) {
    %c0_i32 = arith.constant 0 : i32
    %c0_i32_0 = arith.constant 0 : i32
    %c0_i32_1 = arith.constant 0 : i32
    return %c0_i32, %c0_i32_0 : i32, i32
  }
  func.func @transform_8(%arg0: i32) -> (i32, i32) {
    %c0_i32 = arith.constant 0 : i32
    %c0_i32_0 = arith.constant 0 : i32
    %c0_i32_1 = arith.constant 0 : i32
    return %c0_i32, %c0_i32_0 : i32, i32
  }
  func.func @transform_9(%arg0: i32) -> (i32, i32) {
    %c0_i32 = arith.constant 0 : i32
    %c0_i32_0 = arith.constant 0 : i32
    %c0_i32_1 = arith.constant 0 : i32
    return %c0_i32, %c0_i32_0 : i32, i32
  }
  func.func @transform_10(%arg0: i32) -> (i32, i32) {
    %c0_i32 = arith.constant 0 : i32
    %c0_i32_0 = arith.constant 0 : i32
    %c0_i32_1 = arith.constant 0 : i32
    return %c0_i32, %c0_i32_0 : i32, i32
  }
  func.func @transform_11(%arg0: i32) -> (i32, i32) {
    %c0_i32 = arith.constant 0 : i32
    %c0_i32_0 = arith.constant 0 : i32
    %c0_i32_1 = arith.constant 0 : i32
    return %c0_i32, %c0_i32_0 : i32, i32
  }
  func.func @transform_12(%arg0: i32) -> (i32, i32) {
    %c0_i32 = arith.constant 0 : i32
    %c0_i32_0 = arith.constant 0 : i32
    %c0_i32_1 = arith.constant 0 : i32
    return %c0_i32, %c0_i32_0 : i32, i32
  }
  func.func @transform_13(%arg0: i32) -> (i32, i32) {
    %c0_i32 = arith.constant 0 : i32
    %c0_i32_0 = arith.constant 0 : i32
    %c0_i32_1 = arith.constant 0 : i32
    return %c0_i32, %c0_i32_0 : i32, i32
  }
  func.func @transform_14(%arg0: i32) -> (i32, i32) {
    %c0_i32 = arith.constant 0 : i32
    %c0_i32_0 = arith.constant 0 : i32
    %c0_i32_1 = arith.constant 0 : i32
    return %c0_i32, %c0_i32_0 : i32, i32
  }
  func.func @transform_15(%arg0: i32) -> (i32, i32) {
    %c0_i32 = arith.constant 0 : i32
    %c0_i32_0 = arith.constant 0 : i32
    %c0_i32_1 = arith.constant 0 : i32
    return %c0_i32, %c0_i32_0 : i32, i32
  }
  func.func @transform_16(%arg0: i32) -> (i32, i32) {
    %c0_i32 = arith.constant 0 : i32
    %c0_i32_0 = arith.constant 0 : i32
    %c0_i32_1 = arith.constant 0 : i32
    return %c0_i32, %c0_i32_0 : i32, i32
  }
  func.func @transform_17(%arg0: i32) -> (i32, i32) {
    %c0_i32 = arith.constant 0 : i32
    %c0_i32_0 = arith.constant 0 : i32
    %c0_i32_1 = arith.constant 0 : i32
    return %c0_i32, %c0_i32_0 : i32, i32
  }
  func.func @transform_18(%arg0: i32) -> (i32, i32) {
    %c0_i32 = arith.constant 0 : i32
    %c0_i32_0 = arith.constant 0 : i32
    %c0_i32_1 = arith.constant 0 : i32
    return %c0_i32, %c0_i32_0 : i32, i32
  }
  func.func @transform_19(%arg0: i32) -> (i32, i32) {
    %c0_i32 = arith.constant 0 : i32
    %c0_i32_0 = arith.constant 0 : i32
    return %c0_i32, %arg0 : i32, i32
  }
}

</mosaic_0001>

<bundles_post_ra>
// kernel: policy_forward.1
= control target key start
LH: loop header
LB: loop body
LE: loop exit
PB: predicated region body
PF: predicated region fallthrough
CT: control target
= control target key end

     0   :  { %s6404_s0 = inlined_call_operand.vmem [shape: f32[64,256], index: 0, kind: input, shape index: {}]   ;;  %s6405_s1 = inlined_call_operand.vmem [shape: f32[32,256], index: 1, kind: input, shape index: {}]   ;;  %s6406_s2 = inlined_call_operand.vmem [shape: f32[128,64], index: 2, kind: input, shape index: {}]   ;;  %s6407_s3 = inlined_call_operand.vmem [shape: f32[128,1], index: 3, kind: input, shape index: {}]   ;;  %s6408_s4 = inlined_call_operand.vmem [shape: f32[384,128], index: 4, kind: input, shape index: {}]   ;;  %s6409_s5 = inlined_call_operand.vmem [shape: f32[384,1], index: 5, kind: input, shape index: {}]   ;;  %s6410_s6 = inlined_call_operand.vmem [shape: f32[128,1], index: 6, kind: input, shape index: {}]   ;;  %s6411_s7 = inlined_call_operand.vmem [shape: f32[128,128], index: 7, kind: input, shape index: {}]   ;;  %s6412_s8 = inlined_call_operand.vmem [shape: f32[128,32], index: 8, kind: input, shape index: {}]   ;;  %s6413_s9 = inlined_call_operand.vmem [shape: f32[128,1], index: 9, kind: input, shape index: {}]   ;;  %s6414_s10 = inlined_call_operand.vmem [shape: f32[128,128], index: 10, kind: input, shape index: {}]   ;;  %s6415_s11 = inlined_call_operand.vmem [shape: f32[128,1], index: 11, kind: input, shape index: {}]   ;;  %s6416_s12 = inlined_call_operand.vmem [shape: f32[128,128], index: 12, kind: input, shape index: {}]   ;;  %s6417_s13 = inlined_call_operand.vmem [shape: f32[128,1], index: 13, kind: input, shape index: {}]   ;;  %s6418_s14 = inlined_call_operand.vmem [shape: f32[128,128], index: 14, kind: input, shape index: {}]   ;;  %s6419_s15 = inlined_call_operand.vmem [shape: f32[128,1], index: 15, kind: input, shape index: {}]   ;;  %s6420_s16 = inlined_call_operand.vmem [shape: f32[1,128], index: 16, kind: input, shape index: {}]   ;;  %s6421_s17 = inlined_call_operand.<no memory space> [shape: f32[1,1], index: 17, kind: input, shape index: {}]   ;;  %s6422_s19 = inlined_call_operand.vmem [shape: f32[2,256], index: 19, kind: output, shape index: {}]   ;;  %s6423_s18 = inlined_call_operand.<no memory space> [shape: f32[1,1], index: 18, kind: input, shape index: {}]  }
   0x1   :  { %6438 = sst [smem:[#allocation71_spill]] %s6404_s0  ;;  %v24_v0 = vstv %s6421_s17  ;;  %v26_v1 = vstv %s6423_s18 }
   0x2   :  { %6439 = sst [smem:[#allocation72_spill]] %s6405_s1  ;;  %25 = vst [vmem:[#allocation2] sm:$0x1] %v24_v0 }
   0x3   :  { %6440 = sst [smem:[#allocation73_spill]] %s6406_s2  ;;  %27 = vst [vmem:[#allocation3] sm:$0x1] %v26_v1 }
   0x4   :  { %6441 = sst [smem:[#allocation74_spill]] %s6407_s3 }
   0x5   :  { %s3896_s1 = smov 0   ;;  %s3898_s22 = smov 0  }
   0x6   :  { %s3900_s2 = smov 0  }
   0x7 LB: > { %s3913_s18 = sadd.s32 1, %s3787_s2   ;;  %s40_s24 = sadd.s32 1, %s3783_s22  ;;  %s3787_s2 = sphi %s3900_s2, %s6712_s2   ;;  %s3783_s22 = sphi %s3898_s22, %s6711_s22   ;;  %s3779_s1 = sphi %s3896_s1, %s6710_s1  }
   0x8   : > { %s37_s23 = ssub.s32 %s3787_s2, %s3913_s18  ;;  %p47_p1 = scmp.ne.s32.totalorder %s3783_s22, %s3779_s1 }
   0x9   : > { %p38_p0 = scmp.eq.s32.totalorder %s37_s23, 0  ;;  %p48_p2 = scmp.eq.s32.totalorder %s3787_s2, 0 }
   0xa   : > { %p3468_p4 = scmp.ge.s32.totalorder %s3787_s2, 2 }
   0xb   : > { %s3922_s25 = scalar_select %p38_p0, %s3783_s22, %s40_s24  }
   0xc   : > { %p3924_p3 = por %p48_p2, %p47_p1  ;;  %533 = sbr.rel (%p3468_p4) target bundleno = 49 (0x31), region = 84 }
  0x11   : > { %536 = sbr.rel (!%p3924_p3) target bundleno = 35 (0x23), region = 88  ;;  %s538_s26 = sand.u32 (%p3924_p3), 1, %s3783_s22  }
  0x12   : > { %s3470_s27 = sshll.u32 (%p3924_p3), %s3787_s2, 3  ;;  %s3469_s28 = sshll.u32 (%p3924_p3), %s538_s26, 6 }
  0x13   : > { %s6443_s30 = sld [smem:[#allocation71_spill]] (%p3924_p3)  ;;  %s540_s21 = scalar_lea.vmem (%p3924_p3), [#allocation4], %s3469_s28 }
  0x19   : > { %s542_s20 = scalar_lea.vmem %s6443_s30, %s3470_s27 }
  0x1a   : > { %v585_v2 = vld [vmem:[%s542_s20] sm:$0xff]  ;;  %v587_v3 = vld [vmem:[%s542_s20 + $0x10] sm:$0xff] }
  0x1b   : > { %v589_v4 = vld [vmem:[%s542_s20 + $0x20] sm:$0xff]  ;;  %586 = vst [vmem:[%s540_s21] sm:$0xff] %v585_v2  ;;  %v591_v5 = vld [vmem:[%s542_s20 + $0x30] sm:$0xff] }
  0x1c   : > { %588 = vst [vmem:[%s540_s21 + $0x8] sm:$0xff] %v587_v3  ;;  %v593_v6 = vld [vmem:[%s542_s20 + $0x40] sm:$0xff]  ;;  %v595_v7 = vld [vmem:[%s542_s20 + $0x50] sm:$0xff] }
  0x1d   : > { %590 = vst [vmem:[%s540_s21 + $0x10] sm:$0xff] %v589_v4  ;;  %v597_v8 = vld [vmem:[%s542_s20 + $0x60] sm:$0xff]  ;;  %v599_v9 = vld [vmem:[%s542_s20 + $0x70] sm:$0xff] }
  0x1e   : > { %592 = vst [vmem:[%s540_s21 + $0x18] sm:$0xff] %v591_v5 }
  0x1f   : > { %594 = vst [vmem:[%s540_s21 + $0x20] sm:$0xff] %v593_v6 }
  0x20   : > { %596 = vst [vmem:[%s540_s21 + $0x28] sm:$0xff] %v595_v7 }
  0x21   : > { %598 = vst [vmem:[%s540_s21 + $0x30] sm:$0xff] %v597_v8 }
  0x22   : > { %600 = vst [vmem:[%s540_s21 + $0x38] sm:$0xff] %v599_v9 }
  0x23 PF: > { %606 = sbr.rel (!%p3924_p3) target bundleno = 49 (0x31), region = 126  ;;  %s608_s23 = sand.u32 (%p3924_p3), 1, %s3783_s22  }
  0x24   : > { %s3472_s24 = sshll.u32 (%p3924_p3), %s3787_s2, 3  ;;  %s3471_s26 = sshll.u32 (%p3924_p3), %s608_s23, 5 }
  0x25   : > { %s6444_s29 = sld [smem:[#allocation72_spill]] (%p3924_p3)  ;;  %s610_s30 = scalar_lea.vmem (%p3924_p3), [#allocation5], %s3471_s26 }
  0x2b   : > { %s612_s0 = scalar_lea.vmem %s6444_s29, %s3472_s24 }
  0x2c   : > { %v647_v10 = vld [vmem:[%s612_s0] sm:$0xff]  ;;  %v649_v11 = vld [vmem:[%s612_s0 + $0x10] sm:$0xff] }
  0x2d   : > { %v651_v12 = vld [vmem:[%s612_s0 + $0x20] sm:$0xff]  ;;  %648 = vst [vmem:[%s610_s30] sm:$0xff] %v647_v10  ;;  %v653_v13 = vld [vmem:[%s612_s0 + $0x30] sm:$0xff] }
  0x2e   : > { %650 = vst [vmem:[%s610_s30 + $0x8] sm:$0xff] %v649_v11 }
  0x2f   : > { %652 = vst [vmem:[%s610_s30 + $0x10] sm:$0xff] %v651_v12 }
  0x30   : > { %654 = vst [vmem:[%s610_s30 + $0x18] sm:$0xff] %v653_v13 }
  0x31 PF: > { %p3473_p5 = scmp.ge.s32.totalorder %s3787_s2, 1  ;;  %p659_p6 = scmp.lt.s32.totalorder %s3787_s2, 3 }
  0x33   : > { %p660_p7 = pnand %p3473_p5, %p659_p6 }
  0x35   : > { %663 = sbr.rel (%p660_p7) target bundleno = 2024 (0x7e8), region = 164 }
  0x3a   : > { %s6445_s21 = sld [smem:[#allocation74_spill]]  ;;  %s6426_s28 = sand.u32 1, %s3779_s1   ;;  %v3789_v17 = vmov 0   ;;  %vm855_vm0 = vcmask 523264   ;;  %v1048_v47 = vld [vmem:[%s6409_s5 + $0x78] sm:$0xff]  ;;  %v1047_v48 = vld [vmem:[%s6409_s5 + $0x70] sm:$0xff] }
  0x3b   : > { %3602 = vset.pattern.permute.xlu2 %v3789_v17  ;;  %3601 = vset.pattern.permute.xlu1 %v3789_v17  ;;  %s3474_s29 = sshll.u32 %s6426_s28, 6  ;;  %s6446_s28 = sld [smem:[#allocation73_spill]]  ;;  %v1045_v53 = vld [vmem:[%s6409_s5 + $0x60] sm:$0xff]  ;;  %v1044_v54 = vld [vmem:[%s6409_s5 + $0x58] sm:$0xff]  ;;  %v1046_v55 = vld [vmem:[%s6409_s5 + $0x68] sm:$0xff] }
  0x3c   : > { %3600 = vset.pattern.permute.xlu0 %v3789_v17  ;;  %s3957_s0 = scalar_lea.vmem [#allocation4], %s3474_s29  ;;  %v1043_v57 = vld [vmem:[%s6409_s5 + $0x50] sm:$0xff]  ;;  %v1064_v59 = vld [vmem:[%s6409_s5 + $0xf8] sm:$0xff]  ;;  %v1062_v61 = vld [vmem:[%s6409_s5 + $0xe8] sm:$0xff]  ;;  %s6498_s3 = sadd.s32 4294967295, %s3787_s2  }
  0x3d   : > { %v742_v18 = vld [vmem:[%s3957_s0 + $0x38] sm:$0xff]  ;;  %v741_v19 = vld [vmem:[%s3957_s0 + $0x30] sm:$0xff]  ;;  %v740_v20 = vld [vmem:[%s3957_s0 + $0x28] sm:$0xff]  ;;  %p731_p8 = scmp.lt.s32.totalorder %s6498_s3, 1  ;;  %s6501_s24 = smov %s6498_s3 }
  0x3e   : > { %912 = vmatpush.msra.mxu0 %v742_v18  ;;  %3544 = vmatpush.msra.mxu3 %v742_v18  ;;  %v739_v22 = vld [vmem:[%s3957_s0 + $0x20] sm:$0xff]  ;;  %v738_v25 = vld [vmem:[%s3957_s0 + $0x18] sm:$0xff]  ;;  %v737_v26 = vld [vmem:[%s3957_s0 + $0x10] sm:$0xff]  ;;  %s6602_s29 = sand.u32 1, %s3779_s1  }
  0x3f   : > { %3543 = vmatpush.msra.mxu2 %v742_v18  ;;  %v736_v27 = vld [vmem:[%s3957_s0 + $0x8] sm:$0xff]  ;;  %v735_v31 = vld [vmem:[%s3957_s0] sm:$0xff]  ;;  %v1040_v1 = vld [vmem:[%s6409_s5 + $0x38] sm:$0xff]  ;;  %s6714_s24 = smov (!%p731_p8, %s6501_s24), 1  ;;  %s5616_s0 = sshll.u32 %s6602_s29, 5 }
  0x40   : > { %v774_v14 = vld [vmem:[%s6445_s21 + $0x78] sm:$0xff]  ;;  %v772_v15 = vld [vmem:[%s6445_s21 + $0x68] sm:$0xff]  ;;  %913 = vmatpush.msra.mxu0 %v741_v19  ;;  %3546 = vmatpush.msra.mxu3 %v741_v19  ;;  %v771_v21 = vld [vmem:[%s6445_s21 + $0x60] sm:$0xff]  ;;  %s3476_s17 = sshll.u32 %s6714_s24, 1  ;;  %s5661_s1 = scalar_lea.vmem [#allocation5], %s5616_s0 }
  0x41   : > { %v770_v16 = vld [vmem:[%s6445_s21 + $0x58] sm:$0xff]  ;;  %842 = vperm.xlu1 %3601, %v772_v15   ;;  %852 = vperm.xlu0 %3600, %v774_v14   ;;  %v773_v23 = vld [vmem:[%s6445_s21 + $0x70] sm:$0xff]  ;;  %v767_v28 = vld [vmem:[%s6445_s21 + $0x40] sm:$0xff]  ;;  %s4854_s27 = scalar_lea.vmem %s6422_s19, %s3476_s17 }
  0x42   : > { %832 = vperm.xlu2 %3602, %v770_v16   ;;  %3545 = vmatpush.msra.mxu2 %v741_v19  ;;  %v769_v24 = vld [vmem:[%s6445_s21 + $0x50] sm:$0xff]  ;;  %v768_v29 = vld [vmem:[%s6445_s21 + $0x48] sm:$0xff]  ;;  %v766_v30 = vld [vmem:[%s6445_s21 + $0x38] sm:$0xff] }
  0x43   : > { %914 = vmatpush.msra.mxu0 %v740_v20  ;;  %3548 = vmatpush.msra.mxu3 %v740_v20  ;;  %v743_v32 = vld [vmem:[%s6446_s28] sm:$0xff]  ;;  %v764_v35 = vld [vmem:[%s6445_s21 + $0x28] sm:$0xff]  ;;  %v765_v36 = vld [vmem:[%s6445_s21 + $0x30] sm:$0xff] }
  0x44   : > { %3547 = vmatpush.msra.mxu2 %v740_v20  ;;  %v755_v33 = vld [vmem:[%s6446_s28 + $0x60] sm:$0xff]  ;;  %v744_v38 = vld [vmem:[%s6446_s28 + $0x8] sm:$0xff]  ;;  %v761_v41 = vld [vmem:[%s6445_s21 + $0x10] sm:$0xff] }
  0x45   : > { %915 = vmatpush.msra.mxu0 %v739_v22  ;;  %3550 = vmatpush.msra.mxu3 %v739_v22  ;;  %v751_v34 = vld [vmem:[%s6446_s28 + $0x40] sm:$0xff]  ;;  %v756_v39 = vld [vmem:[%s6446_s28 + $0x68] sm:$0xff]  ;;  %v762_v42 = vld [vmem:[%s6445_s21 + $0x18] sm:$0xff] }
  0x46   : > { %3549 = vmatpush.msra.mxu2 %v739_v22  ;;  %v763_v37 = vld [vmem:[%s6445_s21 + $0x20] sm:$0xff]  ;;  %v752_v40 = vld [vmem:[%s6446_s28 + $0x48] sm:$0xff]  ;;  %v745_v44 = vld [vmem:[%s6446_s28 + $0x10] sm:$0xff] }
  0x47   : > { %916 = vmatpush.msra.mxu0 %v738_v25  ;;  %3552 = vmatpush.msra.mxu3 %v738_v25  ;;  %v760_v43 = vld [vmem:[%s6445_s21 + $0x8] sm:$0xff]  ;;  %v757_v45 = vld [vmem:[%s6446_s28 + $0x70] sm:$0xff]  ;;  %v759_v49 = vld [vmem:[%s6445_s21] sm:$0xff] }
  0x48   : > { %3551 = vmatpush.msra.mxu2 %v738_v25  ;;  %v753_v46 = vld [vmem:[%s6446_s28 + $0x50] sm:$0xff]  ;;  %v746_v50 = vld [vmem:[%s6446_s28 + $0x18] sm:$0xff]  ;;  %v747_v56 = vld [vmem:[%s6446_s28 + $0x20] sm:$0xff] }
  0x49   : > { %837 = vperm.xlu1 %3601, %v771_v21   ;;  %847 = vperm.xlu0 %3600, %v773_v23   ;;  %v758_v51 = vld [vmem:[%s6446_s28 + $0x78] sm:$0xff]  ;;  %v1063_v58 = vld [vmem:[%s6409_s5 + $0xf0] sm:$0xff]  ;;  %v748_v60 = vld [vmem:[%s6446_s28 + $0x28] sm:$0xff] }
  0x4a   : > { %827 = vperm.xlu2 %3602, %v769_v24   ;;  %917 = vmatpush.msra.mxu0 %v737_v26  ;;  %v754_v52 = vld [vmem:[%s6446_s28 + $0x58] sm:$0xff]  ;;  %v1041_v62 = vld [vmem:[%s6409_s5 + $0x40] sm:$0xff]  ;;  %v1042_v63 = vld [vmem:[%s6409_s5 + $0x48] sm:$0xff] }
  0x4b   : > { %3554 = vmatpush.msra.mxu3 %v737_v26  ;;  %3553 = vmatpush.msra.mxu2 %v737_v26  ;;  %v749_v0 = vld [vmem:[%s6446_s28 + $0x30] sm:$0xff]  ;;  %v1060_v2 = vld [vmem:[%s6409_s5 + $0xd8] sm:$0xff]  ;;  %v1061_v3 = vld [vmem:[%s6409_s5 + $0xe0] sm:$0xff] }
  0x4c   : > { %918 = vmatpush.msra.mxu0 %v736_v27  ;;  %v750_v4 = vld [vmem:[%s6446_s28 + $0x38] sm:$0xff]  ;;  %v1059_v5 = vld [vmem:[%s6409_s5 + $0xd0] sm:$0xff]  ;;  %v1038_v6 = vld [vmem:[%s6409_s5 + $0x28] sm:$0xff] }
  0x4d   : > { %3556 = vmatpush.msra.mxu3 %v736_v27  ;;  %3555 = vmatpush.msra.mxu2 %v736_v27  ;;  %v1039_v7 = vld [vmem:[%s6409_s5 + $0x30] sm:$0xff]  ;;  %v1037_v8 = vld [vmem:[%s6409_s5 + $0x20] sm:$0xff]  ;;  %v1058_v10 = vld [vmem:[%s6409_s5 + $0xc8] sm:$0xff] }
  0x4e   : > { %919 = vmatpush.msra.mxu0 %v735_v31  ;;  %v1057_v9 = vld [vmem:[%s6409_s5 + $0xc0] sm:$0xff]  ;;  %v1056_v11 = vld [vmem:[%s6409_s5 + $0xb8] sm:$0xff]  ;;  %v1035_v12 = vld [vmem:[%s6409_s5 + $0x10] sm:$0xff] }
  0x4f   : > { %3558 = vmatpush.msra.mxu3 %v735_v31  ;;  %3477 = vmatmul.msk.f32.vlgmr.msra.gmra.mxu0 %vm855_vm0, %v743_v32  ;;  %v1036_v13 = vld [vmem:[%s6409_s5 + $0x18] sm:$0xff]  ;;  %v1034_v14 = vld [vmem:[%s6409_s5 + $0x8] sm:$0xff]  ;;  %v1055_v16 = vld [vmem:[%s6409_s5 + $0xb0] sm:$0xff] }
  0x50   : > { %3489 = vmatmul.msk.f32.vlgmr.msra.gmra.mxu3 %vm855_vm0, %v755_v33  ;;  %3557 = vmatpush.msra.mxu2 %v735_v31  ;;  %v1054_v15 = vld [vmem:[%s6409_s5 + $0xa8] sm:$0xff]  ;;  %v1080_v17 = vld [vmem:[%s6409_s5 + $0x178] sm:$0xff]  ;;  %v1033_v19 = vld [vmem:[%s6409_s5] sm:$0xff] }
  0x51   : > { %817 = vperm.xlu1 %3601, %v767_v28   ;;  %822 = vperm.xlu0 %3600, %v768_v29   ;;  %v2105_v18 = vld [vmem:[%s6410_s6 + $0x78] sm:$0xff]  ;;  %v1079_v21 = vld [vmem:[%s6409_s5 + $0x170] sm:$0xff]  ;;  %v1053_v23 = vld [vmem:[%s6409_s5 + $0xa0] sm:$0xff] }
  0x52   : > { %812 = vperm.xlu2 %3602, %v766_v30   ;;  %3485 = vmatmul.msk.f32.vlgmr.msra.gmra.mxu2 %vm855_vm0, %v751_v34  ;;  %v2104_v22 = vld [vmem:[%s6410_s6 + $0x70] sm:$0xff]  ;;  %v1078_v25 = vld [vmem:[%s6409_s5 + $0x168] sm:$0xff]  ;;  %v1052_v27 = vld [vmem:[%s6409_s5 + $0x98] sm:$0xff] }
  0x53   : > { %v2103_v26 = vld [vmem:[%s6410_s6 + $0x68] sm:$0xff]  ;;  %v1077_v29 = vld [vmem:[%s6409_s5 + $0x160] sm:$0xff]  ;;  %v1051_v31 = vld [vmem:[%s6409_s5 + $0x90] sm:$0xff] }
  0x54   : > { %v2102_v30 = vld [vmem:[%s6410_s6 + $0x60] sm:$0xff]  ;;  %v1076_v33 = vld [vmem:[%s6409_s5 + $0x158] sm:$0xff] }
  0x55   : > { %v2101_v34 = vld [vmem:[%s6410_s6 + $0x58] sm:$0xff] }
  0x57   : > { %3478 = vmatmul.msk.f32.gmra.mxu0 %vm855_vm0, %v744_v38  ;;  %v1075_v38 = vld [vmem:[%s6409_s5 + $0x150] sm:$0xff] }
  0x58   : > { %3490 = vmatmul.msk.f32.gmra.mxu3 %vm855_vm0, %v756_v39 }
  0x59   : > { %802 = vperm.xlu1 %3601, %v764_v35   ;;  %807 = vperm.xlu0 %3600, %v765_v36   ;;  %v1050_v35 = vld [vmem:[%s6409_s5 + $0x88] sm:$0xff] }
  0x5a   : > { %797 = vperm.xlu2 %3602, %v763_v37   ;;  %3486 = vmatmul.msk.f32.gmra.mxu2 %vm855_vm0, %v752_v40  ;;  %v2100_v40 = vld [vmem:[%s6410_s6 + $0x50] sm:$0xff] }
  0x5f   : > { %3479 = vmatmul.msk.f32.gmra.mxu0 %vm855_vm0, %v745_v44 }
  0x60   : > { %3491 = vmatmul.msk.f32.gmra.mxu3 %vm855_vm0, %v757_v45  ;;  %v2099_v45 = vld [vmem:[%s6410_s6 + $0x48] sm:$0xff] }
  0x61   : > { %787 = vperm.xlu1 %3601, %v761_v41   ;;  %792 = vperm.xlu0 %3600, %v762_v42   ;;  %v1049_v41 = vld [vmem:[%s6409_s5 + $0x80] sm:$0xff] }
  0x62   : > { %782 = vperm.xlu2 %3602, %v760_v43   ;;  %3487 = vmatmul.msk.f32.gmra.mxu2 %vm855_vm0, %v753_v46 }
  0x67   : > { %3480 = vmatmul.msk.f32.gmra.mxu0 %vm855_vm0, %v746_v50 }
  0x68   : > { %3492 = vmatmul.msk.f32.gmra.mxu3 %vm855_vm0, %v758_v51 }
  0x69   : > { %1158 = vperm.xlu1 %3601, %v1048_v47   ;;  %777 = vperm.xlu0 %3600, %v759_v49   ;;  %v1073_v47 = vld [vmem:[%s6409_s5 + $0x140] sm:$0xff] }
  0x6a   : > { %1153 = vperm.xlu2 %3602, %v1047_v48   ;;  %3488 = vmatmul.msk.f32.gmra.mxu2 %vm855_vm0, %v754_v52  ;;  %v1074_v48 = vld [vmem:[%s6409_s5 + $0x148] sm:$0xff] }
  0x6f   : > { %3481 = vmatmul.msk.f32.gmra.mxu0 %vm855_vm0, %v747_v56  ;;  %v2098_v56 = vld [vmem:[%s6410_s6 + $0x40] sm:$0xff] }
  0x71   : > { %1143 = vperm.xlu1 %3601, %v1045_v53   ;;  %1148 = vperm.xlu0 %3600, %v1046_v55   ;;  %v1072_v53 = vld [vmem:[%s6409_s5 + $0x138] sm:$0xff] }
  0x72   : > { %1138 = vperm.xlu2 %3602, %v1044_v54   ;;  %v2097_v55 = vld [vmem:[%s6410_s6 + $0x38] sm:$0xff] }
  0x77   : > { %3482 = vmatmul.msk.f32.gmra.mxu0 %vm855_vm0, %v748_v60 }
  0x79   : > { %1133 = vperm.xlu1 %3601, %v1043_v57   ;;  %1238 = vperm.xlu0 %3600, %v1064_v59  }
  0x7a   : > { %1233 = vperm.xlu2 %3602, %v1063_v58  }
  0x7f   : > { %3483 = vmatmul.msk.f32.gmra.mxu0 %vm855_vm0, %v749_v0  ;;  %v1070_v0 = vld [vmem:[%s6409_s5 + $0x128] sm:$0xff] }
  0x81   : > { %1228 = vperm.xlu1 %3601, %v1062_v61   ;;  %1128 = vperm.xlu0 %3600, %v1042_v63  }
  0x82   : > { %1123 = vperm.xlu2 %3602, %v1041_v62   ;;  %v2096_v62 = vld [vmem:[%s6410_s6 + $0x30] sm:$0xff] }
  0x87   : > { %3484 = vmatmul.msk.f32.gmra.mxu0 %vm855_vm0, %v750_v4 }
  0x89   : > { %1118 = vperm.xlu1 %3601, %v1040_v1   ;;  %1223 = vperm.xlu0 %3600, %v1061_v3   ;;  %v1071_v1 = vld [vmem:[%s6409_s5 + $0x130] sm:$0xff] }
  0x8a   : > { %1218 = vperm.xlu2 %3602, %v1060_v2  }
  0x91   : > { %1213 = vperm.xlu1 %3601, %v1059_v5   ;;  %1113 = vperm.xlu0 %3600, %v1039_v7  }
  0x92   : > { %1108 = vperm.xlu2 %3602, %v1038_v6  }
  0x99   : > { %1103 = vperm.xlu1 %3601, %v1037_v8   ;;  %1208 = vperm.xlu0 %3600, %v1058_v10  }
  0x9a   : > { %1203 = vperm.xlu2 %3602, %v1057_v9  }
  0x9c   : > { %v833_v58 = vpop.permute.xlu2 %832 }
  0xa1   : > { %1198 = vperm.xlu1 %3601, %v1056_v11   ;;  %1098 = vperm.xlu0 %3600, %v1036_v13  }
  0xa2   : > { %1093 = vperm.xlu2 %3602, %v1035_v12  }
  0xa4   : > { %v828_v9 = vpop.permute.xlu2 %827 }
  0xa9   : > { %1088 = vperm.xlu1 %3601, %v1034_v14   ;;  %1193 = vperm.xlu0 %3600, %v1055_v16  }
  0xaa   : > { %1188 = vperm.xlu2 %3602, %v1054_v15   ;;  %v1069_v15 = vld [vmem:[%s6409_s5 + $0x120] sm:$0xff] }
  0xb1   : > { %1318 = vperm.xlu1 %3601, %v1080_v17   ;;  %1083 = vperm.xlu0 %3600, %v1033_v19   ;;  %v2095_v19 = vld [vmem:[%s6410_s6 + $0x28] sm:$0xff] }
  0xb2   : > { %2183 = vperm.xlu2 %3602, %v2105_v18   ;;  %v2094_v18 = vld [vmem:[%s6410_s6 + $0x20] sm:$0xff] }
  0xb3   : > { %v4157_v20 = vpop.permute.xlu1 %842  ;;  %v853_v49 = vpop.permute.xlu0 %852 }
  0xb9   : > { %1313 = vperm.xlu1 %3601, %v1079_v21   ;;  %1183 = vperm.xlu0 %3600, %v1053_v23  }
  0xba   : > { %2178 = vperm.xlu2 %3602, %v2104_v22  }
  0xbb   : > { %v4168_v24 = vpop.permute.xlu1 %837  ;;  %v848_v59 = vpop.permute.xlu0 %847 }
  0xc1   : > { %1308 = vperm.xlu1 %3601, %v1078_v25   ;;  %1178 = vperm.xlu0 %3600, %v1052_v27  }
  0xc2   : > { %2173 = vperm.xlu2 %3602, %v2103_v26   ;;  %v813_v26 = vpop.permute.xlu2 %812 }
  0xc3   : > { %v4179_v28 = vpop.permute.xlu1 %817  ;;  %v823_v12 = vpop.permute.xlu0 %822 }
  0xc9   : > { %1303 = vperm.xlu1 %3601, %v1077_v29   ;;  %1173 = vperm.xlu0 %3600, %v1051_v31   ;;  %v2093_v29 = vld [vmem:[%s6410_s6 + $0x18] sm:$0xff] }
  0xca   : > { %2168 = vperm.xlu2 %3602, %v2102_v30  }
  0xcb   : > { %v4190_v32 = vpop.permute.xlu1 %802  ;;  %v808_v30 = vpop.permute.xlu0 %807 }
  0xcc   : > { %v4201_v36 = vpop.f32.mrf.mxu0 }
  0xd1   : > { %1298 = vperm.xlu1 %3601, %v1076_v33   ;;  %1168 = vperm.xlu0 %3600, %v1050_v35   ;;  %v1067_v33 = vld [vmem:[%s6409_s5 + $0x110] sm:$0xff] }
  0xd2   : > { %2163 = vperm.xlu2 %3602, %v2101_v34  }
  0xd3   : > { %v4203_v37 = vpop.permute.xlu1 %787  ;;  %v957_v39 = vpop.f32.mrf.mxu3 }
  0xd4   : > { %v4214_v42 = vpop.f32.mrf.mxu0  ;;  %v958_v10 = vadd.f32 %v957_v39, %v4168_v24  ;;  %v798_v39 = vpop.permute.xlu2 %797 }
  0xd5   : > { %v4218_v44 = vpop.f32.mrf.mxu2 }
  0xd6   : > { %v981_v17 = vmax.f32 %v958_v10, 0.0  ;;  %v946_v24 = vadd.f32 %v4218_v44, %v4179_v28  ;;  %v1068_v28 = vld [vmem:[%s6409_s5 + $0x118] sm:$0xff]  ;;  %v793_v44 = vpop.permute.xlu0 %792  ;;  %v2491_v10 = vld [vmem:[%s6413_s9 + $0x50] sm:$0xff] }
  0xd8   : > { %v977_v31 = vmax.f32 %v946_v24, 0.0  ;;  %v2484_v24 = vld [vmem:[%s6413_s9 + $0x18] sm:$0xff] }
  0xd9   : > { %1293 = vperm.xlu1 %3601, %v1075_v38   ;;  %1163 = vperm.xlu0 %3600, %v1049_v41   ;;  %v1066_v38 = vld [vmem:[%s6409_s5 + $0x108] sm:$0xff]  ;;  %v2092_v41 = vld [vmem:[%s6410_s6 + $0x10] sm:$0xff] }
  0xda   : > { %2158 = vperm.xlu2 %3602, %v2100_v40   ;;  %v2091_v40 = vld [vmem:[%s6410_s6 + $0x8] sm:$0xff] }
  0xdb   : > { %v4216_v43 = vpop.permute.xlu1 %1158  ;;  %v960_v46 = vpop.f32.mrf.mxu3 }
  0xdc   : > { %v4229_v50 = vpop.f32.mrf.mxu0  ;;  %v961_v5 = vadd.f32 %v960_v46, %v4157_v20 }
  0xdd   : > { %v948_v52 = vpop.f32.mrf.mxu2 }
  0xde   : > { %v982_v14 = vmax.f32 %v961_v5, 0.0  ;;  %v949_v21 = vadd.f32 %v948_v52, %v823_v12  ;;  %v2493_v5 = vld [vmem:[%s6413_s9 + $0x60] sm:$0xff]  ;;  %v2492_v12 = vld [vmem:[%s6413_s9 + $0x58] sm:$0xff] }
  0xe0   : > { %v978_v27 = vmax.f32 %v949_v21, 0.0 }
  0xe1   : > { %2153 = vperm.xlu1 %3601, %v2099_v45   ;;  %1288 = vperm.xlu0 %3600, %v1074_v48  }
  0xe2   : > { %1283 = vperm.xlu2 %3602, %v1073_v47  }
  0xe3   : > { %v4231_v51 = vpop.permute.xlu1 %1143  ;;  %v963_v54 = vpop.f32.mrf.mxu3 }
  0xe4   : > { %v4242_v57 = vpop.f32.mrf.mxu0  ;;  %v964_v2 = vadd.f32 %v963_v54, %v848_v59  ;;  %v2496_v59 = vld [vmem:[%s6413_s9 + $0x78] sm:$0xff] }
  0xe5   : > { %v951_v61 = vpop.f32.mrf.mxu2 }
  0xe6   : > { %v983_v11 = vmax.f32 %v964_v2, 0.0  ;;  %v952_v16 = vadd.f32 %v951_v61, %v828_v9  ;;  %v783_v61 = vpop.permute.xlu2 %782 }
  0xe8   : > { %v979_v25 = vmax.f32 %v952_v16, 0.0  ;;  %v2488_v16 = vld [vmem:[%s6413_s9 + $0x38] sm:$0xff] }
  0xe9   : > { %1278 = vperm.xlu1 %3601, %v1072_v53   ;;  %2148 = vperm.xlu0 %3600, %v2098_v56   ;;  %v931_v56 = vadd.f32 %v4242_v57, %v793_v44  ;;  %v778_v57 = vpop.permute.xlu0 %777  ;;  %v990_v44 = vld [vmem:[%s6408_s4 + $0x28] sm:$0xff] }
  0xea   : > { %2143 = vperm.xlu2 %3602, %v2097_v55   ;;  %v2090_v55 = vld [vmem:[%s6410_s6] sm:$0xff] }
  0xeb   : > { %v4244_v60 = vpop.permute.xlu1 %1133  ;;  %v966_v63 = vpop.f32.mrf.mxu3  ;;  %v972_v2 = vmax.f32 %v931_v56, 0.0 }
  0xec   : > { %v967_v3 = vadd.f32 %v966_v63, %v853_v49  ;;  %v4255_v4 = vpop.f32.mrf.mxu0 }
  0xed   : > { %v954_v8 = vpop.f32.mrf.mxu2  ;;  %v934_v53 = vadd.f32 %v4255_v4, %v798_v39  ;;  %v2671_v39 = vld [vmem:[%s6415_s11 + $0x70] sm:$0xff] }
  0xee   : > { %v984_v6 = vmax.f32 %v967_v3, 0.0  ;;  %v955_v13 = vadd.f32 %v954_v8, %v833_v58  ;;  %v922_v3 = vadd.f32 %v4201_v36, %v778_v57  ;;  %v998_v8 = vld [vmem:[%s6408_s4 + $0x68] sm:$0xff] }
  0xef   : > { %v973_v63 = vmax.f32 %v934_v53, 0.0 }
  0xf0   : > { %1321 = vmatpush.msrb.mxu0 %v984_v6  ;;  %3559 = vmatpush.msra.mxu1 %v984_v6  ;;  %v980_v22 = vmax.f32 %v955_v13, 0.0  ;;  %v969_v36 = vmax.f32 %v922_v3, 0.0  ;;  %v985_v6 = vld [vmem:[%s6408_s4] sm:$0xff]  ;;  %v986_v13 = vld [vmem:[%s6408_s4 + $0x8] sm:$0xff]  ;;  %v2663_v3 = vld [vmem:[%s6415_s11 + $0x30] sm:$0xff] }
  0xf1   : > { %2138 = vperm.xlu1 %3601, %v2096_v62   ;;  %1273 = vperm.xlu0 %3600, %v1071_v1   ;;  %v928_v62 = vadd.f32 %v4229_v50, %v4203_v37  ;;  %v925_v1 = vadd.f32 %v4214_v42, %v783_v61  ;;  %v2494_v37 = vld [vmem:[%s6413_s9 + $0x68] sm:$0xff]  ;;  %v2495_v42 = vld [vmem:[%s6413_s9 + $0x70] sm:$0xff]  ;;  %v4425_v53 = vpop.permute.xlu0 %1148  ;;  %v992_v61 = vld [vmem:[%s6408_s4 + $0x38] sm:$0xff] }
  0xf2   : > { %1268 = vperm.xlu2 %3602, %v1070_v0   ;;  %1322 = vmatpush.msrb.mxu0 %v983_v11 }
  0xf3   : > { %v4258_v7 = vpop.permute.xlu1 %1228  ;;  %3560 = vmatpush.msra.mxu1 %v983_v11  ;;  %v971_v4 = vmax.f32 %v928_v62, 0.0  ;;  %v970_v50 = vmax.f32 %v925_v1, 0.0  ;;  %v2490_v11 = vld [vmem:[%s6413_s9 + $0x48] sm:$0xff]  ;;  %v1005_v62 = vld [vmem:[%s6408_s4 + $0xa0] sm:$0xff] }
  0xf4   : > { %6447 = vst [vmem:[#allocation6_spill] sm:$0xff] %v4258_v7  ;;  %1323 = vmatpush.msrb.mxu0 %v982_v14  ;;  %v936_v20 = vpop.f32.mrf.mxu0  ;;  %v2662_v1 = vld [vmem:[%s6415_s11 + $0x28] sm:$0xff] }
  0xf5   : > { %3561 = vmatpush.msra.mxu1 %v982_v14  ;;  %v937_v49 = vadd.f32 %v936_v20, %v4190_v32  ;;  %v1065_v32 = vld [vmem:[%s6409_s5 + $0x100] sm:$0xff]  ;;  %v999_v14 = vld [vmem:[%s6408_s4 + $0x70] sm:$0xff]  ;;  %v1000_v20 = vld [vmem:[%s6408_s4 + $0x78] sm:$0xff] }
  0xf6   : > { %1324 = vmatpush.msrb.mxu0 %v981_v17 }
  0xf7   : > { %3562 = vmatpush.msra.mxu1 %v981_v17  ;;  %v974_v58 = vmax.f32 %v937_v49, 0.0  ;;  %v2487_v17 = vld [vmem:[%s6413_s9 + $0x30] sm:$0xff] }
  0xf8   : > { %1325 = vmatpush.msrb.mxu0 %v980_v22  ;;  %v2667_v49 = vld [vmem:[%s6415_s11 + $0x50] sm:$0xff] }
  0xf9   : > { %1263 = vperm.xlu1 %3601, %v1069_v15   ;;  %2133 = vperm.xlu0 %3600, %v2095_v19   ;;  %v987_v19 = vld [vmem:[%s6408_s4 + $0x10] sm:$0xff] }
  0xfa   : > { %2128 = vperm.xlu2 %3602, %v2094_v18   ;;  %3563 = vmatpush.msra.mxu1 %v980_v22  ;;  %v2489_v18 = vld [vmem:[%s6413_s9 + $0x40] sm:$0xff] }
  0xfb   : > { %v4270_v23 = vpop.permute.xlu1 %1118  ;;  %1326 = vmatpush.msrb.mxu0 %v979_v25  ;;  %v2485_v22 = vld [vmem:[%s6413_s9 + $0x20] sm:$0xff] }
  0xfc   : > { %3564 = vmatpush.msra.mxu1 %v979_v25  ;;  %v939_v34 = vpop.f32.mrf.mxu0  ;;  %v2486_v25 = vld [vmem:[%s6413_s9 + $0x28] sm:$0xff] }
  0xfd   : > { %1327 = vmatpush.msrb.mxu0 %v978_v27  ;;  %v940_v46 = vadd.f32 %v939_v34, %v808_v30  ;;  %v2482_v30 = vld [vmem:[%s6413_s9 + $0x8] sm:$0xff] }
  0xfe   : > { %3565 = vmatpush.msra.mxu1 %v978_v27  ;;  %v1001_v27 = vld [vmem:[%s6408_s4 + $0x80] sm:$0xff]  ;;  %v1002_v34 = vld [vmem:[%s6408_s4 + $0x88] sm:$0xff] }
  0xff   : > { %1328 = vmatpush.msrb.mxu0 %v977_v31  ;;  %v975_v54 = vmax.f32 %v940_v46, 0.0 }
 0x100   : > { %3566 = vmatpush.msra.mxu1 %v977_v31  ;;  %v2481_v31 = vld [vmem:[%s6413_s9] sm:$0xff] }
 0x101   : > { %2123 = vperm.xlu1 %3601, %v2093_v29   ;;  %1258 = vperm.xlu0 %3600, %v1068_v28   ;;  %v989_v28 = vld [vmem:[%s6408_s4 + $0x20] sm:$0xff] }
 0x102   : > { %1253 = vperm.xlu2 %3602, %v1067_v33   ;;  %v2483_v33 = vld [vmem:[%s6413_s9 + $0x10] sm:$0xff] }
 0x103   : > { %v4283_v35 = vpop.permute.xlu1 %1213 }
 0x104   : > { %6448 = vst [vmem:[#allocation7_spill] sm:$0xff] %v4283_v35  ;;  %v942_v45 = vpop.f32.mrf.mxu0 }
 0x105   : > { %v943_v47 = vadd.f32 %v942_v45, %v813_v26  ;;  %v988_v26 = vld [vmem:[%s6408_s4 + $0x18] sm:$0xff]  ;;  %v1003_v45 = vld [vmem:[%s6408_s4 + $0x90] sm:$0xff] }
 0x107   : > { %v976_v52 = vmax.f32 %v943_v47, 0.0  ;;  %v2668_v47 = vld [vmem:[%s6415_s11 + $0x58] sm:$0xff] }
 0x109   : > { %1248 = vperm.xlu1 %3601, %v1066_v38   ;;  %2118 = vperm.xlu0 %3600, %v2092_v41   ;;  %v2672_v41 = vld [vmem:[%s6415_s11 + $0x78] sm:$0xff] }
 0x10a   : > { %2113 = vperm.xlu2 %3602, %v2091_v40   ;;  %1329 = vmatpush.msrb.mxu0 %v976_v52  ;;  %v2670_v40 = vld [vmem:[%s6415_s11 + $0x68] sm:$0xff] }
 0x10b   : > { %v4294_v48 = vpop.permute.xlu1 %1103  ;;  %3567 = vmatpush.msra.mxu1 %v976_v52  ;;  %v2669_v52 = vld [vmem:[%s6415_s11 + $0x60] sm:$0xff] }
 0x10c   : > { %1330 = vmatpush.msrb.mxu0 %v975_v54 }
 0x10d   : > { %3568 = vmatpush.msra.mxu1 %v975_v54  ;;  %v991_v54 = vld [vmem:[%s6408_s4 + $0x30] sm:$0xff] }
 0x10e   : > { %1331 = vmatpush.msrb.mxu0 %v974_v58 }
 0x10f   : > { %3569 = vmatpush.msra.mxu1 %v974_v58  ;;  %v2665_v58 = vld [vmem:[%s6415_s11 + $0x40] sm:$0xff] }
 0x110   : > { %1332 = vmatpush.msrb.mxu0 %v973_v63 }
 0x111   : > { %2108 = vperm.xlu1 %3601, %v2090_v55   ;;  %1243 = vperm.xlu0 %3600, %v1065_v32   ;;  %v1004_v55 = vld [vmem:[%s6408_s4 + $0x98] sm:$0xff]  ;;  %v2666_v32 = vld [vmem:[%s6415_s11 + $0x48] sm:$0xff] }
 0x112   : > { %2574 = vperm.xlu2 %3602, %v2496_v59   ;;  %3570 = vmatpush.msra.mxu1 %v973_v63  ;;  %v2664_v59 = vld [vmem:[%s6415_s11 + $0x38] sm:$0xff]  ;;  %v4450_v63 = vpop.permute.xlu0 %1238 }
 0x113   : > { %v4310_v0 = vpop.permute.xlu1 %1198  ;;  %1333 = vmatpush.msrb.mxu0 %v972_v2  ;;  %6455 = vst [vmem:[#allocation14_spill] sm:$0xff] %v4450_v63 }
 0x114   : > { %3571 = vmatpush.msra.mxu1 %v972_v2  ;;  %v2661_v2 = vld [vmem:[%s6415_s11 + $0x20] sm:$0xff] }
 0x115   : > { %1334 = vmatpush.msrb.mxu0 %v971_v4 }
 0x116   : > { %3572 = vmatpush.msra.mxu1 %v971_v4  ;;  %v993_v4 = vld [vmem:[%s6408_s4 + $0x40] sm:$0xff] }
 0x117   : > { %1335 = vmatpush.msrb.mxu0 %v970_v50 }
 0x118   : > { %3573 = vmatpush.msra.mxu1 %v970_v50 }
 0x119   : > { %2564 = vperm.xlu1 %3601, %v2494_v37   ;;  %2569 = vperm.xlu0 %3600, %v2495_v42   ;;  %v1006_v37 = vld [vmem:[%s6408_s4 + $0xa8] sm:$0xff]  ;;  %v2659_v42 = vld [vmem:[%s6415_s11 + $0x10] sm:$0xff] }
 0x11a   : > { %2559 = vperm.xlu2 %3602, %v2493_v5   ;;  %1336 = vmatpush.msrb.mxu0 %v969_v36  ;;  %v4471_v5 = vpop.permute.xlu0 %1128 }
 0x11b   : > { %v4329_v9 = vpop.permute.xlu1 %1088  ;;  %3574 = vmatpush.msra.mxu1 %v969_v36  ;;  %1337 = vmatmul.f32.vlgmr.msrb.gmra.mxu0 %v985_v6  ;;  %v2658_v36 = vld [vmem:[%s6415_s11 + $0x8] sm:$0xff]  ;;  %v2660_v6 = vld [vmem:[%s6415_s11 + $0x18] sm:$0xff] }
 0x11c   : > { %1376 = vmatmul.f32.vlgmr.msra.gmra.mxu1 %v998_v8  ;;  %v994_v8 = vld [vmem:[%s6408_s4 + $0x48] sm:$0xff] }
 0x121   : > { %2549 = vperm.xlu1 %3601, %v2491_v10   ;;  %2554 = vperm.xlu0 %3600, %v2492_v12   ;;  %v1007_v10 = vld [vmem:[%s6408_s4 + $0xb0] sm:$0xff]  ;;  %v2913_v12 = vld [vmem:[%s6417_s13 + $0x78] sm:$0xff] }
 0x122   : > { %2544 = vperm.xlu2 %3602, %v2490_v11  }
 0x123   : > { %v4346_v15 = vpop.permute.xlu1 %1318  ;;  %1340 = vmatmul.f32.gmra.mxu0 %v986_v13  ;;  %v4493_v13 = vpop.permute.xlu0 %1223 }
 0x124   : > { %6449 = vst [vmem:[#allocation8_spill] sm:$0xff] %v4346_v15  ;;  %1379 = vmatmul.f32.gmra.mxu1 %v999_v14  ;;  %v2912_v14 = vld [vmem:[%s6417_s13 + $0x70] sm:$0xff] }
 0x125   : > { %6458 = vst [vmem:[#allocation17_spill] sm:$0xff] %v4493_v13 }
 0x129   : > { %2534 = vperm.xlu1 %3601, %v2488_v16   ;;  %2539 = vperm.xlu0 %3600, %v2489_v18   ;;  %v2657_v16 = vld [vmem:[%s6415_s11] sm:$0xff]  ;;  %v1008_v18 = vld [vmem:[%s6408_s4 + $0xb8] sm:$0xff] }
 0x12a   : > { %2529 = vperm.xlu2 %3602, %v2487_v17   ;;  %v995_v17 = vld [vmem:[%s6408_s4 + $0x50] sm:$0xff] }
 0x12b   : > { %v4363_v21 = vpop.permute.xlu1 %1313  ;;  %1343 = vmatmul.f32.gmra.mxu0 %v987_v19 }
 0x12c   : > { %6450 = vst [vmem:[#allocation9_spill] sm:$0xff] %v4363_v21  ;;  %1382 = vmatmul.f32.gmra.mxu1 %v1000_v20  ;;  %v2910_v20 = vld [vmem:[%s6417_s13 + $0x60] sm:$0xff] }
 0x131   : > { %2519 = vperm.xlu1 %3601, %v2485_v22   ;;  %2524 = vperm.xlu0 %3600, %v2486_v25   ;;  %v2909_v22 = vld [vmem:[%s6417_s13 + $0x58] sm:$0xff]  ;;  %v4518_v25 = vpop.permute.xlu0 %1113 }
 0x132   : > { %2514 = vperm.xlu2 %3602, %v2484_v24   ;;  %v2911_v24 = vld [vmem:[%s6417_s13 + $0x68] sm:$0xff] }
 0x133   : > { %v4380_v29 = vpop.permute.xlu1 %1308  ;;  %1346 = vmatmul.f32.gmra.mxu0 %v988_v26  ;;  %v996_v26 = vld [vmem:[%s6408_s4 + $0x58] sm:$0xff] }
 0x134   : > { %6451 = vst [vmem:[#allocation10_spill] sm:$0xff] %v4380_v29  ;;  %1385 = vmatmul.f32.gmra.mxu1 %v1001_v27  ;;  %v1009_v27 = vld [vmem:[%s6408_s4 + $0xc0] sm:$0xff] }
 0x139   : > { %2504 = vperm.xlu1 %3601, %v2482_v30   ;;  %2509 = vperm.xlu0 %3600, %v2483_v33   ;;  %v2906_v33 = vld [vmem:[%s6417_s13 + $0x40] sm:$0xff] }
 0x13a   : > { %2499 = vperm.xlu2 %3602, %v2481_v31   ;;  %v2907_v31 = vld [vmem:[%s6417_s13 + $0x48] sm:$0xff] }
 0x13b   : > { %v4397_v38 = vpop.permute.xlu1 %1303  ;;  %1349 = vmatmul.f32.gmra.mxu0 %v989_v28  ;;  %v2908_v28 = vld [vmem:[%s6417_s13 + $0x50] sm:$0xff] }
 0x13c   : > { %6452 = vst [vmem:[#allocation11_spill] sm:$0xff] %v4397_v38  ;;  %1388 = vmatmul.f32.gmra.mxu1 %v1002_v34  ;;  %v997_v34 = vld [vmem:[%s6408_s4 + $0x60] sm:$0xff] }
 0x141   : > { %2745 = vperm.xlu1 %3601, %v2671_v39   ;;  %2750 = vperm.xlu0 %3600, %v2672_v41   ;;  %v1010_v39 = vld [vmem:[%s6408_s4 + $0xc8] sm:$0xff] }
 0x142   : > { %2740 = vperm.xlu2 %3602, %v2670_v40   ;;  %v4543_v40 = vpop.permute.xlu0 %1208 }
 0x143   : > { %v4414_v46 = vpop.permute.xlu1 %1298  ;;  %1352 = vmatmul.f32.gmra.mxu0 %v990_v44  ;;  %6461 = vst [vmem:[#allocation20_spill] sm:$0xff] %v4543_v40  ;;  %v2904_v44 = vld [vmem:[%s6417_s13 + $0x30] sm:$0xff] }
 0x144   : > { %6453 = vst [vmem:[#allocation12_spill] sm:$0xff] %v4414_v46  ;;  %1391 = vmatmul.f32.gmra.mxu1 %v1003_v45  ;;  %v2903_v45 = vld [vmem:[%s6417_s13 + $0x28] sm:$0xff] }
 0x149   : > { %2730 = vperm.xlu1 %3601, %v2668_v47   ;;  %2735 = vperm.xlu0 %3600, %v2669_v52   ;;  %v2905_v47 = vld [vmem:[%s6417_s13 + $0x38] sm:$0xff] }
 0x14a   : > { %2725 = vperm.xlu2 %3602, %v2667_v49   ;;  %v1011_v49 = vld [vmem:[%s6408_s4 + $0xd0] sm:$0xff] }
 0x14b   : > { %v4433_v56 = vpop.permute.xlu1 %1293  ;;  %1355 = vmatmul.f32.gmra.mxu0 %v991_v54  ;;  %v4561_v54 = vpop.permute.xlu0 %1098 }
 0x14c   : > { %6454 = vst [vmem:[#allocation13_spill] sm:$0xff] %v4433_v56  ;;  %1394 = vmatmul.f32.gmra.mxu1 %v1004_v55  ;;  %v2901_v55 = vld [vmem:[%s6417_s13 + $0x18] sm:$0xff] }
 0x151   : > { %2715 = vperm.xlu1 %3601, %v2665_v58   ;;  %2720 = vperm.xlu0 %3600, %v2666_v32   ;;  %v2900_v58 = vld [vmem:[%s6417_s13 + $0x10] sm:$0xff]  ;;  %v1012_v32 = vld [vmem:[%s6408_s4 + $0xd8] sm:$0xff] }
 0x152   : > { %2710 = vperm.xlu2 %3602, %v2664_v59   ;;  %v2902_v59 = vld [vmem:[%s6417_s13 + $0x20] sm:$0xff] }
 0x153   : > { %v4452_v57 = vpop.permute.xlu1 %2153  ;;  %1358 = vmatmul.f32.gmra.mxu0 %v992_v61 }
 0x154   : > { %6456 = vst [vmem:[#allocation15_spill] sm:$0xff] %v4452_v57  ;;  %1397 = vmatmul.f32.gmra.mxu1 %v1005_v62  ;;  %v2898_v62 = vld [vmem:[%s6417_s13] sm:$0xff] }
 0x159   : > { %2700 = vperm.xlu1 %3601, %v2662_v1   ;;  %2705 = vperm.xlu0 %3600, %v2663_v3   ;;  %v4580_v1 = vpop.permute.xlu0 %1193  ;;  %v2899_v3 = vld [vmem:[%s6417_s13 + $0x8] sm:$0xff] }
 0x15a   : > { %2695 = vperm.xlu2 %3602, %v2661_v2   ;;  %v3138_v2 = vld [vmem:[%s6419_s15 + $0x78] sm:$0xff] }
 0x15b   : > { %v4469_v50 = vpop.permute.xlu1 %1278  ;;  %1361 = vmatmul.f32.gmra.mxu0 %v993_v4  ;;  %v1013_v4 = vld [vmem:[%s6408_s4 + $0xe0] sm:$0xff] }
 0x15c   : > { %6457 = vst [vmem:[#allocation16_spill] sm:$0xff] %v4469_v50  ;;  %1400 = vmatmul.f32.gmra.mxu1 %v1006_v37 }
 0x161   : > { %2685 = vperm.xlu1 %3601, %v2659_v42   ;;  %2690 = vperm.xlu0 %3600, %v2660_v6   ;;  %v4593_v42 = vpop.permute.xlu2 %1153  ;;  %v3135_v6 = vld [vmem:[%s6419_s15 + $0x60] sm:$0xff] }
 0x162   : > { %2680 = vperm.xlu2 %3602, %v2658_v36   ;;  %v3136_v36 = vld [vmem:[%s6419_s15 + $0x68] sm:$0xff] }
 0x163   : > { %v4488_v11 = vpop.permute.xlu1 %2138  ;;  %1364 = vmatmul.f32.gmra.mxu0 %v994_v8  ;;  %v3137_v8 = vld [vmem:[%s6419_s15 + $0x70] sm:$0xff] }
 0x164   : > { %1403 = vmatmul.f32.gmra.mxu1 %v1007_v10  ;;  %v1084_v10 = vpop.permute.xlu0 %1083 }
 0x169   : > { %2991 = vperm.xlu1 %3601, %v2913_v12   ;;  %2675 = vperm.xlu0 %3600, %v2657_v16   ;;  %v1014_v16 = vld [vmem:[%s6408_s4 + $0xe8] sm:$0xff] }
 0x16a   : > { %2986 = vperm.xlu2 %3602, %v2912_v14  }
 0x16b   : > { %v4507_v19 = vpop.permute.xlu1 %1263  ;;  %1367 = vmatmul.f32.gmra.mxu0 %v995_v17 }
 0x16c   : > { %6459 = vst [vmem:[#allocation18_spill] sm:$0xff] %v4507_v19  ;;  %1406 = vmatmul.f32.gmra.mxu1 %v1008_v18 }
 0x171   : > { %2976 = vperm.xlu1 %3601, %v2910_v20   ;;  %2981 = vperm.xlu0 %3600, %v2911_v24   ;;  %v4614_v24 = vpop.permute.xlu2 %1138 }
 0x172   : > { %2971 = vperm.xlu2 %3602, %v2909_v22   ;;  %v3133_v22 = vld [vmem:[%s6419_s15 + $0x50] sm:$0xff] }
 0x173   : > { %v4526_v30 = vpop.permute.xlu1 %2123  ;;  %1370 = vmatmul.f32.gmra.mxu0 %v996_v26  ;;  %v3132_v26 = vld [vmem:[%s6419_s15 + $0x48] sm:$0xff] }
 0x174   : > { %6460 = vst [vmem:[#allocation19_spill] sm:$0xff] %v4526_v30  ;;  %1409 = vmatmul.f32.gmra.mxu1 %v1009_v27  ;;  %v3134_v27 = vld [vmem:[%s6419_s15 + $0x58] sm:$0xff] }
 0x179   : > { %2961 = vperm.xlu1 %3601, %v2907_v31   ;;  %2966 = vperm.xlu0 %3600, %v2908_v28  }
 0x17a   : > { %2956 = vperm.xlu2 %3602, %v2906_v33   ;;  %v1015_v33 = vld [vmem:[%s6408_s4 + $0xf0] sm:$0xff] }
 0x17b   : > { %v4545_v41 = vpop.permute.xlu1 %1248  ;;  %1373 = vmatmul.f32.gmra.mxu0 %v997_v34 }
 0x17c   : > { %6462 = vst [vmem:[#allocation21_spill] sm:$0xff] %v4545_v41  ;;  %1412 = vmatmul.f32.gmra.mxu1 %v1010_v39 }
 0x181   : > { %2946 = vperm.xlu1 %3601, %v2904_v44   ;;  %2951 = vperm.xlu0 %3600, %v2905_v47   ;;  %v3130_v44 = vld [vmem:[%s6419_s15 + $0x38] sm:$0xff]  ;;  %v3131_v47 = vld [vmem:[%s6419_s15 + $0x40] sm:$0xff] }
 0x182   : > { %2941 = vperm.xlu2 %3602, %v2903_v45   ;;  %v3129_v45 = vld [vmem:[%s6419_s15 + $0x30] sm:$0xff] }
 0x183   : > { %v4559_v52 = vpop.permute.xlu1 %2108 }
 0x184   : > { %1415 = vmatmul.f32.gmra.mxu1 %v1011_v49  ;;  %v4638_v49 = vpop.permute.xlu2 %1233 }
 0x185   : > { %6467 = vst [vmem:[#allocation26_spill] sm:$0xff] %v4638_v49 }
 0x189   : > { %2931 = vperm.xlu1 %3601, %v2901_v55   ;;  %2936 = vperm.xlu0 %3600, %v2902_v59  }
 0x18a   : > { %2926 = vperm.xlu2 %3602, %v2900_v58   ;;  %v1016_v58 = vld [vmem:[%s6408_s4 + $0xf8] sm:$0xff] }
 0x18b   : > { %v4575_v61 = vpop.permute.xlu1 %2564 }
 0x18c   : > { %6463 = vst [vmem:[#allocation22_spill] sm:$0xff] %v4575_v61  ;;  %1418 = vmatmul.f32.gmra.mxu1 %v1012_v32 }
 0x191   : > { %2916 = vperm.xlu1 %3601, %v2898_v62   ;;  %2921 = vperm.xlu0 %3600, %v2899_v3   ;;  %v3127_v62 = vld [vmem:[%s6419_s15 + $0x20] sm:$0xff]  ;;  %v3126_v3 = vld [vmem:[%s6419_s15 + $0x18] sm:$0xff] }
 0x192   : > { %3216 = vperm.xlu2 %3602, %v3138_v2  }
 0x193   : > { %v4591_v37 = vpop.permute.xlu1 %2549 }
 0x194   : > { %6464 = vst [vmem:[#allocation23_spill] sm:$0xff] %v4591_v37  ;;  %1421 = vmatmul.f32.gmra.mxu1 %v1013_v4  ;;  %v3128_v4 = vld [vmem:[%s6419_s15 + $0x28] sm:$0xff] }
 0x198   : > { %v1338_v12 = vpop.f32.mrf.mxu0 }
 0x199   : > { %3206 = vperm.xlu1 %3601, %v3136_v36   ;;  %v4604_v14 = vpop.f32.mrf.mxu1  ;;  %v1339_v17 = vadd.f32 %v1338_v12, %v1084_v10  ;;  %3211 = vperm.xlu0 %3600, %v3137_v8   ;;  %v1017_v8 = vld [vmem:[%s6408_s4 + $0x100] sm:$0xff]  ;;  %v4661_v12 = vpop.permute.xlu2 %1123 }
 0x19a   : > { %3201 = vperm.xlu2 %3602, %v3135_v6  }
 0x19b   : > { %v4609_v18 = vpop.permute.xlu1 %2534  ;;  %v3493_v20 = vmul.f32 -1.442695, %v1339_v17 }
 0x19c   : > { %6465 = vst [vmem:[#allocation24_spill] sm:$0xff] %v4609_v18  ;;  %1424 = vmatmul.f32.gmra.mxu1 %v1014_v16 }
 0x19d   : > { %3603 = vpow2.f32 %v3493_v20 }
 0x1a0   : > { %v1341_v37 = vpop.f32.mrf.mxu0 }
 0x1a1   : > { %3191 = vperm.xlu1 %3601, %v3133_v22   ;;  %v4622_v31 = vpop.f32.mrf.mxu1  ;;  %3196 = vperm.xlu0 %3600, %v3134_v27  }
 0x1a2   : > { %3186 = vperm.xlu2 %3602, %v3132_v26   ;;  %v3124_v26 = vld [vmem:[%s6419_s15 + $0x8] sm:$0xff] }
 0x1a3   : > { %v4627_v28 = vpop.permute.xlu1 %2519  ;;  %v3604_v34 = vpop.eup %3603 }
 0x1a4   : > { %6466 = vst [vmem:[#allocation25_spill] sm:$0xff] %v4627_v28  ;;  %1427 = vmatmul.f32.gmra.mxu1 %v1015_v33  ;;  %v1530_v39 = vadd.f32 1.0, %v3604_v34  ;;  %v3123_v34 = vld [vmem:[%s6419_s15] sm:$0xff] }
 0x1a6   : > { %3605 = vrcp.f32 %v1530_v39  ;;  %v1557_v10 = vand.u32 2147483648, %v1530_v39  ;;  %v1555_v20 = vand.u32 2147483647, %v1530_v39  ;;  %vm1551_vm2 = vweird.f32 %v1530_v39 }
 0x1a8   : > { %v1558_v27 = vor.u32 1.1754944e-38, %v1557_v10  ;;  %vm1556_vm4 = vcmp.eq.f32.partialorder %v1555_v20, 8.507059e+37  ;;  %v1020_v20 = vld [vmem:[%s6408_s4 + $0x118] sm:$0xff]  ;;  %v4768_v50 = vpop.f32.mrf.mxu0 }
 0x1a9   : > { %3176 = vperm.xlu1 %3601, %v3130_v44   ;;  %v4640_v55 = vpop.f32.mrf.mxu1  ;;  %3181 = vperm.xlu0 %3600, %v3131_v47   ;;  %v3125_v44 = vld [vmem:[%s6419_s15 + $0x10] sm:$0xff] }
 0x1aa   : > { %3171 = vperm.xlu2 %3602, %v3129_v45  }
 0x1ab   : > { %v4645_v59 = vpop.permute.xlu1 %2504 }
 0x1ac   : > { %6468 = vst [vmem:[#allocation27_spill] sm:$0xff] %v4645_v59  ;;  %1430 = vmatmul.f32.gmra.mxu1 %v1016_v58  ;;  %v3606_v32 = vpop.eup %3605  ;;  %v1018_v58 = vld [vmem:[%s6408_s4 + $0x108] sm:$0xff] }
 0x1ad   : > { %v1547_v2 = vmul.f32 %v3606_v32, %v1530_v39  ;;  %vm1552_vm1 = vweird.f32 %v3606_v32 }
 0x1ae   : > { %vm1553_vm3 = vmor %vm1551_vm2, %vm1552_vm1 }
 0x1af   : > { %v1548_v36 = vsub.f32 1.0, %v1547_v2  ;;  %v3380_v2 = vld [vmem:[#allocation3] sm:$0x1] }
 0x1b0   : > { %v4781_v15 = vpop.f32.mrf.mxu0 }
 0x1b1   : > { %3161 = vperm.xlu1 %3601, %v3127_v62   ;;  %v4656_v6 = vpop.f32.mrf.mxu1  ;;  %3166 = vperm.xlu0 %3600, %v3128_v4   ;;  %v1549_v17 = vmul.f32 %v3606_v32, %v1548_v36  ;;  %v4684_v62 = vpop.permute.xlu2 %1218 }
 0x1b2   : > { %3156 = vperm.xlu2 %3602, %v3126_v3   ;;  %6471 = vst [vmem:[#allocation30_spill] sm:$0xff] %v4684_v62  ;;  %v3349_v3 = vld [vmem:[#allocation2] sm:$0x1]  ;;  %v4691_v36 = vpop.permute.xlu0 %1183 }
 0x1b3   : > { %v4663_v16 = vpop.permute.xlu1 %2745  ;;  %v1550_v22 = vadd.f32 %v3606_v32, %v1549_v17 }
 0x1b4   : > { %6469 = vst [vmem:[#allocation28_spill] sm:$0xff] %v4663_v16  ;;  %1433 = vmatmul.f32.gmra.mxu1 %v1017_v8 }
 0x1b5   : > { %v1554_v33 = vsel %vm1553_vm3, %v3606_v32, %v1550_v22 }
 0x1b6   : > { %v1559_v45 = vsel %vm1556_vm4, %v1558_v27, %v1554_v33 }
 0x1b7   : > { %v4675_v39 = vmul.f32 %v4559_v52, %v1559_v45  ;;  %v1019_v52 = vld [vmem:[%s6408_s4 + $0x110] sm:$0xff] }
 0x1b9   : > { %3146 = vperm.xlu1 %3601, %v3124_v26   ;;  %v4677_v47 = vpop.f32.mrf.mxu1  ;;  %3151 = vperm.xlu0 %3600, %v3125_v44   ;;  %v4695_v10 = vpop.permute.xlu2 %1108 }
 0x1ba   : > { %3141 = vperm.xlu2 %3602, %v3123_v34   ;;  %v4704_v26 = vpop.permute.xlu0 %1178  ;;  %v1021_v34 = vld [vmem:[%s6408_s4 + $0x120] sm:$0xff] }
 0x1bb   : > { %v4682_v32 = vpop.permute.xlu1 %2730 }
 0x1bc   : > { %6470 = vst [vmem:[#allocation29_spill] sm:$0xff] %v4682_v32  ;;  %1436 = vmatmul.f32.gmra.mxu1 %v1018_v58 }
 0x1c1   : > { %3383 = vperm.xlu1 %3601, %v3380_v2   ;;  %v4686_v4 = vpop.f32.mrf.mxu1  ;;  %3352 = vperm.xlu0 %3600, %v3349_v3   ;;  %v4706_v27 = vpop.permute.xlu2 %1203  ;;  %v1022_v2 = vld [vmem:[%s6408_s4 + $0x128] sm:$0xff] }
 0x1c2   : > { %v4715_v45 = vpop.permute.xlu0 %1173 }
 0x1c3   : > { %v4693_v8 = vpop.permute.xlu1 %2715 }
 0x1c4   : > { %6472 = vst [vmem:[#allocation31_spill] sm:$0xff] %v4693_v8  ;;  %1439 = vmatmul.f32.gmra.mxu1 %v1019_v52 }
 0x1c9   : > { %v4697_v17 = vpop.f32.mrf.mxu1  ;;  %v4722_v3 = vpop.permute.xlu2 %1093 }
 0x1cb   : > { %v4702_v22 = vpop.permute.xlu1 %2700 }
 0x1cc   : > { %6473 = vst [vmem:[#allocation32_spill] sm:$0xff] %v4702_v22  ;;  %1442 = vmatmul.f32.gmra.mxu1 %v1020_v20  ;;  %v4726_v20 = vpop.permute.xlu0 %1168 }
 0x1cd   : > { %v1390_v63 = vadd.f32 %v4677_v47, %v4726_v20 }
 0x1d1   : > { %v4708_v33 = vpop.f32.mrf.mxu1  ;;  %v4735_v8 = vpop.permute.xlu2 %1188 }
 0x1d3   : > { %v4713_v44 = vpop.permute.xlu1 %2685 }
 0x1d4   : > { %6474 = vst [vmem:[#allocation33_spill] sm:$0xff] %v4713_v44  ;;  %1445 = vmatmul.f32.gmra.mxu1 %v1021_v34  ;;  %v1023_v34 = vld [vmem:[%s6408_s4 + $0x130] sm:$0xff] }
 0x1d9   : > { %v4717_v58 = vpop.f32.mrf.mxu1  ;;  %v4746_v59 = vpop.permute.xlu2 %2183 }
 0x1da   : > { %6478 = vst [vmem:[#allocation37_spill] sm:$0xff] %v4746_v59  ;;  %v4801_v59 = vpop.f32.mrf.mxu0 }
 0x1db   : > { %v4724_v52 = vpop.permute.xlu1 %2991 }
 0x1dc   : > { %6475 = vst [vmem:[#allocation34_spill] sm:$0xff] %v4724_v52  ;;  %1448 = vmatmul.f32.gmra.mxu1 %v1022_v2  ;;  %v1024_v52 = vld [vmem:[%s6408_s4 + $0x138] sm:$0xff]  ;;  %v4742_v2 = vpop.permute.xlu0 %1163 }
 0x1e1   : > { %v4728_v22 = vpop.f32.mrf.mxu1  ;;  %v4757_v61 = vpop.permute.xlu2 %2178 }
 0x1e3   : > { %v4733_v44 = vpop.permute.xlu1 %2976 }
 0x1e4   : > { %6476 = vst [vmem:[#allocation35_spill] sm:$0xff] %v4733_v44  ;;  %1451 = vmatmul.f32.gmra.mxu1 %v1023_v34  ;;  %v1025_v44 = vld [vmem:[%s6408_s4 + $0x140] sm:$0xff]  ;;  %v4755_v18 = vpop.permute.xlu0 %1288 }
 0x1e5   : > { %6480 = vst [vmem:[#allocation39_spill] sm:$0xff] %v4755_v18 }
 0x1e9   : > { %v4737_v32 = vpop.f32.mrf.mxu1  ;;  %v4775_v18 = vpop.permute.xlu2 %2173 }
 0x1eb   : > { %v4744_v16 = vpop.permute.xlu1 %2961 }
 0x1ec   : > { %6477 = vst [vmem:[#allocation36_spill] sm:$0xff] %v4744_v16  ;;  %1454 = vmatmul.f32.gmra.mxu1 %v1024_v52  ;;  %v1026_v52 = vld [vmem:[%s6408_s4 + $0x148] sm:$0xff]  ;;  %v4766_v19 = vpop.permute.xlu0 %2148 }
 0x1f1   : > { %v4748_v28 = vpop.f32.mrf.mxu1  ;;  %v4790_v29 = vpop.permute.xlu2 %2168 }
 0x1f2   : > { %6487 = vst [vmem:[#allocation46_spill] sm:$0xff] %v4790_v29 }
 0x1f3   : > { %v4753_v34 = vpop.permute.xlu1 %2946 }
 0x1f4   : > { %6479 = vst [vmem:[#allocation38_spill] sm:$0xff] %v4753_v34  ;;  %1457 = vmatmul.f32.gmra.mxu1 %v1025_v44  ;;  %v1027_v44 = vld [vmem:[%s6408_s4 + $0x150] sm:$0xff]  ;;  %v4779_v46 = vpop.permute.xlu0 %1273 }
 0x1f9   : > { %v4759_v41 = vpop.f32.mrf.mxu1  ;;  %v4803_v30 = vpop.permute.xlu2 %2163 }
 0x1fa   : > { %6481 = vst [vmem:[#allocation40_spill] sm:$0xff] %v4759_v41 }
 0x1fb   : > { %v4764_v16 = vpop.permute.xlu1 %2931  ;;  %6490 = vst [vmem:[#allocation49_spill] sm:$0xff] %v4803_v30  ;;  %v1031_v30 = vld [vmem:[%s6408_s4 + $0x170] sm:$0xff] }
 0x1fc   : > { %6482 = vst [vmem:[#allocation41_spill] sm:$0xff] %v4764_v16  ;;  %1460 = vmatmul.f32.gmra.mxu1 %v1026_v52  ;;  %v1028_v16 = vld [vmem:[%s6408_s4 + $0x158] sm:$0xff] }
 0x201   : > { %v4770_v34 = vpop.f32.mrf.mxu1  ;;  %v4814_v13 = vpop.permute.xlu2 %2158 }
 0x202   : > { %6483 = vst [vmem:[#allocation42_spill] sm:$0xff] %v4770_v34 }
 0x203   : > { %v4777_v56 = vpop.permute.xlu1 %2916  ;;  %6494 = vst [vmem:[#allocation53_spill] sm:$0xff] %v4814_v13 }
 0x204   : > { %6484 = vst [vmem:[#allocation43_spill] sm:$0xff] %v4777_v56  ;;  %1463 = vmatmul.f32.gmra.mxu1 %v1027_v44  ;;  %v1029_v44 = vld [vmem:[%s6408_s4 + $0x160] sm:$0xff]  ;;  %v4797_v56 = vpop.permute.xlu0 %2133 }
 0x209   : > { %v4783_v52 = vpop.f32.mrf.mxu1 }
 0x20a   : > { %6485 = vst [vmem:[#allocation44_spill] sm:$0xff] %v4783_v52 }
 0x20b   : > { %v4788_v38 = vpop.permute.xlu1 %3206 }
 0x20c   : > { %6486 = vst [vmem:[#allocation45_spill] sm:$0xff] %v4788_v38  ;;  %1466 = vmatmul.f32.gmra.mxu1 %v1028_v16  ;;  %v1030_v16 = vld [vmem:[%s6408_s4 + $0x168] sm:$0xff]  ;;  %v4812_v29 = vpop.permute.xlu0 %1258 }
 0x20d   : > { %6493 = vst [vmem:[#allocation52_spill] sm:$0xff] %v4812_v29  ;;  %v1342_v29 = vadd.f32 %v1341_v37, %v4329_v9 }
 0x211   : > { %v4792_v21 = vpop.f32.mrf.mxu1 }
 0x212   : > { %6488 = vst [vmem:[#allocation47_spill] sm:$0xff] %v4792_v21  ;;  %v1353_v21 = vpop.f32.mrf.mxu0 }
 0x213   : > { %v4799_v57 = vpop.permute.xlu1 %3191 }
 0x214   : > { %6489 = vst [vmem:[#allocation48_spill] sm:$0xff] %v4799_v57  ;;  %1469 = vmatmul.f32.gmra.mxu1 %v1029_v44  ;;  %v1378_v44 = vadd.f32 %v4604_v14, %v4425_v53  ;;  %v4825_v49 = vpop.permute.xlu0 %2118  ;;  %v1032_v14 = vld [vmem:[%s6408_s4 + $0x178] sm:$0xff] }
 0x215   : > { %6497 = vst [vmem:[#allocation56_spill] sm:$0xff] %v4825_v49 }
 0x219   : > { %v4805_v7 = vpop.f32.mrf.mxu1 }
 0x21a   : > { %6491 = vst [vmem:[#allocation50_spill] sm:$0xff] %v4805_v7  ;;  %v1356_v13 = vpop.f32.mrf.mxu0 }
 0x21b   : > { %v4810_v38 = vpop.permute.xlu1 %3176  ;;  %v1357_v9 = vadd.f32 %v1356_v13, %v4518_v25 }
 0x21c   : > { %6492 = vst [vmem:[#allocation51_spill] sm:$0xff] %v4810_v38  ;;  %1472 = vmatmul.f32.gmra.mxu1 %v1030_v16  ;;  %v3506_v38 = vmul.f32 -1.442695, %v1378_v44  ;;  %v1354_v16 = vadd.f32 %v1353_v21, %v4695_v10  ;;  %v1244_v37 = vpop.permute.xlu0 %1243  ;;  %v1402_v10 = vadd.f32 %v4717_v58, %v4735_v8 }
 0x21e   : > { %3607 = vpow2.f32 %v3506_v38  ;;  %v1381_v38 = vadd.f32 %v4622_v31, %v4593_v42  ;;  %v3514_v31 = vmul.f32 -1.442695, %v1402_v10 }
 0x221   : > { %v4818_v57 = vpop.f32.mrf.mxu1 }
 0x222   : > { %6495 = vst [vmem:[#allocation54_spill] sm:$0xff] %v4818_v57  ;;  %v4836_v57 = vpop.permute.xlu2 %1283  ;;  %v4847_v49 = vpop.f32.mrf.mxu0 }
 0x223   : > { %v4823_v7 = vpop.permute.xlu1 %3161 }
 0x224   : > { %6496 = vst [vmem:[#allocation55_spill] sm:$0xff] %v4823_v7  ;;  %1475 = vmatmul.f32.gmra.mxu1 %v1031_v30  ;;  %v3498_v30 = vmul.f32 -1.442695, %v1354_v16  ;;  %v3494_v7 = vmul.f32 -1.442695, %v1342_v29  ;;  %v3608_v21 = vpop.eup %3607 }
 0x225   : > { %v3499_v16 = vmul.f32 -1.442695, %v1357_v9 }
 0x226   : > { %3609 = vpow2.f32 %v3498_v30  ;;  %v1345_v30 = vadd.f32 %v4768_v50, %v4722_v3 }
 0x227   : > { %3611 = vpow2.f32 %v3494_v7  ;;  %v3507_v7 = vmul.f32 -1.442695, %v1381_v38 }
 0x228   : > { %3613 = vpow2.f32 %v3499_v16 }
 0x229   : > { %v4831_v53 = vpop.f32.mrf.mxu1 }
 0x22a   : > { %6499 = vst [vmem:[#allocation57_spill] sm:$0xff] %v4831_v53  ;;  %v4856_v42 = vpop.permute.xlu2 %2143  ;;  %v1362_v16 = vpop.f32.mrf.mxu0 }
 0x22b   : > { %v4838_v44 = vpop.permute.xlu1 %3146  ;;  %6502 = vst [vmem:[#allocation59_spill] sm:$0xff] %v4856_v42 }
 0x22c   : > { %6500 = vst [vmem:[#allocation58_spill] sm:$0xff] %v4838_v44  ;;  %1478 = vmatmul.f32.gmra.mxu1 %v1032_v14  ;;  %v4849_v44 = vadd.f32 1.0, %v3608_v21  ;;  %v3610_v25 = vpop.eup %3609 }
 0x22d   : > { %v3612_v58 = vpop.eup %3611  ;;  %v4865_v9 = vadd.f32 1.0, %v3610_v25 }
 0x22e   : > { %3615 = vrcp.f32 %v4849_v44  ;;  %v4869_v21 = vadd.f32 1.0, %v3612_v58  ;;  %v3614_v10 = vpop.eup %3613  ;;  %vm1746_vm5 = vweird.f32 %v4849_v44 }
 0x22f   : > { %3617 = vpow2.f32 %v3507_v7  ;;  %v4881_v7 = vadd.f32 1.0, %v3614_v10  ;;  %vm1626_vm13 = vweird.f32 %v4865_v9  ;;  %v1630_v47 = vand.u32 2147483647, %v4865_v9 }
 0x230   : > { %3619 = vpow2.f32 %v3514_v31  ;;  %vm1566_vm8 = vweird.f32 %v4869_v21 }
 0x231   : > { %v1434_v29 = vpop.f32.mrf.mxu1  ;;  %3621 = vrcp.f32 %v4865_v9  ;;  %vm1631_vm0 = vcmp.eq.f32.partialorder %v1630_v47, 8.507059e+37  ;;  %vm1641_vm2 = vweird.f32 %v4881_v7 }
 0x232   : > { %v1435_v14 = vadd.f32 %v1434_v29, %v1244_v37  ;;  %v3495_v37 = vmul.f32 -1.442695, %v1345_v30  ;;  %3623 = vrcp.f32 %v4869_v21 }
 0x233   : > { %v3384_v52 = vpop.permute.xlu1 %3383 }
 0x234   : > { %v3386_v13 = vperm.slane %v3384_v52, 0  ;;  %v4859_v8 = vadd.f32 %v4675_v39, %v1435_v14  ;;  %v1405_v52 = vadd.f32 %v4728_v22, %v4580_v1  ;;  %v1384_v39 = vadd.f32 %v4640_v55, %v4216_v43  ;;  %v4876_v3 = vpop.eup %3615  ;;  %v4879_v14 = vpop.permute.xlu2 %1268 }
 0x235   : > { %v3618_v29 = vpop.eup %3617  ;;  %3625 = vpow2.f32 %v3495_v37  ;;  %v1363_v43 = vadd.f32 %v1362_v16, %v4661_v12  ;;  %v1742_v55 = vmul.f32 %v4876_v3, %v4849_v44  ;;  %v1750_v16 = vand.u32 2147483647, %v4849_v44 }
 0x236   : > { %6503 = vst [vmem:[#allocation60_spill] sm:$0xff] %v4859_v8  ;;  %v3515_v50 = vmul.f32 -1.442695, %v1405_v52  ;;  %v3508_v1 = vmul.f32 -1.442695, %v1384_v39  ;;  %v3620_v22 = vpop.eup %3619  ;;  %v1348_v52 = vadd.f32 %v4781_v15, %v4561_v54  ;;  %v1752_v54 = vand.u32 2147483648, %v4849_v44 }
 0x237   : > { %3387 = vst [vmem:[%s4854_s27 + $0x1] sm:$0x1] %v3386_v13  ;;  %v4886_v13 = vadd.f32 1.0, %v3618_v29  ;;  %v4888_v25 = vpop.eup %3621  ;;  %v4890_v31 = vadd.f32 1.0, %v3620_v22  ;;  %v3501_v12 = vmul.f32 -1.442695, %v1363_v43  ;;  %v1387_v29 = vadd.f32 %v4656_v6, %v4742_v2 }
 0x238   : > { %3627 = vpow2.f32 %v3515_v50  ;;  %v4894_v30 = vpop.eup %3623  ;;  %v1743_v39 = vsub.f32 1.0, %v1742_v55  ;;  %v1622_v10 = vmul.f32 %v4888_v25, %v4865_v9  ;;  %v1411_v55 = vadd.f32 %v4748_v28, %v4706_v27 }
 0x239   : > { %v4873_v38 = vpop.f32.mrf.mxu1  ;;  %3629 = vpow2.f32 %v3508_v1  ;;  %v1562_v15 = vmul.f32 %v4894_v30, %v4869_v21  ;;  %v3496_v1 = vmul.f32 -1.442695, %v1348_v52  ;;  %v3509_v52 = vmul.f32 -1.442695, %v1387_v29 }
 0x23a   : > { %6504 = vst [vmem:[#allocation61_spill] sm:$0xff] %v4873_v38  ;;  %3631 = vrcp.f32 %v4881_v7  ;;  %v1744_v8 = vmul.f32 %v4876_v3, %v1743_v39  ;;  %v1623_v42 = vsub.f32 1.0, %v1622_v10  ;;  %vm4924_vm6 = vcmp.eq.f32.partialorder %v1750_v16, 8.507059e+37 }
 0x23b   : > { %v3626_v37 = vpop.eup %3625  ;;  %3633 = vrcp.f32 %v4886_v13  ;;  %v1753_v28 = vor.u32 1.1754944e-38, %v1752_v54  ;;  %vm1747_vm7 = vweird.f32 %v4876_v3  ;;  %v3517_v29 = vmul.f32 -1.442695, %v1411_v55 }
 0x23c   : > { %3635 = vrcp.f32 %v4890_v31  ;;  %v4909_v43 = vadd.f32 1.0, %v3626_v37  ;;  %v4916_v6 = vpop.permute.xlu2 %2128  ;;  %vm1567_vm9 = vweird.f32 %v4894_v30  ;;  %vm4957_vm10 = vmor %vm1746_vm5, %vm1747_vm7  ;;  %vm1627_vm12 = vweird.f32 %v4888_v25 }
 0x23d   : > { %3637 = vpow2.f32 %v3501_v12  ;;  %6506 = vst [vmem:[#allocation63_spill] sm:$0xff] %v4916_v6  ;;  %v1563_v12 = vsub.f32 1.0, %v1562_v15  ;;  %v1745_v15 = vadd.f32 %v4876_v3, %v1744_v8  ;;  %v1351_v6 = vadd.f32 %v4801_v59, %v4294_v48  ;;  %vm4998_vm14 = vmor %vm1626_vm13, %vm1627_vm12 }
 0x23e   : > { %v3628_v50 = vpop.eup %3627  ;;  %3639 = vpow2.f32 %v3496_v1  ;;  %v1767_v8 = vand.u32 2147483648, %v4886_v13  ;;  %v1587_v34 = vand.u32 2147483648, %v4909_v43  ;;  %vm5013_vm15 = vmor %vm1566_vm8, %vm1567_vm9  ;;  %vm1761_vm7 = vweird.f32 %v4886_v13 }
 0x23f   : > { %v3630_v22 = vpop.eup %3629  ;;  %v4918_v2 = vadd.f32 1.0, %v3628_v50  ;;  %v1570_v50 = vand.u32 2147483647, %v4869_v21  ;;  %3641 = vrcp.f32 %v4909_v43  ;;  %v1564_v53 = vmul.f32 %v4894_v30, %v1563_v12 }
 0x240   : > { %v4914_v38 = vpop.eup %3631  ;;  %v4930_v39 = vadd.f32 1.0, %v3630_v22  ;;  %v1624_v22 = vmul.f32 %v4888_v25, %v1623_v42  ;;  %v1749_v44 = vsel %vm4957_vm10, %v4876_v3, %v1745_v15  ;;  %v1632_v42 = vand.u32 2147483648, %v4865_v9 }
 0x241   : > { %v4892_v58 = vpop.f32.mrf.mxu1  ;;  %v4928_v27 = vpop.eup %3633  ;;  %v1637_v16 = vmul.f32 %v4914_v38, %v4881_v7  ;;  %3643 = vrcp.f32 %v4918_v2  ;;  %vm4968_vm11 = vcmp.eq.f32.partialorder %v1570_v50, 8.507059e+37  ;;  %v3497_v50 = vmul.f32 -1.442695, %v1351_v6 }
 0x242   : > { %6505 = vst [vmem:[#allocation62_spill] sm:$0xff] %v4892_v58  ;;  %v1572_v58 = vand.u32 2147483648, %v4869_v21  ;;  %v4934_v10 = vpop.eup %3635  ;;  %3645 = vpow2.f32 %v3509_v52  ;;  %v1757_v55 = vmul.f32 %v4928_v27, %v4886_v13  ;;  %v1565_v35 = vadd.f32 %v4894_v30, %v1564_v53 }
 0x243   : > { %v3638_v54 = vpop.eup %3637  ;;  %3647 = vrcp.f32 %v4930_v39  ;;  %v1926_v48 = vmul.f32 %v4934_v10, %v4890_v31  ;;  %v1638_v12 = vsub.f32 1.0, %v1637_v16  ;;  %v1754_v20 = vsel %vm4924_vm6, %v1753_v28, %v1749_v44 }
 0x244   : > { %v4942_v1 = vor.u32 1.1754944e-38, %v1572_v58  ;;  %v4964_v59 = vadd.f32 1.0, %v3638_v54  ;;  %v4966_v58 = vpop.f32.mrf.mxu0  ;;  %3649 = vpow2.f32 %v3517_v29  ;;  %v1625_v54 = vadd.f32 %v4888_v25, %v1624_v22  ;;  %v4988_v41 = vpop.permute.xlu2 %1253 }
 0x245   : > { %v1758_v3 = vsub.f32 1.0, %v1757_v55  ;;  %6515 = vst [vmem:[#allocation66_spill] sm:$0xff] %v4988_v41  ;;  %v1927_v22 = vsub.f32 1.0, %v1926_v48  ;;  %v1639_v41 = vmul.f32 %v4914_v38, %v1638_v12  ;;  %v3510_v28 = vmul.f32 -1.442695, %v1390_v63 }
 0x246   : > { %3651 = vrcp.f32 %v4964_v59  ;;  %v5017_v44 = vor.u32 1.1754944e-38, %v1587_v34  ;;  %v1633_v63 = vor.u32 1.1754944e-38, %v1632_v42  ;;  %v5026_v53 = vmul.f32 %v4775_v18, %v1754_v20 }
 0x247   : > { %3653 = vpow2.f32 %v3497_v50  ;;  %v1759_v34 = vmul.f32 %v4928_v27, %v1758_v3  ;;  %v1928_v40 = vmul.f32 %v4934_v10, %v1927_v22  ;;  %vm1642_vm1 = vweird.f32 %v4914_v38 }
 0x248   : > { %v1647_v20 = vand.u32 2147483648, %v4881_v7  ;;  %vm5055_vm3 = vmor %vm1641_vm2, %vm1642_vm1  ;;  %vm1931_vm4 = vweird.f32 %v4934_v10  ;;  %v1360_v52 = vadd.f32 %v4847_v49, %v4270_v23  ;;  %vm1762_vm5 = vweird.f32 %v4928_v27 }
 0x249   : > { %v4922_v37 = vpop.f32.mrf.mxu1  ;;  %vm1930_vm6 = vweird.f32 %v4890_v31  ;;  %v1934_v23 = vand.u32 2147483647, %v4890_v31  ;;  %vm5141_vm1 = vmor %vm1761_vm7, %vm1762_vm5 }
 0x24a   : > { %6507 = vst [vmem:[#allocation64_spill] sm:$0xff] %v4922_v37  ;;  %v3640_v37 = vpop.eup %3639  ;;  %vm5079_vm8 = vmor %vm1930_vm6, %vm1931_vm4  ;;  %vm1671_vm4 = vweird.f32 %v4964_v59 }
 0x24b   : > { %v4980_v29 = vpop.eup %3641  ;;  %v5007_v62 = vadd.f32 1.0, %v3640_v37  ;;  %v1569_v37 = vsel %vm5013_vm15, %v4894_v30, %v1565_v35  ;;  %v1640_v35 = vadd.f32 %v4914_v38, %v1639_v41  ;;  %v1645_v41 = vand.u32 2147483647, %v4881_v7 }
 0x24c   : > { %v4986_v15 = vpop.eup %3643  ;;  %v1574_v50 = vsel %vm4968_vm11, %v4942_v1, %v1569_v37  ;;  %v5048_v3 = vpop.f32.mrf.mxu0  ;;  %v1929_v1 = vadd.f32 %v4934_v10, %v1928_v40  ;;  %vm1935_vm10 = vcmp.eq.f32.partialorder %v1934_v23, 8.507059e+37  ;;  %vm1582_vm13 = vweird.f32 %v4980_v29 }
 0x24d   : > { %v3646_v6 = vpop.eup %3645  ;;  %v1941_v21 = vmul.f32 %v4986_v15, %v4918_v2  ;;  %3655 = vrcp.f32 %v5007_v62  ;;  %v1644_v7 = vsel %vm5055_vm3, %v4914_v38, %v1640_v35  ;;  %v1648_v38 = vor.u32 1.1754944e-38, %v1647_v20 }
 0x24e   : > { %v5005_v9 = vpop.eup %3647  ;;  %v5039_v18 = vadd.f32 1.0, %v3646_v6  ;;  %vm1646_vm9 = vcmp.eq.f32.partialorder %v1645_v41, 8.507059e+37  ;;  %v1600_v35 = vand.u32 2147483647, %v5007_v62  ;;  %v1602_v20 = vand.u32 2147483648, %v5007_v62 }
 0x24f   : > { %v3650_v12 = vpop.eup %3649  ;;  %v1942_v22 = vsub.f32 1.0, %v1941_v21  ;;  %vm1946_vm11 = vweird.f32 %v4986_v15 }
 0x250   : > { %v5041_v30 = vadd.f32 1.0, %v3650_v12  ;;  %v5046_v42 = vpop.eup %3651 }
 0x251   : > { %v4983_v16 = vpop.f32.mrf.mxu1  ;;  %v1667_v40 = vmul.f32 %v5046_v42, %v4964_v59  ;;  %v1943_v37 = vmul.f32 %v4986_v15, %v1942_v22  ;;  %vm1672_vm3 = vweird.f32 %v5046_v42 }
 0x252   : > { %6514 = vst [vmem:[#allocation65_spill] sm:$0xff] %v4983_v16  ;;  %v5003_v16 = vor.u32 1.1754944e-38, %v1767_v8  ;;  %v1629_v8 = vsel %vm4998_vm14, %v4888_v25, %v1625_v54  ;;  %v5034_v25 = vmul.f32 %v4980_v29, %v4909_v43  ;;  %3657 = vrcp.f32 %v5041_v30  ;;  %vm5171_vm5 = vmor %vm1671_vm4, %vm1672_vm3 }
 0x253   : > { %v1634_v54 = vsel %vm1631_vm0, %v1633_v63, %v1629_v8  ;;  %v2114_v8 = vpop.permute.xlu2 %2113  ;;  %3659 = vpow2.f32 %v3510_v28  ;;  %v3500_v28 = vmul.f32 -1.442695, %v1360_v52  ;;  %v1668_v22 = vsub.f32 1.0, %v1667_v40 }
 0x254   : > { %v2191_v55 = vmul.f32 %v4797_v56, %v1634_v54  ;;  %v1936_v56 = vand.u32 2147483648, %v4890_v31  ;;  %v5073_v49 = vmul.f32 %v2114_v8, %v1574_v50  ;;  %v1578_v54 = vsub.f32 1.0, %v5034_v25 }
 0x255   : > { %v1933_v31 = vsel %vm5079_vm8, %v4934_v10, %v1929_v1  ;;  %v1649_v50 = vsel %vm1646_vm9, %v1648_v38, %v1644_v7  ;;  %v1760_v25 = vadd.f32 %v4928_v27, %v1759_v34  ;;  %v1944_v41 = vadd.f32 %v4986_v15, %v1943_v37 }
 0x256   : > { %6522 = vst [vmem:[#allocation67_spill] sm:$0xff] %v5073_v49  ;;  %v2192_v52 = vmul.f32 %v4488_v11, %v1649_v50  ;;  %v6525_v7 = vand.u32 2147483647, %v4886_v13  ;;  %v1951_v34 = vand.u32 2147483648, %v4918_v2  ;;  %v1366_v40 = vadd.f32 %v4966_v58, %v4471_v5 }
 0x257   : > { %vm1945_vm14 = vweird.f32 %v4918_v2  ;;  %v1669_v23 = vmul.f32 %v5046_v42, %v1668_v22  ;;  %v1772_v38 = vmul.f32 %v5005_v9, %v4930_v39  ;;  %v1393_v58 = vadd.f32 %v4686_v4, %v4715_v45 }
 0x258   : > { %vm5103_vm12 = vcmp.eq.f32.partialorder %v6525_v7, 8.507059e+37  ;;  %vm5120_vm15 = vmor %vm1945_vm14, %vm1946_vm11  ;;  %v1579_v63 = vmul.f32 %v4980_v29, %v1578_v54  ;;  %vm1581_vm0 = vweird.f32 %v4909_v43  ;;  %v5135_v50 = vor.u32 1.1754944e-38, %v1602_v20 }
 0x259   : > { %v1449_v47 = vpop.f32.mrf.mxu1  ;;  %v1952_v45 = vor.u32 1.1754944e-38, %v1951_v34  ;;  %v1670_v20 = vadd.f32 %v5046_v42, %v1669_v23  ;;  %v1677_v13 = vand.u32 2147483648, %v4964_v59  ;;  %v1675_v34 = vand.u32 2147483647, %v4964_v59  ;;  %vm5199_vm7 = vmor %vm1581_vm0, %vm1582_vm13 }
 0x25a   : > { %v1450_v6 = vadd.f32 %v1449_v47, %v4879_v14  ;;  %v3654_v14 = vpop.eup %3653  ;;  %v1937_v47 = vor.u32 1.1754944e-38, %v1936_v56  ;;  %v6535_v37 = vand.u32 2147483647, %v4909_v43  ;;  %vm1777_vm9 = vweird.f32 %v5005_v9 }
 0x25b   : > { %v5083_v21 = vpop.eup %3655  ;;  %v5097_v48 = vadd.f32 1.0, %v3654_v14  ;;  %v1371_v14 = vpop.f32.mrf.mxu0  ;;  %vm1676_vm8 = vcmp.eq.f32.partialorder %v1675_v34, 8.507059e+37  ;;  %vm1975_vm13 = vweird.f32 %v5041_v30  ;;  %vm5252_vm0 = vcmp.eq.f32.partialorder %v1600_v35, 8.507059e+37 }
 0x25c   : > { %v2207_v12 = vadd.f32 %v2191_v55, %v1450_v6  ;;  %v1938_v55 = vsel %vm1935_vm10, %v1937_v47, %v1933_v31  ;;  %v5095_v10 = vpop.eup %3657  ;;  %v1948_v31 = vsel %vm5120_vm15, %v4986_v15, %v1944_v41  ;;  %v3502_v47 = vmul.f32 -1.442695, %v1366_v40 }
 0x25d   : > { %v5108_v8 = vpop.eup %3659  ;;  %v2239_v5 = vsub.f32 1.0, %v1938_v55  ;;  %v1764_v15 = vsel %vm5141_vm1, %v4928_v27, %v1760_v25  ;;  %v3511_v41 = vmul.f32 -1.442695, %v1393_v58  ;;  %v1369_v55 = vadd.f32 %v5048_v3, %v4244_v60 }
 0x25e   : > { %3661 = vtanh.f32 %v2207_v12  ;;  %v1396_v27 = vadd.f32 %v4697_v17, %v4704_v26  ;;  %v5161_v25 = vadd.f32 %v4980_v29, %v1579_v63  ;;  %v1399_v40 = vadd.f32 %v4708_v33, %v4691_v36 }
 0x25f   : > { %3663 = vrcp.f32 %v5039_v18  ;;  %v1592_v60 = vmul.f32 %v5083_v21, %v5007_v62  ;;  %v1769_v17 = vsel %vm5103_vm12, %v5003_v16, %v1764_v15  ;;  %v1674_v36 = vsel %vm5171_vm5, %v5046_v42, %v1670_v20  ;;  %v6549_v42 = vld [vmem:[#allocation40_spill] sm:$0xff] }
 0x260   : > { %3665 = vpow2.f32 %v3500_v28  ;;  %v1678_v33 = vor.u32 1.1754944e-38, %v1677_v13  ;;  %v1372_v23 = vadd.f32 %v1371_v14, %v4614_v24  ;;  %vm5188_vm6 = vcmp.eq.f32.partialorder %v6535_v37, 8.507059e+37  ;;  %v6569_v37 = vld [vmem:[#allocation50_spill] sm:$0xff] }
 0x261   : > { %v1452_v6 = vpop.f32.mrf.mxu1  ;;  %v3512_v58 = vmul.f32 -1.442695, %v1396_v27  ;;  %v5204_v24 = vmul.f32 %v4757_v61, %v1769_v17  ;;  %v3513_v63 = vmul.f32 -1.442695, %v1399_v40  ;;  %v1593_v4 = vsub.f32 1.0, %v1592_v60 }
 0x262   : > { %v1453_v1 = vadd.f32 %v1452_v6, %v4779_v46  ;;  %v1949_v46 = vand.u32 2147483647, %v4918_v2  ;;  %v1971_v2 = vmul.f32 %v5095_v10, %v5041_v30  ;;  %vm1776_vm10 = vweird.f32 %v4930_v39 }
 0x263   : > { %vm1976_vm11 = vweird.f32 %v5095_v10  ;;  %vm1596_vm12 = vweird.f32 %v5007_v62  ;;  %v1981_v13 = vand.u32 2147483648, %v5041_v30  ;;  %vm1597_vm15 = vweird.f32 %v5083_v21  ;;  %vm5283_vm4 = vmor %vm1776_vm10, %vm1777_vm9 }
 0x264   : > { %v3662_v11 = vpop.eup %3661  ;;  %v2208_v12 = vadd.f32 %v2192_v52, %v1453_v1  ;;  %vm1950_vm2 = vcmp.eq.f32.partialorder %v1949_v46, 8.507059e+37  ;;  %v1773_v52 = vsub.f32 1.0, %v1772_v38  ;;  %v1972_v7 = vsub.f32 1.0, %v1971_v2  ;;  %v1374_v38 = vpop.f32.mrf.mxu0  ;;  %vm5232_vm14 = vmor %vm1975_vm13, %vm1976_vm11 }
 0x265   : > { %v5133_v28 = vpop.eup %3663  ;;  %v5145_v54 = vmul.f32 %v3662_v11, %v2239_v5  ;;  %v1953_v22 = vsel %vm1950_vm2, %v1952_v45, %v1948_v31  ;;  %v1584_v2 = vsel %vm5199_vm7, %v4980_v29, %v5161_v25  ;;  %v1679_v31 = vsel %vm1676_vm8, %v1678_v33, %v1674_v36  ;;  %vm5293_vm5 = vmor %vm1596_vm12, %vm1597_vm15 }
 0x266   : > { %3667 = vtanh.f32 %v2208_v12  ;;  %v3666_v6 = vpop.eup %3665  ;;  %v2240_v26 = vsub.f32 1.0, %v1953_v22  ;;  %v3503_v12 = vmul.f32 -1.442695, %v1369_v55  ;;  %v1973_v56 = vmul.f32 %v5095_v10, %v1972_v7 }
 0x267   : > { %6532 = vst [vmem:[#allocation68_spill] sm:$0xff] %v5145_v54  ;;  %3669 = vrcp.f32 %v5097_v48  ;;  %v5178_v11 = vadd.f32 1.0, %v3666_v6  ;;  %v1774_v14 = vmul.f32 %v5005_v9, %v1773_v52  ;;  %v1375_v43 = vadd.f32 %v1374_v38, %v4231_v51 }
 0x268   : > { %3671 = vpow2.f32 %v3502_v47  ;;  %v3504_v45 = vmul.f32 -1.442695, %v1372_v23  ;;  %v1974_v15 = vadd.f32 %v5095_v10, %v1973_v56  ;;  %v2194_v51 = vmul.f32 %v4766_v19, %v1679_v31 }
 0x269   : > { %v5156_v1 = vpop.f32.mrf.mxu1  ;;  %3673 = vpow2.f32 %v3511_v41  ;;  %v5224_v22 = vadd.f32 1.0, %v5108_v8  ;;  %v1979_v6 = vand.u32 2147483647, %v5041_v30  ;;  %v3505_v41 = vmul.f32 -1.442695, %v1375_v43 }
 0x26a   : > { %3675 = vrcp.f32 %v5178_v11  ;;  %v1594_v55 = vmul.f32 %v5083_v21, %v1593_v4  ;;  %v1780_v7 = vand.u32 2147483647, %v4930_v39  ;;  %v1978_v30 = vsel %vm5232_vm14, %v5095_v10, %v1974_v15  ;;  %v6556_v15 = vld [vmem:[#allocation42_spill] sm:$0xff] }
 0x26b   : > { %3677 = vpow2.f32 %v3503_v12  ;;  %v5247_v34 = vsel %vm5188_vm6, %v5017_v44, %v1584_v2  ;;  %v1982_v40 = vor.u32 1.1754944e-38, %v1981_v13  ;;  %v1615_v10 = vand.u32 2147483647, %v5097_v48  ;;  %v6568_v2 = vld [vmem:[#allocation6_spill] sm:$0xff] }
 0x26c   : > { %v3668_v46 = vpop.eup %3667  ;;  %3679 = vpow2.f32 %v3512_v58  ;;  %6543 = vst [vmem:[#allocation70_spill] sm:$0xff] %v5247_v34  ;;  %v1617_v17 = vand.u32 2147483648, %v5097_v48  ;;  %vm1980_vm1 = vcmp.eq.f32.partialorder %v1979_v6, 8.507059e+37  ;;  %v1595_v44 = vadd.f32 %v5083_v21, %v1594_v55  ;;  %v6548_v58 = vld [vmem:[#allocation20_spill] sm:$0xff] }
 0x26d   : > { %v5183_v59 = vpop.eup %3669  ;;  %v5193_v5 = vmul.f32 %v3668_v46, %v2240_v26  ;;  %3681 = vpow2.f32 %v3513_v63  ;;  %vm1611_vm2 = vweird.f32 %v5097_v48  ;;  %v1775_v46 = vadd.f32 %v5005_v9, %v1774_v14 }
 0x26e   : > { %v1607_v61 = vmul.f32 %v5183_v59, %v5097_v48  ;;  %v3672_v29 = vpop.eup %3671  ;;  %3683 = vpow2.f32 %v3504_v45  ;;  %v1983_v36 = vsel %vm1980_vm1, %v1982_v40, %v1978_v30  ;;  %v1408_v35 = vadd.f32 %v4737_v32, %v4310_v0  ;;  %v6560_v40 = vld [vmem:[#allocation30_spill] sm:$0xff] }
 0x26f   : > { %6538 = vst [vmem:[#allocation69_spill] sm:$0xff] %v5193_v5  ;;  %v3674_v19 = vpop.eup %3673  ;;  %v5242_v25 = vadd.f32 1.0, %v3672_v29  ;;  %vm5268_vm3 = vcmp.eq.f32.partialorder %v1780_v7, 8.507059e+37  ;;  %v1414_v14 = vadd.f32 %v6549_v42, %v6548_v58  ;;  %v1618_v31 = vor.u32 1.1754944e-38, %v1617_v17  ;;  %v6559_v7 = vld [vmem:[#allocation57_spill] sm:$0xff] }
 0x270   : > { %v1608_v8 = vsub.f32 1.0, %v1607_v61  ;;  %v5240_v27 = vpop.eup %3675  ;;  %v5261_v12 = vadd.f32 1.0, %v3674_v19  ;;  %v1782_v43 = vand.u32 2147483648, %v4930_v39  ;;  %v2242_v4 = vsub.f32 1.0, %v1983_v36  ;;  %v6563_v36 = vld [vmem:[#allocation54_spill] sm:$0xff]  ;;  %v6593_v5 = vld [vmem:[#allocation53_spill] sm:$0xff] }
 0x271   : > { %v1458_v47 = vpop.f32.mrf.mxu1  ;;  %v3678_v60 = vpop.eup %3677  ;;  %v1652_v16 = vmul.f32 %v5240_v27, %v5178_v11  ;;  %v1779_v62 = vsel %vm5283_vm4, %v5005_v9, %v1775_v46  ;;  %v3516_v39 = vmul.f32 -1.442695, %v1408_v35  ;;  %vm1612_vm6 = vweird.f32 %v5183_v59  ;;  %v6558_v9 = vld [vmem:[#allocation14_spill] sm:$0xff] }
 0x272   : > { %v1459_v20 = vadd.f32 %v1458_v47, %v4836_v57  ;;  %v3680_v26 = vpop.eup %3679  ;;  %v1609_v23 = vmul.f32 %v5183_v59, %v1608_v8  ;;  %v5275_v56 = vadd.f32 1.0, %v3678_v60  ;;  %v6555_v47 = vld [vmem:[#allocation7_spill] sm:$0xff]  ;;  %v1432_v57 = vadd.f32 %v6559_v7, %v6558_v9  ;;  %v6561_v60 = vld [vmem:[#allocation44_spill] sm:$0xff]  ;;  %v6562_v46 = vld [vmem:[#allocation26_spill] sm:$0xff] }
 0x273   : > { %v3682_v33 = vpop.eup %3681  ;;  %v5287_v63 = vadd.f32 1.0, %v3680_v26  ;;  %v1417_v29 = vadd.f32 %v6556_v15, %v6555_v47  ;;  %v1783_v19 = vor.u32 1.1754944e-38, %v1782_v43  ;;  %v1420_v17 = vadd.f32 %v6561_v60, %v6560_v40  ;;  %vm5337_vm7 = vmor %vm1611_vm2, %vm1612_vm6  ;;  %v6570_v15 = vld [vmem:[#allocation19_spill] sm:$0xff] }
 0x274   : > { %v2210_v52 = vadd.f32 %v2194_v51, %v1459_v20  ;;  %v3684_v32 = vpop.eup %3683  ;;  %v5298_v45 = vadd.f32 1.0, %v3682_v33  ;;  %v1599_v20 = vsel %vm5293_vm5, %v5083_v21, %v1595_v44  ;;  %v1610_v55 = vadd.f32 %v5183_v59, %v1609_v23  ;;  %v6573_v60 = vld [vmem:[#allocation63_spill] sm:$0xff] }
 0x275   : > { %6552 = vst [vmem:[#allocation20_spill] sm:$0xff] %v5287_v63  ;;  %v1653_v21 = vsub.f32 1.0, %v1652_v16  ;;  %v3519_v30 = vmul.f32 -1.442695, %v1417_v29  ;;  %v1604_v26 = vsel %vm5252_vm0, %v5135_v50, %v1599_v20  ;;  %v1429_v33 = vadd.f32 %v6563_v36, %v6562_v46  ;;  %v6566_v50 = vld [vmem:[#allocation17_spill] sm:$0xff]  ;;  %v6567_v16 = vld [vmem:[#allocation47_spill] sm:$0xff] }
 0x276   : > { %3685 = vtanh.f32 %v2210_v52  ;;  %v5317_v52 = vadd.f32 1.0, %v3684_v32  ;;  %v1784_v3 = vsel %vm5268_vm3, %v1783_v19, %v1779_v62  ;;  %v1423_v58 = vadd.f32 %v6567_v16, %v6566_v50 }
 0x277   : > { %3687 = vrcp.f32 %v5224_v22  ;;  %v1614_v42 = vsel %vm5337_vm7, %v5183_v59, %v1610_v55  ;;  %v1426_v43 = vadd.f32 %v6569_v37, %v6568_v2  ;;  %v3520_v47 = vmul.f32 -1.442695, %v1420_v17 }
 0x278   : > { %3689 = vpow2.f32 %v3505_v41  ;;  %v3518_v41 = vmul.f32 -1.442695, %v1414_v14  ;;  %v1654_v14 = vmul.f32 %v5240_v27, %v1653_v21  ;;  %v5361_v29 = vmul.f32 %v6570_v15, %v1604_v26 }
 0x279   : > { %v5266_v38 = vpop.f32.mrf.mxu1  ;;  %3691 = vrcp.f32 %v5242_v25  ;;  %vm1616_vm8 = vcmp.eq.f32.partialorder %v1615_v10, 8.507059e+37  ;;  %v3523_v20 = vmul.f32 -1.442695, %v1429_v33  ;;  %v3521_v55 = vmul.f32 -1.442695, %v1423_v58 }
 0x27a   : > { %3693 = vrcp.f32 %v5261_v12  ;;  %6571 = vst [vmem:[#allocation7_spill] sm:$0xff] %v5361_v29  ;;  %v1619_v62 = vsel %vm1616_vm8, %v1618_v31, %v1614_v42  ;;  %v1655_v21 = vadd.f32 %v5240_v27, %v1654_v14  ;;  %vm1657_vm9 = vweird.f32 %v5240_v27 }
 0x27b   : > { %3695 = vrcp.f32 %v5275_v56  ;;  %v1662_v9 = vand.u32 2147483648, %v5178_v11  ;;  %v3522_v7 = vmul.f32 -1.442695, %v1426_v43  ;;  %vm1656_vm10 = vweird.f32 %v5178_v11 }
 0x27c   : > { %v3686_v61 = vpop.eup %3685  ;;  %3697 = vrcp.f32 %v5287_v63  ;;  %v1660_v19 = vand.u32 2147483647, %v5178_v11  ;;  %v5384_v17 = vmul.f32 %v6573_v60, %v1619_v62  ;;  %vm5388_vm11 = vmor %vm1656_vm10, %vm1657_vm9  ;;  %v1692_v2 = vand.u32 2147483648, %v5242_v25 }
 0x27d   : > { %v5308_v51 = vpop.eup %3687  ;;  %v5312_v13 = vmul.f32 %v3686_v61, %v2242_v4  ;;  %3699 = vrcp.f32 %v5298_v45  ;;  %v3524_v4 = vmul.f32 -1.442695, %v1432_v57  ;;  %v1663_v50 = vor.u32 1.1754944e-38, %v1662_v9 }
 0x27e   : > { %v3690_v6 = vpop.eup %3689  ;;  %3701 = vpow2.f32 %v3516_v39  ;;  %v6572_v39 = vld [vmem:[#allocation37_spill] sm:$0xff]  ;;  %6574 = vst [vmem:[#allocation42_spill] sm:$0xff] %v5384_v17  ;;  %vm1661_vm12 = vcmp.eq.f32.partialorder %v1660_v19, 8.507059e+37  ;;  %vm1686_vm13 = vweird.f32 %v5242_v25  ;;  %v1693_v19 = vor.u32 1.1754944e-38, %v1692_v2 }
 0x27f   : > { %6557 = vst [vmem:[#allocation40_spill] sm:$0xff] %v5312_v13  ;;  %v5321_v8 = vpop.eup %3691  ;;  %v5329_v44 = vadd.f32 1.0, %v3690_v6  ;;  %3703 = vpow2.f32 %v3518_v41  ;;  %v5369_v6 = vmul.f32 %v6572_v39, %v1784_v3  ;;  %v1659_v3 = vsel %vm5388_vm11, %v5240_v27, %v1655_v21 }
 0x280   : > { %v5351_v0 = vpop.eup %3693  ;;  %v1682_v32 = vmul.f32 %v5321_v8, %v5242_v25  ;;  %3705 = vrcp.f32 %v5317_v52  ;;  %vm1687_vm14 = vweird.f32 %v5321_v8  ;;  %v1705_v26 = vand.u32 2147483647, %v5275_v56 }
 0x281   : > { %v5341_v23 = vpop.f32.mrf.mxu1  ;;  %v5358_v61 = vpop.eup %3695  ;;  %3707 = vpow2.f32 %v3519_v30  ;;  %v1921_v30 = vand.u32 2147483648, %v5298_v45  ;;  %vm5446_vm0 = vmor %vm1686_vm13, %vm1687_vm14  ;;  %vm1701_vm2 = vweird.f32 %v5275_v56  ;;  %vm1915_vm6 = vweird.f32 %v5298_v45 }
 0x282   : > { %v5365_v59 = vpop.eup %3697  ;;  %3709 = vrcp.f32 %v5329_v44  ;;  %v1697_v10 = vmul.f32 %v5358_v61, %v5275_v56  ;;  %v1683_v57 = vsub.f32 1.0, %v1682_v32  ;;  %v1690_v32 = vand.u32 2147483647, %v5242_v25 }
 0x283   : > { %v5371_v41 = vpop.eup %3699  ;;  %3711 = vpow2.f32 %v3524_v4  ;;  %v5409_v37 = vor.u32 1.1754944e-38, %v1921_v30  ;;  %v5421_v39 = vmul.f32 %v5365_v59, %v5287_v63  ;;  %vm1702_vm1 = vweird.f32 %v5358_v61 }
 0x284   : > { %v3702_v48 = vpop.eup %3701  ;;  %3713 = vpow2.f32 %v3520_v47  ;;  %v1911_v36 = vmul.f32 %v5371_v41, %v5298_v45  ;;  %v1684_v42 = vmul.f32 %v5321_v8, %v1683_v57  ;;  %v1698_v14 = vsub.f32 1.0, %v1697_v10  ;;  %vm5478_vm4 = vmor %vm1701_vm2, %vm1702_vm1 }
 0x285   : > { %v3704_v31 = vpop.eup %3703  ;;  %3715 = vpow2.f32 %v3523_v20  ;;  %v5397_v35 = vadd.f32 1.0, %v3702_v48  ;;  %6577 = vst [vmem:[#allocation14_spill] sm:$0xff] %v5409_v37  ;;  %v1664_v47 = vsel %vm1661_vm12, %v1663_v50, %v1659_v3  ;;  %vm5432_vm15 = vcmp.eq.f32.partialorder %v1690_v32, 8.507059e+37  ;;  %v6600_v37 = vld [vmem:[#allocation46_spill] sm:$0xff] }
 0x286   : > { %v5381_v40 = vpop.eup %3705  ;;  %3717 = vpow2.f32 %v3521_v55  ;;  %v5404_v58 = vadd.f32 1.0, %v3704_v31  ;;  %v1912_v15 = vsub.f32 1.0, %v1911_v36  ;;  %v1685_v21 = vadd.f32 %v5321_v8, %v1684_v42 }
 0x287   : > { %v3708_v33 = vpop.eup %3707  ;;  %3719 = vpow2.f32 %v3522_v7  ;;  %v1712_v27 = vmul.f32 %v5381_v40, %v5317_v52  ;;  %v1699_v9 = vmul.f32 %v5358_v61, %v1698_v14  ;;  %v6578_v7 = vld [vmem:[#allocation59_spill] sm:$0xff]  ;;  %v1707_v42 = vand.u32 2147483648, %v5275_v56 }
 0x288   : > { %v5402_v16 = vpop.eup %3709  ;;  %v5413_v4 = vadd.f32 1.0, %v3708_v33  ;;  %3721 = vrcp.f32 %v5397_v35  ;;  %v5430_v57 = vmul.f32 %v6578_v7, %v1664_v47  ;;  %v1913_v32 = vmul.f32 %v5371_v41, %v1912_v15 }
 0x289   : > { %v5392_v46 = vpop.f32.mrf.mxu1  ;;  %v3712_v43 = vpop.eup %3711  ;;  %v1727_v62 = vmul.f32 %v5402_v16, %v5329_v44  ;;  %3723 = vrcp.f32 %v5404_v58  ;;  %v1713_v36 = vsub.f32 1.0, %v1712_v27  ;;  %v1700_v27 = vadd.f32 %v5358_v61, %v1699_v9 }
 0x28a   : > { %v3714_v20 = vpop.eup %3713  ;;  %v5427_v10 = vadd.f32 1.0, %v3712_v43  ;;  %3725 = vrcp.f32 %v5413_v4  ;;  %v1689_v43 = vsel %vm5446_vm0, %v5321_v8, %v1685_v21  ;;  %v1966_v15 = vand.u32 2147483648, %v5397_v35 }
 0x28b   : > { %v3716_v55 = vpop.eup %3715  ;;  %v5437_v60 = vadd.f32 1.0, %v3714_v20  ;;  %v1728_v14 = vsub.f32 1.0, %v1727_v62  ;;  %vm5469_vm3 = vcmp.eq.f32.partialorder %v1705_v26, 8.507059e+37  ;;  %v1714_v62 = vmul.f32 %v5381_v40, %v1713_v36 }
 0x28c   : > { %v3718_v48 = vpop.eup %3717  ;;  %v5442_v3 = vadd.f32 1.0, %v3716_v55  ;;  %3727 = vrcp.f32 %v5427_v10  ;;  %v1694_v21 = vsel %vm5432_vm15, %v1693_v19, %v1689_v43  ;;  %v1708_v9 = vor.u32 1.1754944e-38, %v1707_v42  ;;  %v6588_v42 = vld [vmem:[#allocation15_spill] sm:$0xff] }
 0x28d   : > { %v3720_v30 = vpop.eup %3719  ;;  %v5452_v2 = vadd.f32 1.0, %v3718_v48  ;;  %3729 = vrcp.f32 %v5437_v60  ;;  %v1729_v48 = vmul.f32 %v5402_v16, %v1728_v14  ;;  %vm1916_vm5 = vweird.f32 %v5371_v41 }
 0x28e   : > { %v5459_v25 = vpop.eup %3721  ;;  %v5461_v47 = vadd.f32 1.0, %v3720_v30  ;;  %3731 = vrcp.f32 %v5442_v3  ;;  %v1704_v30 = vsel %vm5478_vm4, %v5358_v61, %v1700_v27  ;;  %v1720_v31 = vand.u32 2147483647, %v5317_v52  ;;  %vm5576_vm15 = vmor %vm1915_vm6, %vm1916_vm5 }
 0x28f   : > { %v5466_v20 = vpop.eup %3723  ;;  %3733 = vrcp.f32 %v5452_v2  ;;  %v1956_v19 = vmul.f32 %v5459_v25, %v5397_v35  ;;  %v1722_v26 = vand.u32 2147483648, %v5317_v52  ;;  %v5497_v50 = vor.u32 1.1754944e-38, %v1966_v15 }
 0x290   : > { %v5484_v7 = vpop.eup %3725  ;;  %3735 = vrcp.f32 %v5461_v47  ;;  %v1986_v36 = vmul.f32 %v5466_v20, %v5404_v58  ;;  %v5501_v14 = vmul.f32 %v6588_v42, %v1694_v21  ;;  %v1715_v61 = vadd.f32 %v5381_v40, %v1714_v62 }
 0x291   : > { %v5440_v33 = vpop.f32.mrf.mxu1  ;;  %6587 = vst [vmem:[#allocation57_spill] sm:$0xff] %v5497_v50  ;;  %vm1716_vm7 = vweird.f32 %v5317_v52  ;;  %vm1717_vm8 = vweird.f32 %v5381_v40  ;;  %v1709_v56 = vsel %vm5469_vm3, %v1708_v9, %v1704_v30  ;;  %v1730_v15 = vadd.f32 %v5402_v16, %v1729_v48 }
 0x292   : > { %v5508_v27 = vpop.eup %3727  ;;  %vm1732_vm9 = vweird.f32 %v5402_v16  ;;  %v2001_v21 = vmul.f32 %v5484_v7, %v5413_v4  ;;  %vm5518_vm10 = vcmp.eq.f32.partialorder %v1720_v31, 8.507059e+37  ;;  %v1735_v62 = vand.u32 2147483647, %v5329_v44  ;;  %vm5526_vm11 = vmor %vm1716_vm7, %vm1717_vm8 }
 0x293   : > { %v5516_v42 = vpop.eup %3729  ;;  %v1737_v11 = vand.u32 2147483648, %v5329_v44  ;;  %v1957_v55 = vsub.f32 1.0, %v1956_v19  ;;  %v1723_v48 = vor.u32 1.1754944e-38, %v1722_v26  ;;  %vm1731_vm12 = vweird.f32 %v5329_v44 }
 0x294   : > { %v5524_v8 = vpop.eup %3731  ;;  %v1987_v30 = vsub.f32 1.0, %v1986_v36  ;;  %v1996_v31 = vand.u32 2147483648, %v5404_v58  ;;  %v5535_v13 = vmul.f32 %v6593_v5, %v1709_v56  ;;  %v1719_v19 = vsel %vm5526_vm11, %v5381_v40, %v1715_v61  ;;  %vm5542_vm13 = vmor %vm1731_vm12, %vm1732_vm9 }
 0x295   : > { %v5532_v54 = vpop.eup %3733  ;;  %v2076_v44 = vmul.f32 %v5508_v27, %v5427_v10  ;;  %v5549_v26 = vadd.f32 %v5371_v41, %v1913_v32  ;;  %v1734_v5 = vsel %vm5542_vm13, %v5402_v16, %v1730_v15  ;;  %v2016_v40 = vmul.f32 %v5516_v42, %v5437_v60 }
 0x296   : > { %v5551_v36 = vpop.eup %3735  ;;  %v2002_v61 = vsub.f32 1.0, %v2001_v21  ;;  %vm1736_vm14 = vcmp.eq.f32.partialorder %v1735_v62, 8.507059e+37  ;;  %v1738_v9 = vor.u32 1.1754944e-38, %v1737_v11  ;;  %v2061_v29 = vmul.f32 %v5524_v8, %v5442_v3 }
 0x297   : > { %v1958_v32 = vmul.f32 %v5459_v25, %v1957_v55  ;;  %v1724_v34 = vsel %vm5518_vm10, %v1723_v48, %v1719_v19  ;;  %v2031_v49 = vmul.f32 %v5532_v54, %v5452_v2  ;;  %v1988_v16 = vmul.f32 %v5466_v20, %v1987_v30  ;;  %v6599_v19 = vld [vmem:[#allocation49_spill] sm:$0xff] }
 0x298   : > { %v5567_v15 = vor.u32 1.1754944e-38, %v1996_v31  ;;  %v1739_v21 = vsel %vm1736_vm14, %v1738_v9, %v1734_v5  ;;  %v2077_v56 = vsub.f32 1.0, %v2076_v44  ;;  %v2046_v11 = vmul.f32 %v5551_v36, %v5461_v47 }
 0x299   : > { %v5506_v43 = vpop.f32.mrf.mxu1  ;;  %v2026_v62 = vand.u32 2147483648, %v5437_v60  ;;  %v6596_v55 = vmov 0  ;;  %v2017_v52 = vsub.f32 1.0, %v2016_v40  ;;  %v2003_v48 = vmul.f32 %v5484_v7, %v2002_v61 }
 0x29a   : > { %v6597_v55 = vsel %vm5576_vm15, 4294967295, %v6596_v55  ;;  %v5587_v44 = vmul.f32 %v6599_v19, %v1724_v34  ;;  %v2062_v5 = vsub.f32 1.0, %v2061_v29  ;;  %v5591_v17 = vadd.f32 %v5459_v25, %v1958_v32  ;;  %v6605_v32 = vld [vmem:[#allocation8_spill] sm:$0xff] }
 0x29b   : > { %6598 = vst [vmem:[#allocation30_spill] sm:$0xff] %v6597_v55  ;;  %v2198_v40 = vmul.f32 %v6600_v37, %v1739_v21  ;;  %v2032_v61 = vsub.f32 1.0, %v2031_v49  ;;  %v2024_v30 = vand.u32 2147483647, %v5437_v60  ;;  %v5596_v50 = vadd.f32 %v5466_v20, %v1988_v16  ;;  %v6601_v55 = vld [vmem:[#allocation9_spill] sm:$0xff] }
 0x29c   : > { %v2078_v34 = vmul.f32 %v5508_v27, %v2077_v56  ;;  %v2047_v19 = vsub.f32 1.0, %v2046_v11  ;;  %v5600_v29 = vor.u32 1.1754944e-38, %v2026_v62  ;;  %v2039_v9 = vand.u32 2147483647, %v5452_v2  ;;  %v6603_v56 = vld [vmem:[#allocation10_spill] sm:$0xff] }
 0x29d   : > { %v5605_v37 = vmul.f32 %v5516_v42, %v2017_v52  ;;  %v5608_v49 = vadd.f32 %v5484_v7, %v2003_v48  ;;  %v2063_v16 = vmul.f32 %v5524_v8, %v2062_v5  ;;  %vm2050_vm0 = vweird.f32 %v5461_v47 }
 0x29e   : > { %vm2036_vm1 = vweird.f32 %v5532_v54  ;;  %v1474_v21 = vadd.f32 %v5506_v43, %v6603_v56  ;;  %vm2051_vm2 = vweird.f32 %v5551_v36  ;;  %v2056_v11 = vand.u32 2147483648, %v5461_v47  ;;  %v6604_v43 = vld [vmem:[#allocation11_spill] sm:$0xff] }
 0x29f   : > { %v2033_v62 = vmul.f32 %v5532_v54, %v2032_v61  ;;  %v2079_v48 = vadd.f32 %v5508_v27, %v2078_v34  ;;  %vm2081_vm3 = vweird.f32 %v5508_v27  ;;  %v2048_v5 = vmul.f32 %v5551_v36, %v2047_v19 }
 0x2a0   : > { %vm2035_vm4 = vweird.f32 %v5452_v2  ;;  %vm2021_vm5 = vweird.f32 %v5516_v42  ;;  %v1471_v56 = vadd.f32 %v5440_v33, %v6604_v43  ;;  %v2086_v61 = vand.u32 2147483648, %v5427_v10  ;;  %v6606_v33 = vld [vmem:[#allocation12_spill] sm:$0xff] }
 0x2a1   : > { %v1476_v63 = vpop.f32.mrf.mxu1  ;;  %vm1991_vm6 = vweird.f32 %v5466_v20  ;;  %vm2080_vm7 = vweird.f32 %v5427_v10  ;;  %v2064_v34 = vadd.f32 %v5524_v8, %v2063_v16  ;;  %vm2066_vm8 = vweird.f32 %v5524_v8 }
 0x2a2   : > { %v1477_v31 = vadd.f32 %v1476_v63, %v6601_v55  ;;  %vm2020_vm9 = vweird.f32 %v5437_v60  ;;  %vm2006_vm10 = vweird.f32 %v5484_v7  ;;  %v1468_v19 = vadd.f32 %v5392_v46, %v6606_v33  ;;  %vm5647_vm11 = vmor %vm2080_vm7, %vm2081_vm3  ;;  %v2282_v60 = vld [vmem:[%s6412_s8] sm:$0xff] }
 0x2a3   : > { %vm2065_vm12 = vweird.f32 %v5442_v3  ;;  %vm1990_vm13 = vweird.f32 %v5404_v58  ;;  %v2083_v16 = vsel %vm5647_vm11, %v5508_v27, %v2079_v48  ;;  %v2069_v46 = vand.u32 2147483647, %v5442_v3 }
 0x2a4   : > { %v2216_v55 = vadd.f32 %v5204_v24, %v1477_v31  ;;  %v2071_v24 = vand.u32 2147483648, %v5442_v3  ;;  %v2084_v31 = vand.u32 2147483647, %v5427_v10  ;;  %v2087_v43 = vor.u32 1.1754944e-38, %v2086_v61  ;;  %vm5668_vm7 = vmor %vm2065_vm12, %vm2066_vm8  ;;  %v6635_v3 = vld [vmem:[#allocation16_spill] sm:$0xff] }
 0x2a5   : > { %v2068_v27 = vsel %vm5668_vm7, %v5524_v8, %v2064_v34  ;;  %vm5676_vm3 = vcmp.eq.f32.partialorder %v2024_v30, 8.507059e+37  ;;  %vm1960_vm14 = vweird.f32 %v5397_v35  ;;  %vm5689_vm8 = vmor %vm2050_vm0, %vm2051_vm2  ;;  %vm2070_vm12 = vcmp.eq.f32.partialorder %v2069_v46, 8.507059e+37 }
 0x2a6   : > { %3737 = vtanh.f32 %v2216_v55  ;;  %v2214_v55 = vadd.f32 %v2198_v40, %v1471_v56  ;;  %vm2085_vm11 = vcmp.eq.f32.partialorder %v2084_v31, 8.507059e+37  ;;  %v2072_v48 = vor.u32 1.1754944e-38, %v2071_v24  ;;  %v2300_v40 = vld [vmem:[%s5661_s1 + $0x10] sm:$0xff]  ;;  %v6614_v56 = vld [vmem:[#allocation39_spill] sm:$0xff] }
 0x2a7   : > { %v1462_v61 = vadd.f32 %v5266_v38, %v6614_v56  ;;  %v2213_v31 = vadd.f32 %v5587_v44, %v1468_v19  ;;  %v2088_v33 = vsel %vm2085_vm11, %v2087_v43, %v2083_v16  ;;  %vm5698_vm7 = vcmp.eq.f32.partialorder %v2039_v9, 8.507059e+37  ;;  %v2299_v9 = vld [vmem:[%s5661_s1 + $0x8] sm:$0xff]  ;;  %vm5724_vm11 = vmor %vm2035_vm4, %vm2036_vm1 }
 0x2a8   : > { %v2019_v44 = vadd.f32 %v5516_v42, %v5605_v37  ;;  %v6622_v34 = vand.u32 2147483647, %v5404_v58  ;;  %v2057_v37 = vor.u32 1.1754944e-38, %v2056_v11  ;;  %v2249_v16 = vsub.f32 1.0, %v2088_v33  ;;  %vm5755_vm4 = vmor %vm2020_vm9, %vm2021_vm5  ;;  %v2283_v24 = vld [vmem:[%s6412_s8 + $0x8] sm:$0xff]  ;;  %v6660_v58 = vld [vmem:[#allocation61_spill] sm:$0xff] }
 0x2a9   : > { %v1479_v52 = vpop.f32.mrf.mxu1  ;;  %v6627_v46 = vand.u32 2147483647, %v5461_v47  ;;  %v6628_v11 = vand.u32 2147483648, %v5452_v2  ;;  %v2298_v47 = vld [vmem:[%s5661_s1] sm:$0xff]  ;;  %v2211_v2 = vadd.f32 %v5501_v14, %v1462_v61  ;;  %vm2302_vm5 = vcmask 261120  }
 0x2aa   : > { %v1480_v63 = vadd.f32 %v1479_v52, %v6605_v32  ;;  %v2215_v32 = vadd.f32 %v5026_v53, %v1474_v21  ;;  %v2049_v53 = vadd.f32 %v5551_v36, %v2048_v5  ;;  %v2034_v5 = vadd.f32 %v5532_v54, %v2033_v62 }
 0x2ab   : > { %v6619_v62 = vand.u32 2147483647, %v5413_v4  ;;  %vm5712_vm2 = vcmp.eq.f32.partialorder %v6622_v34, 8.507059e+37  ;;  %vm6640_vm9 = vweird.f32 %v5413_v4  ;;  %v1897_v61 = vsub.f32 1.0, %v5421_v39 }
 0x2ac   : > { %v2217_v52 = vadd.f32 %v5369_v6, %v1480_v63  ;;  %v2301_v6 = vld [vmem:[%s5661_s1 + $0x18] sm:$0xff]  ;;  %v2053_v30 = vsel %vm5689_vm8, %v5551_v36, %v2049_v53  ;;  %v3738_v10 = vpop.eup %3737  ;;  %vm2055_vm8 = vcmp.eq.f32.partialorder %v6627_v46, 8.507059e+37  ;;  %v2042_v53 = vor.u32 1.1754944e-38, %v6628_v11  ;;  %v6650_v46 = vld [vmem:[#allocation64_spill] sm:$0xff] }
 0x2ad   : > { %v6609_v63 = vld [vmem:[#allocation13_spill] sm:$0xff]  ;;  %2363 = vmatpush.msrb.mxu2 %v2301_v6  ;;  %vm5706_vm0 = vcmp.eq.f32.partialorder %v6619_v62, 8.507059e+37  ;;  %v6629_v6 = vand.u32 2147483647, %v5397_v35  ;;  %v6647_v62 = vld [vmem:[#allocation18_spill] sm:$0xff] }
 0x2ae   : > { %v1465_v21 = vadd.f32 %v5341_v23, %v6609_v63  ;;  %3739 = vtanh.f32 %v2217_v52  ;;  %v6648_v35 = vld [vmem:[#allocation65_spill] sm:$0xff]  ;;  %v1851_v52 = vmul.f32 %v5133_v28, %v5039_v18  ;;  %v6655_v63 = vld [vmem:[#allocation66_spill] sm:$0xff] }
 0x2af   : > { %3741 = vtanh.f32 %v2215_v32  ;;  %2364 = vmatpush.msrb.mxu2 %v2300_v40  ;;  %v2073_v32 = vsel %vm2070_vm12, %v2072_v48, %v2068_v27  ;;  %vm5737_vm12 = vcmp.eq.f32.partialorder %v6629_v6, 8.507059e+37  ;;  %v2058_v27 = vsel %vm2055_vm8, %v2057_v37, %v2053_v30  ;;  %vm5781_vm8 = vmor %vm6640_vm9, %vm2006_vm10  ;;  %v6654_v6 = vld [vmem:[#allocation14_spill] sm:$0xff] }
 0x2b0   : > { %v2212_v19 = vadd.f32 %v5535_v13, %v1465_v21  ;;  %3743 = vtanh.f32 %v2214_v55  ;;  %v2038_v13 = vsel %vm5724_vm11, %v5532_v54, %v2034_v5  ;;  %v6632_v21 = vand.u32 2147483647, %v5298_v45  ;;  %vm5768_vm11 = vmor %vm1990_vm13, %vm1991_vm6  ;;  %v6658_v55 = vld [vmem:[#allocation20_spill] sm:$0xff] }
 0x2b1   : > { %2365 = vmatpush.msrb.mxu2 %v2299_v9  ;;  %v1456_v54 = vadd.f32 %v5156_v1, %v6635_v3  ;;  %3745 = vtanh.f32 %v2213_v31  ;;  %v2248_v5 = vsub.f32 1.0, %v2073_v32  ;;  %v2023_v1 = vsel %vm5755_vm4, %v5516_v42, %v2019_v44 }
 0x2b2   : > { %vm5743_vm1 = vcmp.eq.f32.partialorder %v6632_v21, 8.507059e+37  ;;  %3747 = vtanh.f32 %v2212_v19  ;;  %v2043_v56 = vsel %vm5698_vm7, %v2042_v53, %v2038_v13  ;;  %v1993_v42 = vsel %vm5768_vm11, %v5466_v20, %v5596_v50 }
 0x2b3   : > { %2366 = vmatpush.msrb.mxu2 %v2298_v47  ;;  %v5792_v31 = vmul.f32 %v3738_v10, %v2248_v5  ;;  %v2247_v33 = vsub.f32 1.0, %v2058_v27  ;;  %v2008_v8 = vsel %vm5781_vm8, %v5484_v7, %v5608_v49  ;;  %v1881_v30 = vmul.f32 %v5351_v0, %v5261_v12  ;;  %v6656_v27 = vld [vmem:[#allocation62_spill] sm:$0xff] }
 0x2b4   : > { %v3740_v43 = vpop.eup %3739  ;;  %3525 = vmatmul.msk.f32.vlgmr.msrb.gmra.mxu2 %vm2302_vm5, %v2282_v60  ;;  %v2209_v20 = vadd.f32 %v5430_v57, %v1456_v54  ;;  %3749 = vtanh.f32 %v2211_v2  ;;  %v2028_v39 = vsel %vm5676_vm3, %v5600_v29, %v2023_v1  ;;  %v6643_v50 = vand.u32 2147483648, %v5413_v4  ;;  %v6657_v5 = vld [vmem:[#allocation42_spill] sm:$0xff] }
 0x2b5   : > { %v5759_v45 = vmul.f32 %v3740_v43, %v2249_v16  ;;  %v3742_v40 = vpop.eup %3741  ;;  %vm6644_vm6 = vweird.f32 %v5459_v25  ;;  %v2246_v57 = vsub.f32 1.0, %v2043_v56  ;;  %v1866_v4 = vmul.f32 %v5308_v51, %v5224_v22  ;;  %v6649_v16 = vld [vmem:[#allocation52_spill] sm:$0xff]  ;;  %v6659_v56 = vld [vmem:[#allocation21_spill] sm:$0xff] }
 0x2b6   : > { %v3744_v38 = vpop.eup %3743  ;;  %v2012_v44 = vor.u32 1.1754944e-38, %v6643_v50  ;;  %vm5810_vm10 = vmor %vm1960_vm14, %vm6644_vm6  ;;  %v5815_v49 = vmul.f32 %v3742_v40, %v2247_v33  ;;  %v1447_v34 = vadd.f32 %v6648_v35, %v6647_v62  ;;  %v1998_v19 = vsel %vm5712_vm2, %v5567_v15, %v1993_v42  ;;  %v6651_v15 = vld [vmem:[#allocation57_spill] sm:$0xff]  ;;  %v6662_v33 = vld [vmem:[#allocation56_spill] sm:$0xff] }
 0x2b7   : > { %2416 = vmatpush.msrb.mxu3 %v5759_v45  ;;  %v1963_v29 = vsel %vm5810_vm10, %v5459_v25, %v5591_v17  ;;  %v3746_v23 = vpop.eup %3745  ;;  %v1898_v32 = vmul.f32 %v5365_v59, %v1897_v61  ;;  %v5832_v37 = vmul.f32 %v3744_v38, %v2246_v57  ;;  %v2245_v17 = vsub.f32 1.0, %v2028_v39  ;;  %v6661_v61 = vld [vmem:[#allocation70_spill] sm:$0xff] }
 0x2b8   : > { %v2013_v9 = vsel %vm5706_vm0, %v2012_v44, %v2008_v8  ;;  %v1882_v25 = vsub.f32 1.0, %v1881_v30  ;;  %v3748_v10 = vpop.eup %3747  ;;  %v1444_v36 = vadd.f32 %v6650_v46, %v6649_v16  ;;  %3751 = vtanh.f32 %v2209_v20  ;;  %v6663_v30 = vld [vmem:[#allocation7_spill] sm:$0xff]  ;;  %v2290_v62 = vld [vmem:[%s6412_s8 + $0x40] sm:$0xff] }
 0x2b9   : > { %2417 = vmatpush.msrb.mxu3 %v5792_v31  ;;  %v1968_v13 = vsel %vm5737_vm12, %v6651_v15, %v1963_v29  ;;  %v6653_v53 = vsel %vm5576_vm15, %v5371_v41, %v5549_v26  ;;  %v5855_v47 = vmul.f32 %v3746_v23, %v2245_v17  ;;  %v2244_v43 = vsub.f32 1.0, %v2013_v9  ;;  %v2284_v9 = vld [vmem:[%s6412_s8 + $0x10] sm:$0xff]  ;;  %v2287_v44 = vld [vmem:[%s6412_s8 + $0x28] sm:$0xff] }
 0x2ba   : > { %v5852_v21 = vsel %vm5743_vm1, %v6654_v6, %v6653_v53  ;;  %v2243_v3 = vsub.f32 1.0, %v1998_v19  ;;  %v1867_v54 = vsub.f32 1.0, %v1866_v4  ;;  %v3750_v2 = vpop.eup %3749  ;;  %v1441_v48 = vadd.f32 %v6656_v27, %v6655_v63  ;;  %v6668_v19 = vld [vmem:[#allocation67_spill] sm:$0xff]  ;;  %v6669_v17 = vld [vmem:[#allocation40_spill] sm:$0xff] }
 0x2bb   : > { %2418 = vmatpush.msrb.mxu3 %v5815_v49  ;;  %v2206_v1 = vadd.f32 %v6657_v5, %v1447_v34  ;;  %v1899_v41 = vadd.f32 %v5365_v59, %v1898_v32  ;;  %vm1901_vm15 = vweird.f32 %v5365_v59  ;;  %v5864_v26 = vmul.f32 %v3748_v10, %v2244_v43  ;;  %v2295_v16 = vld [vmem:[%s6412_s8 + $0x68] sm:$0xff]  ;;  %v2280_v6 = vld [vmem:[%s6411_s7 + $0x70] sm:$0xff] }
 0x2bc   : > { %3526 = vmatmul.msk.f32.gmra.mxu2 %vm2302_vm5, %v2283_v24  ;;  %v1904_v14 = vand.u32 2147483647, %v6658_v55  ;;  %v1883_v60 = vmul.f32 %v5351_v0, %v1882_v25  ;;  %v1852_v40 = vsub.f32 1.0, %v1851_v52  ;;  %v1438_v42 = vadd.f32 %v6660_v58, %v6659_v56 }
 0x2bd   : > { %2419 = vmatpush.msrb.mxu3 %v5832_v37  ;;  %v2188_v8 = vmul.f32 %v6662_v33, %v6661_v61  ;;  %v2205_v38 = vadd.f32 %v6663_v30, %v1444_v36  ;;  %vm1900_vm13 = vweird.f32 %v6658_v55  ;;  %v5875_v20 = vmul.f32 %v3750_v2, %v2243_v3 }
 0x2be   : > { %v2241_v39 = vsub.f32 1.0, %v1968_v13  ;;  %v2238_v50 = vsub.f32 1.0, %v5852_v21  ;;  %vm5880_vm14 = vmor %vm1900_vm13, %vm1901_vm15  ;;  %v1868_v7 = vmul.f32 %v5308_v51, %v1867_v54  ;;  %v3752_v57 = vpop.eup %3751  ;;  %3753 = vtanh.f32 %v2206_v1  ;;  %v6674_v21 = vld [vmem:[#allocation69_spill] sm:$0xff]  ;;  %v6675_v54 = vld [vmem:[#allocation60_spill] sm:$0xff] }
 0x2bf   : > { %2420 = vmatpush.msrb.mxu3 %v5855_v47  ;;  %v2204_v29 = vadd.f32 %v2188_v8, %v1441_v48  ;;  %v1903_v4 = vsel %vm5880_vm14, %v5365_v59, %v1899_v41  ;;  %v1906_v23 = vand.u32 2147483648, %v6658_v55  ;;  %vm5890_vm3 = vcmp.eq.f32.partialorder %v1904_v14, 8.507059e+37  ;;  %v6678_v48 = vld [vmem:[#allocation68_spill] sm:$0xff] }
 0x2c0   : > { %v1884_v35 = vadd.f32 %v5351_v0, %v1883_v60  ;;  %vm1886_vm7 = vweird.f32 %v5351_v0  ;;  %v1853_v34 = vmul.f32 %v5133_v28, %v1852_v40  ;;  %v2203_v59 = vadd.f32 %v6668_v19, %v1438_v42  ;;  %v2285_v1 = vld [vmem:[%s6412_s8 + $0x18] sm:$0xff]  ;;  %v2292_v19 = vld [vmem:[%s6412_s8 + $0x50] sm:$0xff] }
 0x2c1   : > { %2421 = vmatpush.msrb.mxu3 %v5864_v26  ;;  %3755 = vtanh.f32 %v2205_v38  ;;  %vm1885_vm0 = vweird.f32 %v5261_v12  ;;  %v1891_v32 = vand.u32 2147483648, %v5261_v12  ;;  %v5904_v25 = vmul.f32 %v3752_v57, %v2241_v39  ;;  %v2266_v38 = vld [vmem:[%s6411_s7] sm:$0xff]  ;;  %v2288_v57 = vld [vmem:[%s6412_s8 + $0x30] sm:$0xff] }
 0x2c2   : > { %v1889_v52 = vand.u32 2147483647, %v5261_v12  ;;  %v1869_v24 = vadd.f32 %v5308_v51, %v1868_v7  ;;  %vm1871_vm2 = vweird.f32 %v5308_v51  ;;  %3757 = vtanh.f32 %v2204_v29  ;;  %vm5909_vm12 = vmor %vm1885_vm0, %vm1886_vm7  ;;  %v2286_v39 = vld [vmem:[%s6412_s8 + $0x20] sm:$0xff]  ;;  %v2268_v7 = vld [vmem:[%s6411_s7 + $0x10] sm:$0xff] }
 0x2c3   : > { %2422 = vmatpush.msrb.mxu3 %v5875_v20  ;;  %v1907_v10 = vor.u32 1.1754944e-38, %v1906_v23  ;;  %vm1870_vm1 = vweird.f32 %v5224_v22  ;;  %v1876_v46 = vand.u32 2147483648, %v5224_v22  ;;  %v1888_v12 = vsel %vm5909_vm12, %v5351_v0, %v1884_v35  ;;  %v2269_v29 = vld [vmem:[%s6411_s7 + $0x18] sm:$0xff]  ;;  %v2270_v23 = vld [vmem:[%s6411_s7 + $0x20] sm:$0xff]  ;;  %v2271_v35 = vld [vmem:[%s6411_s7 + $0x28] sm:$0xff] }
 0x2c4   : > { %3527 = vmatmul.msk.f32.gmra.mxu2 %vm2302_vm5, %v2284_v9  ;;  %v1874_v36 = vand.u32 2147483647, %v5224_v22  ;;  %v1854_v15 = vadd.f32 %v5133_v28, %v1853_v34  ;;  %vm1856_vm4 = vweird.f32 %v5133_v28  ;;  %v3754_v13 = vpop.eup %3753  ;;  %3759 = vtanh.f32 %v2203_v59  ;;  %vm5927_vm11 = vmor %vm1870_vm1, %vm1871_vm2  ;;  %v2291_v34 = vld [vmem:[%s6412_s8 + $0x48] sm:$0xff]  ;;  %v2272_v9 = vld [vmem:[%s6411_s7 + $0x30] sm:$0xff] }
 0x2c5   : > { %2423 = vmatpush.msrb.mxu3 %v6669_v17  ;;  %v1908_v11 = vsel %vm5890_vm3, %v1907_v10, %v1903_v4  ;;  %v1892_v53 = vor.u32 1.1754944e-38, %v1891_v32  ;;  %v1861_v0 = vand.u32 2147483648, %v5039_v18  ;;  %vm1890_vm9 = vcmp.eq.f32.partialorder %v1889_v52, 8.507059e+37  ;;  %v2289_v4 = vld [vmem:[%s6412_s8 + $0x38] sm:$0xff]  ;;  %v2274_v52 = vld [vmem:[%s6411_s7 + $0x40] sm:$0xff]  ;;  %v2275_v10 = vld [vmem:[%s6411_s7 + $0x48] sm:$0xff] }
 0x2c6   : > { %v1873_v22 = vsel %vm5927_vm11, %v5308_v51, %v1869_v24  ;;  %vm1855_vm8 = vweird.f32 %v5039_v18  ;;  %v1859_v43 = vand.u32 2147483647, %v5039_v18  ;;  %3761 = vtanh.f32 %v6675_v54  ;;  %v2273_v59 = vld [vmem:[%s6411_s7 + $0x38] sm:$0xff]  ;;  %v2294_v24 = vld [vmem:[%s6412_s8 + $0x60] sm:$0xff] }
 0x2c7   : > { %2424 = vmatpush.msrb.mxu3 %v5904_v25  ;;  %v3756_v3 = vpop.eup %3755  ;;  %v1893_v2 = vsel %vm1890_vm9, %v1892_v53, %v1888_v12  ;;  %v1877_v63 = vor.u32 1.1754944e-38, %v1876_v46  ;;  %vm5941_vm6 = vmor %vm1855_vm8, %vm1856_vm4  ;;  %v5946_v5 = vmul.f32 %v3754_v13, %v2238_v50  ;;  %v2237_v51 = vsub.f32 1.0, %v1908_v11  ;;  %v2267_v50 = vld [vmem:[%s6411_s7 + $0x8] sm:$0xff]  ;;  %v2293_v32 = vld [vmem:[%s6412_s8 + $0x58] sm:$0xff] }
 0x2c8   : > { %vm1875_vm10 = vcmp.eq.f32.partialorder %v1874_v36, 8.507059e+37  ;;  %v1858_v18 = vsel %vm5941_vm6, %v5133_v28, %v1854_v15  ;;  %v3758_v41 = vpop.eup %3757  ;;  %v1862_v14 = vor.u32 1.1754944e-38, %v1861_v0  ;;  %v2236_v40 = vsub.f32 1.0, %v1893_v2  ;;  %v2276_v46 = vld [vmem:[%s6411_s7 + $0x50] sm:$0xff]  ;;  %v2277_v36 = vld [vmem:[%s6411_s7 + $0x58] sm:$0xff]  ;;  %v2278_v13 = vld [vmem:[%s6411_s7 + $0x60] sm:$0xff] }
 0x2c9   : > { %2425 = vmatpush.msrb.mxu3 %v6674_v21  ;;  %6679 = vst [vmem:[#allocation44_spill] sm:$0xff] %v5946_v5  ;;  %v1878_v55 = vsel %vm1875_vm10, %v1877_v63, %v1873_v22  ;;  %v5955_v60 = vmul.f32 %v3756_v3, %v2237_v51  ;;  %vm1860_vm15 = vcmp.eq.f32.partialorder %v1859_v43, 8.507059e+37  ;;  %v2296_v12 = vld [vmem:[%s6412_s8 + $0x70] sm:$0xff]  ;;  %v2297_v15 = vld [vmem:[%s6412_s8 + $0x78] sm:$0xff]  ;;  %v2279_v53 = vld [vmem:[%s6411_s7 + $0x68] sm:$0xff] }
 0x2ca   : > { %v3760_v56 = vpop.eup %3759  ;;  %v1863_v58 = vsel %vm1860_vm15, %v1862_v14, %v1858_v18  ;;  %v5959_v28 = vmul.f32 %v3758_v41, %v2236_v40  ;;  %v2235_v42 = vsub.f32 1.0, %v1878_v55  ;;  %v2281_v22 = vld [vmem:[%s6411_s7 + $0x78] sm:$0xff] }
 0x2cb   : > { %2426 = vmatpush.msrb.mxu3 %v6678_v48  ;;  %6680 = vst [vmem:[#allocation26_spill] sm:$0xff] %v5955_v60  ;;  %v2234_v8 = vsub.f32 1.0, %v1863_v58 }
 0x2cc   : > { %3528 = vmatmul.msk.f32.gmra.mxu2 %vm2302_vm5, %v2285_v1  ;;  %6681 = vst [vmem:[#allocation54_spill] sm:$0xff] %v5959_v28  ;;  %v3762_v61 = vpop.eup %3761  ;;  %v5962_v33 = vmul.f32 %v3760_v56, %v2235_v42 }
 0x2cd   : > { %2427 = vmatpush.msrb.mxu3 %v5946_v5  ;;  %v5965_v30 = vmul.f32 %v3762_v61, %v2234_v8 }
 0x2ce   : > { %6682 = vst [vmem:[#allocation17_spill] sm:$0xff] %v5962_v33 }
 0x2cf   : > { %2428 = vmatpush.msrb.mxu3 %v5955_v60  ;;  %6683 = vst [vmem:[#allocation47_spill] sm:$0xff] %v5965_v30 }
 0x2d1   : > { %2429 = vmatpush.msrb.mxu3 %v5959_v28 }
 0x2d3   : > { %2430 = vmatpush.msrb.mxu3 %v5962_v33 }
 0x2d4   : > { %3529 = vmatmul.msk.f32.gmra.mxu2 %vm2302_vm5, %v2286_v39 }
 0x2d5   : > { %2431 = vmatpush.msrb.mxu3 %v5965_v30 }
 0x2d6   : > { %2432 = vmatmul.f32.vlgmr.msrb.gmra.mxu3 %v2266_v38 }
 0x2dc   : > { %3530 = vmatmul.msk.f32.gmra.mxu2 %vm2302_vm5, %v2287_v44 }
 0x2de   : > { %2435 = vmatmul.f32.gmra.mxu3 %v2267_v50 }
 0x2e4   : > { %3531 = vmatmul.msk.f32.gmra.mxu2 %vm2302_vm5, %v2288_v57 }
 0x2e6   : > { %2438 = vmatmul.f32.gmra.mxu3 %v2268_v7 }
 0x2ec   : > { %3532 = vmatmul.msk.f32.gmra.mxu2 %vm2302_vm5, %v2289_v4 }
 0x2ee   : > { %2441 = vmatmul.f32.gmra.mxu3 %v2269_v29  ;;  %v2575_v29 = vpop.permute.xlu2 %2574 }
 0x2f4   : > { %3533 = vmatmul.msk.f32.gmra.mxu2 %vm2302_vm5, %v2290_v62 }
 0x2f6   : > { %2444 = vmatmul.f32.gmra.mxu3 %v2270_v23  ;;  %v2570_v23 = vpop.permute.xlu0 %2569 }
 0x2fc   : > { %3534 = vmatmul.msk.f32.gmra.mxu2 %vm2302_vm5, %v2291_v34 }
 0x2fe   : > { %2447 = vmatmul.f32.gmra.mxu3 %v2271_v35  ;;  %v2560_v35 = vpop.permute.xlu2 %2559 }
 0x304   : > { %3535 = vmatmul.msk.f32.gmra.mxu2 %vm2302_vm5, %v2292_v19  ;;  %v2555_v19 = vpop.permute.xlu0 %2554 }
 0x306   : > { %2450 = vmatmul.f32.gmra.mxu3 %v2272_v9 }
 0x30c   : > { %3536 = vmatmul.msk.f32.gmra.mxu2 %vm2302_vm5, %v2293_v32  ;;  %v2545_v32 = vpop.permute.xlu2 %2544 }
 0x30e   : > { %2453 = vmatmul.f32.gmra.mxu3 %v2273_v59 }
 0x314   : > { %3537 = vmatmul.msk.f32.gmra.mxu2 %vm2302_vm5, %v2294_v24 }
 0x316   : > { %2456 = vmatmul.f32.gmra.mxu3 %v2274_v52 }
 0x31c   : > { %3538 = vmatmul.msk.f32.gmra.mxu2 %vm2302_vm5, %v2295_v16 }
 0x31e   : > { %2459 = vmatmul.f32.gmra.mxu3 %v2275_v10 }
 0x324   : > { %3539 = vmatmul.msk.f32.gmra.mxu2 %vm2302_vm5, %v2296_v12 }
 0x326   : > { %2462 = vmatmul.f32.gmra.mxu3 %v2276_v46 }
 0x32c   : > { %3540 = vmatmul.msk.f32.gmra.mxu2 %vm2302_vm5, %v2297_v15  ;;  %v6684_v15 = vld [vmem:[#allocation22_spill] sm:$0xff] }
 0x32e   : > { %2465 = vmatmul.f32.gmra.mxu3 %v2277_v36 }
 0x336   : > { %2468 = vmatmul.f32.gmra.mxu3 %v2278_v13 }
 0x337   : > { %v6055_v11 = vpop.f32.mrf.mxu2 }
 0x33e   : > { %2471 = vmatmul.f32.gmra.mxu3 %v2279_v53 }
 0x33f   : > { %v6063_v0 = vpop.f32.mrf.mxu2 }
 0x346   : > { %2474 = vmatmul.f32.gmra.mxu3 %v2280_v6  ;;  %v2540_v6 = vpop.permute.xlu0 %2539 }
 0x347   : > { %v6068_v43 = vpop.f32.mrf.mxu2 }
 0x34e   : > { %2477 = vmatmul.f32.gmra.mxu3 %v2281_v22 }
 0x34f   : > { %v6070_v3 = vpop.f32.mrf.mxu2 }
 0x357   : > { %v6076_v63 = vpop.f32.mrf.mxu2 }
 0x359   : > { %v6072_v54 = vpop.f32.mrf.mxu3 }
 0x35f   : > { %v6080_v51 = vpop.f32.mrf.mxu2 }
 0x361   : > { %v6074_v2 = vpop.f32.mrf.mxu3 }
 0x367   : > { %v2386_v1 = vpop.f32.mrf.mxu2 }
 0x369   : > { %v6078_v27 = vpop.f32.mrf.mxu3 }
 0x36f   : > { %v2389_v55 = vpop.f32.mrf.mxu2 }
 0x371   : > { %v6082_v18 = vpop.f32.mrf.mxu3 }
 0x377   : > { %v2392_v56 = vpop.f32.mrf.mxu2 }
 0x379   : > { %v6084_v41 = vpop.f32.mrf.mxu3 }
 0x37f   : > { %v2395_v42 = vpop.f32.mrf.mxu2 }
 0x381   : > { %v6086_v14 = vpop.f32.mrf.mxu3 }
 0x387   : > { %v2398_v8 = vpop.f32.mrf.mxu2 }
 0x389   : > { %v2451_v40 = vpop.f32.mrf.mxu3 }
 0x38f   : > { %v2401_v39 = vpop.f32.mrf.mxu2 }
 0x391   : > { %v2454_v58 = vpop.f32.mrf.mxu3 }
 0x397   : > { %v2404_v7 = vpop.f32.mrf.mxu2 }
 0x399   : > { %v2457_v61 = vpop.f32.mrf.mxu3 }
 0x39f   : > { %v2407_v4 = vpop.f32.mrf.mxu2 }
 0x3a1   : > { %v2460_v38 = vpop.f32.mrf.mxu3 }
 0x3a2   : > { %v2461_v60 = vadd.f32 %v2460_v38, %v2395_v42  ;;  %v2452_v42 = vadd.f32 %v2451_v40, %v2386_v1  ;;  %v2443_v40 = vadd.f32 %v6082_v18, %v6070_v3 }
 0x3a7   : > { %v2410_v34 = vpop.f32.mrf.mxu2 }
 0x3a9   : > { %v2463_v50 = vpop.f32.mrf.mxu3 }
 0x3aa   : > { %v2464_v22 = vadd.f32 %v2463_v50, %v2398_v8  ;;  %v2455_v8 = vadd.f32 %v2454_v58, %v2389_v55  ;;  %v2586_v50 = vadd.f32 %v2545_v32, %v2461_v60  ;;  %v2440_v32 = vadd.f32 %v6078_v27, %v6068_v43 }
 0x3ac   : > { %vm2602_vm2 = vcmp.gt.f32.partialorder %v2586_v50, 0.0 }
 0x3af   : > { %v2413_v52 = vpop.f32.mrf.mxu2 }
 0x3b1   : > { %v2466_v44 = vpop.f32.mrf.mxu3 }
 0x3b2   : > { %v2467_v36 = vadd.f32 %v2466_v44, %v2401_v39 }
 0x3b9   : > { %v2469_v57 = vpop.f32.mrf.mxu3 }
 0x3ba   : > { %v2470_v16 = vadd.f32 %v2469_v57, %v2404_v7  ;;  %v2458_v7 = vadd.f32 %v2457_v61, %v2392_v56  ;;  %v6685_v57 = vld [vmem:[#allocation23_spill] sm:$0xff]  ;;  %v2449_v56 = vadd.f32 %v6086_v14, %v6080_v51 }
 0x3bb   : > { %v2587_v39 = vadd.f32 %v6685_v57, %v2464_v22 }
 0x3bc   : > { %v2589_v30 = vadd.f32 %v2560_v35, %v2470_v16  ;;  %v2585_v38 = vadd.f32 %v2540_v6, %v2458_v7  ;;  %v2437_v16 = vadd.f32 %v6074_v2, %v6063_v0 }
 0x3bd   : > { %v2619_v35 = vmul.f32 0.01, %v2587_v39  ;;  %vm2603_vm0 = vcmp.gt.f32.partialorder %v2587_v39, 0.0 }
 0x3be   : > { %vm2605_vm3 = vcmp.gt.f32.partialorder %v2589_v30, 0.0  ;;  %v2617_v55 = vmul.f32 0.01, %v2585_v38  ;;  %vm2601_vm12 = vcmp.gt.f32.partialorder %v2585_v38, 0.0 }
 0x3bf   : > { %v2635_v1 = vsel %vm2603_vm0, %v2587_v39, %v2619_v35  ;;  %v2641_v39 = vld [vmem:[%s6414_s10] sm:$0xff]  ;;  %v2650_v35 = vld [vmem:[%s6414_s10 + $0x48] sm:$0xff] }
 0x3c1   : > { %v2472_v62 = vpop.f32.mrf.mxu3 }
 0x3c2   : > { %v2473_v24 = vadd.f32 %v2472_v62, %v2407_v4  ;;  %v2530_v4 = vpop.permute.xlu2 %2529 }
 0x3c3   : > { %v2583_v60 = vadd.f32 %v2530_v4, %v2452_v42  ;;  %v2647_v42 = vld [vmem:[%s6414_s10 + $0x30] sm:$0xff] }
 0x3c4   : > { %v2590_v13 = vadd.f32 %v6684_v15, %v2473_v24  ;;  %v6687_v24 = vld [vmem:[#allocation25_spill] sm:$0xff] }
 0x3c5   : > { %vm2599_vm4 = vcmp.gt.f32.partialorder %v2583_v60, 0.0 }
 0x3c6   : > { %v2622_v5 = vmul.f32 0.01, %v2590_v13  ;;  %vm2606_vm14 = vcmp.gt.f32.partialorder %v2590_v13, 0.0 }
 0x3c9   : > { %v2475_v9 = vpop.f32.mrf.mxu3 }
 0x3ca   : > { %v2476_v59 = vadd.f32 %v2475_v9, %v2410_v34  ;;  %v2588_v34 = vadd.f32 %v2555_v19, %v2467_v36  ;;  %v2525_v19 = vpop.permute.xlu0 %2524  ;;  %v2434_v36 = vadd.f32 %v6072_v54, %v6055_v11 }
 0x3cb   : > { %v2582_v58 = vadd.f32 %v2525_v19, %v2449_v56  ;;  %v2651_v19 = vld [vmem:[%s6414_s10 + $0x50] sm:$0xff]  ;;  %v2652_v56 = vld [vmem:[%s6414_s10 + $0x58] sm:$0xff] }
 0x3cc   : > { %v2591_v46 = vadd.f32 %v2570_v23, %v2476_v59  ;;  %v2621_v23 = vmul.f32 0.01, %v2589_v30  ;;  %v2620_v62 = vmul.f32 0.01, %v2588_v34  ;;  %vm2604_vm7 = vcmp.gt.f32.partialorder %v2588_v34, 0.0 }
 0x3cd   : > { %v2614_v3 = vmul.f32 0.01, %v2582_v58  ;;  %vm2598_vm11 = vcmp.gt.f32.partialorder %v2582_v58, 0.0 }
 0x3ce   : > { %v2623_v28 = vmul.f32 0.01, %v2591_v46  ;;  %vm2607_vm13 = vcmp.gt.f32.partialorder %v2591_v46, 0.0  ;;  %v2636_v59 = vsel %vm2604_vm7, %v2588_v34, %v2620_v62  ;;  %v2646_v62 = vld [vmem:[%s6414_s10 + $0x28] sm:$0xff] }
 0x3cf   : > { %v2630_v6 = vsel %vm2598_vm11, %v2582_v58, %v2614_v3 }
 0x3d0   : > { %v2639_v44 = vsel %vm2607_vm13, %v2591_v46, %v2623_v28  ;;  %v6686_v28 = vld [vmem:[#allocation24_spill] sm:$0xff] }
 0x3d1   : > { %v2478_v10 = vpop.f32.mrf.mxu3  ;;  %v2584_v61 = vadd.f32 %v6686_v28, %v2455_v8  ;;  %v2643_v8 = vld [vmem:[%s6414_s10 + $0x10] sm:$0xff]  ;;  %v2653_v28 = vld [vmem:[%s6414_s10 + $0x60] sm:$0xff] }
 0x3d2   : > { %v2479_v12 = vadd.f32 %v2478_v10, %v2413_v52  ;;  %v2618_v52 = vmul.f32 0.01, %v2586_v50  ;;  %v2510_v18 = vpop.permute.xlu0 %2509 }
 0x3d3   : > { %v2616_v14 = vmul.f32 0.01, %v2584_v61  ;;  %vm2600_vm1 = vcmp.gt.f32.partialorder %v2584_v61, 0.0  ;;  %v2579_v15 = vadd.f32 %v2510_v18, %v2440_v32 }
 0x3d4   : > { %v2592_v53 = vadd.f32 %v2575_v29, %v2479_v12  ;;  %v2638_v29 = vsel %vm2606_vm14, %v2590_v13, %v2622_v5  ;;  %v2446_v5 = vadd.f32 %v6084_v41, %v6076_v63  ;;  %v2634_v51 = vsel %vm2602_vm2, %v2586_v50, %v2618_v52  ;;  %v6688_v13 = vld [vmem:[#allocation27_spill] sm:$0xff]  ;;  %v2644_v50 = vld [vmem:[%s6414_s10 + $0x18] sm:$0xff] }
 0x3d5   : > { %v2633_v63 = vsel %vm2601_vm12, %v2585_v38, %v2617_v55  ;;  %v2615_v41 = vmul.f32 0.01, %v2583_v60  ;;  %v2632_v12 = vsel %vm2600_vm1, %v2584_v61, %v2616_v14  ;;  %vm2595_vm6 = vcmp.gt.f32.partialorder %v2579_v15, 0.0  ;;  %v2648_v38 = vld [vmem:[%s6414_s10 + $0x38] sm:$0xff]  ;;  %v2654_v61 = vld [vmem:[%s6414_s10 + $0x68] sm:$0xff] }
 0x3d6   : > { %v2624_v33 = vmul.f32 0.01, %v2592_v53  ;;  %vm2608_vm5 = vcmp.gt.f32.partialorder %v2592_v53, 0.0  ;;  %v2581_v10 = vadd.f32 %v6687_v24, %v2446_v5  ;;  %v2656_v52 = vld [vmem:[%s6414_s10 + $0x78] sm:$0xff] }
 0x3d7   : > { %v2631_v43 = vsel %vm2599_vm4, %v2583_v60, %v2615_v41 }
 0x3d8   : > { %v2640_v9 = vsel %vm2608_vm5, %v2592_v53, %v2624_v33  ;;  %v2637_v33 = vsel %vm2605_vm3, %v2589_v30, %v2621_v23  ;;  %v2515_v30 = vpop.permute.xlu2 %2514  ;;  %v2613_v27 = vmul.f32 0.01, %v2581_v10  ;;  %vm2597_vm9 = vcmp.gt.f32.partialorder %v2581_v10, 0.0  ;;  %v2642_v23 = vld [vmem:[%s6414_s10 + $0x8] sm:$0xff] }
 0x3d9   : > { %2753 = vmatpush.msra.mxu2 %v2640_v9  ;;  %v2580_v46 = vadd.f32 %v2515_v30, %v2443_v40  ;;  %v2578_v53 = vadd.f32 %v6688_v13, %v2437_v16  ;;  %v2611_v9 = vmul.f32 0.01, %v2579_v15 }
 0x3da   : > { %v2629_v2 = vsel %vm2597_vm9, %v2581_v10, %v2613_v27 }
 0x3db   : > { %2754 = vmatpush.msra.mxu2 %v2639_v44  ;;  %v2612_v22 = vmul.f32 0.01, %v2580_v46  ;;  %vm2596_vm8 = vcmp.gt.f32.partialorder %v2580_v46, 0.0  ;;  %v2610_v7 = vmul.f32 0.01, %v2578_v53  ;;  %vm2594_vm10 = vcmp.gt.f32.partialorder %v2578_v53, 0.0 }
 0x3dc   : > { %v2627_v11 = vsel %vm2595_vm6, %v2579_v15, %v2611_v9  ;;  %v6689_v15 = vld [vmem:[#allocation28_spill] sm:$0xff] }
 0x3dd   : > { %2755 = vmatpush.msra.mxu2 %v2638_v29  ;;  %v2628_v4 = vsel %vm2596_vm8, %v2580_v46, %v2612_v22  ;;  %v2626_v57 = vsel %vm2594_vm10, %v2578_v53, %v2610_v7  ;;  %v2645_v29 = vld [vmem:[%s6414_s10 + $0x20] sm:$0xff] }
 0x3df   : > { %2756 = vmatpush.msra.mxu2 %v2637_v33  ;;  %v2649_v33 = vld [vmem:[%s6414_s10 + $0x40] sm:$0xff] }
 0x3e0   : > { %v2500_v34 = vpop.permute.xlu2 %2499 }
 0x3e1   : > { %2757 = vmatpush.msra.mxu2 %v2636_v59  ;;  %v2577_v0 = vadd.f32 %v2500_v34, %v2434_v36  ;;  %v2655_v59 = vld [vmem:[%s6414_s10 + $0x70] sm:$0xff] }
 0x3e3   : > { %2758 = vmatpush.msra.mxu2 %v2635_v1  ;;  %v2609_v54 = vmul.f32 0.01, %v2577_v0  ;;  %vm2593_vm15 = vcmp.gt.f32.partialorder %v2577_v0, 0.0 }
 0x3e5   : > { %2759 = vmatpush.msra.mxu2 %v2634_v51  ;;  %v2625_v44 = vsel %vm2593_vm15, %v2577_v0, %v2609_v54  ;;  %v6690_v0 = vld [vmem:[#allocation29_spill] sm:$0xff] }
 0x3e7   : > { %2760 = vmatpush.msra.mxu2 %v2633_v63  ;;  %v2751_v63 = vpop.permute.xlu0 %2750 }
 0x3e8   : > { %v2741_v16 = vpop.permute.xlu2 %2740 }
 0x3e9   : > { %2761 = vmatpush.msra.mxu2 %v2632_v12 }
 0x3eb   : > { %2762 = vmatpush.msra.mxu2 %v2631_v43 }
 0x3ed   : > { %2763 = vmatpush.msra.mxu2 %v2630_v6 }
 0x3ef   : > { %2764 = vmatpush.msra.mxu2 %v2629_v2  ;;  %v2736_v46 = vpop.permute.xlu0 %2735 }
 0x3f0   : > { %v2726_v3 = vpop.permute.xlu2 %2725 }
 0x3f1   : > { %2765 = vmatpush.msra.mxu2 %v2628_v4 }
 0x3f3   : > { %2766 = vmatpush.msra.mxu2 %v2627_v11 }
 0x3f5   : > { %2767 = vmatpush.msra.mxu2 %v2626_v57 }
 0x3f7   : > { %2768 = vmatpush.msra.mxu2 %v2625_v44  ;;  %v2721_v36 = vpop.permute.xlu0 %2720 }
 0x3f8   : > { %2769 = vmatmul.f32.vlgmr.msra.gmra.mxu2 %v2641_v39  ;;  %v2711_v34 = vpop.permute.xlu2 %2710 }
 0x3ff   : > { %v2706_v7 = vpop.permute.xlu0 %2705 }
 0x400   : > { %2772 = vmatmul.f32.gmra.mxu2 %v2642_v23 }
 0x408   : > { %2775 = vmatmul.f32.gmra.mxu2 %v2643_v8 }
 0x410   : > { %2778 = vmatmul.f32.gmra.mxu2 %v2644_v50 }
 0x418   : > { %2781 = vmatmul.f32.gmra.mxu2 %v2645_v29 }
 0x420   : > { %2784 = vmatmul.f32.gmra.mxu2 %v2646_v62  ;;  %v6691_v62 = vld [vmem:[#allocation31_spill] sm:$0xff] }
 0x428   : > { %2787 = vmatmul.f32.gmra.mxu2 %v2647_v42 }
 0x430   : > { %2790 = vmatmul.f32.gmra.mxu2 %v2648_v38 }
 0x438   : > { %2793 = vmatmul.f32.gmra.mxu2 %v2649_v33 }
 0x440   : > { %2796 = vmatmul.f32.gmra.mxu2 %v2650_v35 }
 0x448   : > { %2799 = vmatmul.f32.gmra.mxu2 %v2651_v19 }
 0x450   : > { %2802 = vmatmul.f32.gmra.mxu2 %v2652_v56 }
 0x458   : > { %2805 = vmatmul.f32.gmra.mxu2 %v2653_v28  ;;  %v2696_v28 = vpop.permute.xlu2 %2695 }
 0x460   : > { %2808 = vmatmul.f32.gmra.mxu2 %v2654_v61 }
 0x468   : > { %2811 = vmatmul.f32.gmra.mxu2 %v2655_v59 }
 0x470   : > { %2814 = vmatmul.f32.gmra.mxu2 %v2656_v52 }
 0x47b   : > { %v6153_v5 = vpop.f32.mrf.mxu2 }
 0x483   : > { %v6155_v60 = vpop.f32.mrf.mxu2 }
 0x48b   : > { %v6157_v1 = vpop.f32.mrf.mxu2 }
 0x493   : > { %v6159_v55 = vpop.f32.mrf.mxu2 }
 0x49b   : > { %v6161_v30 = vpop.f32.mrf.mxu2 }
 0x4a3   : > { %v2785_v40 = vpop.f32.mrf.mxu2 }
 0x4ab   : > { %v2788_v58 = vpop.f32.mrf.mxu2 }
 0x4ac   : > { %v2789_v61 = vadd.f32 %v2788_v58, %v2706_v7  ;;  %v2783_v58 = vadd.f32 %v6161_v30, %v2696_v28  ;;  %v2892_v28 = vld [vmem:[%s6416_s12 + $0x50] sm:$0xff] }
 0x4ae   : > { %vm2824_vm4 = vcmp.gt.f32.partialorder %v2789_v61, 0.0  ;;  %vm2822_vm9 = vcmp.gt.f32.partialorder %v2783_v58, 0.0 }
 0x4b3   : > { %v2791_v51 = vpop.f32.mrf.mxu2 }
 0x4bb   : > { %v2794_v14 = vpop.f32.mrf.mxu2 }
 0x4bc   : > { %v2795_v42 = vadd.f32 %v2794_v14, %v6691_v62  ;;  %v2691_v14 = vpop.permute.xlu0 %2690  ;;  %v2885_v62 = vld [vmem:[%s6416_s12 + $0x18] sm:$0xff] }
 0x4be   : > { %v2842_v59 = vmul.f32 0.01, %v2795_v42  ;;  %vm2826_vm12 = vcmp.gt.f32.partialorder %v2795_v42, 0.0 }
 0x4c3   : > { %v2797_v32 = vpop.f32.mrf.mxu2 }
 0x4c4   : > { %v2798_v23 = vadd.f32 %v2797_v32, %v2721_v36  ;;  %v2681_v36 = vpop.permute.xlu2 %2680 }
 0x4c6   : > { %v2843_v19 = vmul.f32 0.01, %v2798_v23  ;;  %vm2827_vm2 = vcmp.gt.f32.partialorder %v2798_v23, 0.0 }
 0x4cb   : > { %v2800_v24 = vpop.f32.mrf.mxu2 }
 0x4cc   : > { %v2801_v11 = vadd.f32 %v2800_v24, %v2726_v3  ;;  %v2838_v3 = vmul.f32 0.01, %v2783_v58 }
 0x4ce   : > { %v2844_v38 = vmul.f32 0.01, %v2801_v11  ;;  %vm2828_vm0 = vcmp.gt.f32.partialorder %v2801_v11, 0.0 }
 0x4d0   : > { %v2860_v52 = vsel %vm2828_vm0, %v2801_v11, %v2844_v38  ;;  %v6697_v11 = vld [vmem:[#allocation17_spill] sm:$0xff]  ;;  %v2887_v38 = vld [vmem:[%s6416_s12 + $0x28] sm:$0xff] }
 0x4d3   : > { %v2803_v10 = vpop.f32.mrf.mxu2 }
 0x4d4   : > { %v2804_v2 = vadd.f32 %v2803_v10, %v6690_v0  ;;  %v2859_v10 = vsel %vm2827_vm2, %v2798_v23, %v2843_v19  ;;  %v2882_v23 = vld [vmem:[%s6416_s12] sm:$0xff] }
 0x4d5   : > { %v2890_v19 = vld [vmem:[%s6416_s12 + $0x40] sm:$0xff] }
 0x4d6   : > { %v2845_v8 = vmul.f32 0.01, %v2804_v2  ;;  %vm2829_vm7 = vcmp.gt.f32.partialorder %v2804_v2, 0.0 }
 0x4d8   : > { %v2861_v56 = vsel %vm2829_vm7, %v2804_v2, %v2845_v8  ;;  %v2883_v8 = vld [vmem:[%s6416_s12 + $0x8] sm:$0xff] }
 0x4db   : > { %v2806_v41 = vpop.f32.mrf.mxu2 }
 0x4dc   : > { %v2807_v53 = vadd.f32 %v2806_v41, %v2736_v46  ;;  %v2858_v41 = vsel %vm2826_vm12, %v2795_v42, %v2842_v59  ;;  %v2886_v42 = vld [vmem:[%s6416_s12 + $0x20] sm:$0xff] }
 0x4dd   : > { %v2894_v59 = vld [vmem:[%s6416_s12 + $0x60] sm:$0xff] }
 0x4de   : > { %v2846_v54 = vmul.f32 0.01, %v2807_v53  ;;  %vm2830_vm3 = vcmp.gt.f32.partialorder %v2807_v53, 0.0 }
 0x4e0   : > { %v2862_v33 = vsel %vm2830_vm3, %v2807_v53, %v2846_v54  ;;  %v2854_v53 = vsel %vm2822_vm9, %v2783_v58, %v2838_v3 }
 0x4e3   : > { %v2809_v12 = vpop.f32.mrf.mxu2 }
 0x4e4   : > { %v2810_v27 = vadd.f32 %v2809_v12, %v2741_v16  ;;  %v6693_v12 = vld [vmem:[#allocation33_spill] sm:$0xff] }
 0x4e5   : > { %v2777_v30 = vadd.f32 %v6157_v1, %v6693_v12 }
 0x4e6   : > { %v2847_v9 = vmul.f32 0.01, %v2810_v27  ;;  %vm2831_vm14 = vcmp.gt.f32.partialorder %v2810_v27, 0.0 }
 0x4e7   : > { %vm2820_vm6 = vcmp.gt.f32.partialorder %v2777_v30, 0.0 }
 0x4e8   : > { %v2863_v50 = vsel %vm2831_vm14, %v2810_v27, %v2847_v9  ;;  %v2676_v27 = vpop.permute.xlu0 %2675 }
 0x4e9   : > { %v6175_v35 = vadd.f32 %v2863_v50, %v5815_v49  ;;  %v6183_v49 = vadd.f32 %v2861_v56, %v5855_v47  ;;  %v6193_v47 = vadd.f32 %v2859_v10, %v5875_v20  ;;  %v2771_v1 = vadd.f32 %v6153_v5, %v2676_v27  ;;  %v6695_v5 = vld [vmem:[#allocation26_spill] sm:$0xff]  ;;  %v2884_v50 = vld [vmem:[%s6416_s12 + $0x10] sm:$0xff] }
 0x4ea   : > { %v2891_v56 = vld [vmem:[%s6416_s12 + $0x48] sm:$0xff] }
 0x4eb   : > { %v2812_v18 = vpop.f32.mrf.mxu2  ;;  %vm2818_vm15 = vcmp.gt.f32.partialorder %v2771_v1, 0.0 }
 0x4ec   : > { %v2813_v43 = vadd.f32 %v2812_v18, %v6689_v15 }
 0x4ee   : > { %v2848_v6 = vmul.f32 0.01, %v2813_v43  ;;  %vm2832_vm5 = vcmp.gt.f32.partialorder %v2813_v43, 0.0 }
 0x4f0   : > { %v2864_v39 = vsel %vm2832_vm5, %v2813_v43, %v2848_v6 }
 0x4f1   : > { %v6170_v29 = vadd.f32 %v2864_v39, %v5792_v31  ;;  %v6179_v31 = vadd.f32 %v2862_v33, %v5832_v37  ;;  %v6188_v37 = vadd.f32 %v2860_v52, %v5864_v26  ;;  %v6198_v26 = vadd.f32 %v2858_v41, %v6669_v17  ;;  %v2888_v33 = vld [vmem:[%s6416_s12 + $0x30] sm:$0xff]  ;;  %v2895_v52 = vld [vmem:[%s6416_s12 + $0x68] sm:$0xff] }
 0x4f3   : > { %v2815_v13 = vpop.f32.mrf.mxu2 }
 0x4f4   : > { %v2816_v22 = vadd.f32 %v2815_v13, %v2751_v63  ;;  %v2840_v63 = vmul.f32 0.01, %v2789_v61  ;;  %v2836_v13 = vmul.f32 0.01, %v2777_v30 }
 0x4f6   : > { %vm2833_vm13 = vcmp.gt.f32.partialorder %v2816_v22, 0.0  ;;  %v2849_v4 = vmul.f32 0.01, %v2816_v22  ;;  %v2856_v18 = vsel %vm2824_vm4, %v2789_v61, %v2840_v63  ;;  %v2852_v0 = vsel %vm2820_vm6, %v2777_v30, %v2836_v13  ;;  %v2893_v61 = vld [vmem:[%s6416_s12 + $0x58] sm:$0xff] }
 0x4f7   : > { %v6209_v17 = vadd.f32 %v2856_v18, %v6674_v21  ;;  %v2834_v21 = vmul.f32 0.01, %v2771_v1 }
 0x4f8   : > { %v2865_v57 = vsel %vm2833_vm13, %v2816_v22, %v2849_v4  ;;  %v6694_v22 = vld [vmem:[#allocation44_spill] sm:$0xff] }
 0x4f9   : > { %v6166_v44 = vadd.f32 %v2865_v57, %v5759_v45  ;;  %v2792_v45 = vadd.f32 %v2791_v51, %v2711_v34  ;;  %v6692_v51 = vld [vmem:[#allocation32_spill] sm:$0xff]  ;;  %v6218_v34 = vadd.f32 %v2854_v53, %v6694_v22  ;;  %v2850_v7 = vsel %vm2818_vm15, %v2771_v1, %v2834_v21  ;;  %v6698_v57 = vld [vmem:[#allocation47_spill] sm:$0xff] }
 0x4fa   : > { %v2786_v32 = vadd.f32 %v2785_v40, %v6692_v51  ;;  %v2780_v40 = vadd.f32 %v6159_v55, %v2691_v14  ;;  %v2774_v55 = vadd.f32 %v6155_v60, %v2681_v36  ;;  %v6234_v39 = vadd.f32 %v2850_v7, %v6698_v57  ;;  %v2896_v14 = vld [vmem:[%s6416_s12 + $0x70] sm:$0xff]  ;;  %v2897_v51 = vld [vmem:[%s6416_s12 + $0x78] sm:$0xff]  ;;  %v2987_v36 = vpop.permute.xlu2 %2986 }
 0x4fb   : > { %2994 = vmatpush.msra.mxu0 %v6166_v44  ;;  %v2841_v24 = vmul.f32 0.01, %v2792_v45  ;;  %vm2825_vm1 = vcmp.gt.f32.partialorder %v2792_v45, 0.0 }
 0x4fc   : > { %v2839_v16 = vmul.f32 0.01, %v2786_v32  ;;  %vm2823_vm11 = vcmp.gt.f32.partialorder %v2786_v32, 0.0  ;;  %v2837_v15 = vmul.f32 0.01, %v2780_v40  ;;  %vm2821_vm8 = vcmp.gt.f32.partialorder %v2780_v40, 0.0 }
 0x4fd   : > { %2995 = vmatpush.msra.mxu0 %v6170_v29  ;;  %v2857_v46 = vsel %vm2825_vm1, %v2792_v45, %v2841_v24  ;;  %v2835_v60 = vmul.f32 0.01, %v2774_v55  ;;  %vm2819_vm10 = vcmp.gt.f32.partialorder %v2774_v55, 0.0  ;;  %v2889_v45 = vld [vmem:[%s6416_s12 + $0x38] sm:$0xff] }
 0x4fe   : > { %v6204_v20 = vadd.f32 %v2857_v46, %v5904_v25  ;;  %v2855_v43 = vsel %vm2823_vm11, %v2786_v32, %v2839_v16  ;;  %v2853_v6 = vsel %vm2821_vm8, %v2780_v40, %v2837_v15 }
 0x4ff   : > { %2996 = vmatpush.msra.mxu0 %v6175_v35  ;;  %v6214_v25 = vadd.f32 %v2855_v43, %v6678_v48  ;;  %v6222_v2 = vadd.f32 %v2853_v6, %v6695_v5  ;;  %v2851_v9 = vsel %vm2819_vm10, %v2774_v55, %v2835_v60  ;;  %v6696_v48 = vld [vmem:[#allocation54_spill] sm:$0xff]  ;;  %v2982_v55 = vpop.permute.xlu0 %2981 }
 0x500   : > { %v6226_v4 = vadd.f32 %v2852_v0, %v6696_v48  ;;  %v6230_v54 = vadd.f32 %v2851_v9, %v6697_v11  ;;  %v6699_v6 = vld [vmem:[#allocation34_spill] sm:$0xff]  ;;  %v6700_v0 = vld [vmem:[#allocation35_spill] sm:$0xff] }
 0x501   : > { %2997 = vmatpush.msra.mxu0 %v6179_v31 }
 0x502   : > { %v2972_v43 = vpop.permute.xlu2 %2971 }
 0x503   : > { %2998 = vmatpush.msra.mxu0 %v6183_v49 }
 0x505   : > { %2999 = vmatpush.msra.mxu0 %v6188_v37 }
 0x507   : > { %3000 = vmatpush.msra.mxu0 %v6193_v47  ;;  %v2967_v1 = vpop.permute.xlu0 %2966 }
 0x509   : > { %3001 = vmatpush.msra.mxu0 %v6198_v26 }
 0x50a   : > { %v2957_v21 = vpop.permute.xlu2 %2956 }
 0x50b   : > { %3002 = vmatpush.msra.mxu0 %v6204_v20 }
 0x50d   : > { %3003 = vmatpush.msra.mxu0 %v6209_v17 }
 0x50f   : > { %3004 = vmatpush.msra.mxu0 %v6214_v25  ;;  %v2952_v7 = vpop.permute.xlu0 %2951 }
 0x511   : > { %3005 = vmatpush.msra.mxu0 %v6218_v34 }
 0x513   : > { %3006 = vmatpush.msra.mxu0 %v6222_v2 }
 0x515   : > { %3007 = vmatpush.msra.mxu0 %v6226_v4 }
 0x517   : > { %3008 = vmatpush.msra.mxu0 %v6230_v54 }
 0x519   : > { %3009 = vmatpush.msra.mxu0 %v6234_v39 }
 0x51a   : > { %3010 = vmatmul.f32.vlgmr.msra.gmra.mxu0 %v2882_v23 }
 0x522   : > { %3013 = vmatmul.f32.gmra.mxu0 %v2883_v8 }
 0x52a   : > { %3016 = vmatmul.f32.gmra.mxu0 %v2884_v50 }
 0x532   : > { %3019 = vmatmul.f32.gmra.mxu0 %v2885_v62 }
 0x53a   : > { %3022 = vmatmul.f32.gmra.mxu0 %v2886_v42  ;;  %v6701_v42 = vld [vmem:[#allocation36_spill] sm:$0xff] }
 0x542   : > { %3025 = vmatmul.f32.gmra.mxu0 %v2887_v38 }
 0x54a   : > { %3028 = vmatmul.f32.gmra.mxu0 %v2888_v33 }
 0x552   : > { %3031 = vmatmul.f32.gmra.mxu0 %v2889_v45 }
 0x55a   : > { %3034 = vmatmul.f32.gmra.mxu0 %v2890_v19 }
 0x562   : > { %3037 = vmatmul.f32.gmra.mxu0 %v2891_v56 }
 0x56a   : > { %3040 = vmatmul.f32.gmra.mxu0 %v2892_v28 }
 0x572   : > { %3043 = vmatmul.f32.gmra.mxu0 %v2893_v61  ;;  %v2942_v61 = vpop.permute.xlu2 %2941 }
 0x57a   : > { %3046 = vmatmul.f32.gmra.mxu0 %v2894_v59 }
 0x582   : > { %3049 = vmatmul.f32.gmra.mxu0 %v2895_v52 }
 0x58a   : > { %3052 = vmatmul.f32.gmra.mxu0 %v2896_v14 }
 0x592   : > { %3055 = vmatmul.f32.gmra.mxu0 %v2897_v51  ;;  %v2937_v51 = vpop.permute.xlu0 %2936 }
 0x597   : > { %v6285_v32 = vpop.f32.mrf.mxu0 }
 0x59f   : > { %v6287_v24 = vpop.f32.mrf.mxu0 }
 0x5a7   : > { %v6289_v10 = vpop.f32.mrf.mxu0 }
 0x5af   : > { %v6291_v58 = vpop.f32.mrf.mxu0 }
 0x5b7   : > { %v6293_v63 = vpop.f32.mrf.mxu0 }
 0x5bf   : > { %v3026_v41 = vpop.f32.mrf.mxu0 }
 0x5c7   : > { %v3029_v40 = vpop.f32.mrf.mxu0 }
 0x5cf   : > { %v3032_v16 = vpop.f32.mrf.mxu0 }
 0x5d0   : > { %v3033_v59 = vadd.f32 %v3032_v16, %v2952_v7 }
 0x5d2   : > { %vm3066_vm1 = vcmp.gt.f32.partialorder %v3033_v59, 0.0 }
 0x5d7   : > { %v3035_v46 = vpop.f32.mrf.mxu0 }
 0x5d8   : > { %v3036_v19 = vadd.f32 %v3035_v46, %v2957_v21 }
 0x5da   : > { %vm3067_vm12 = vcmp.gt.f32.partialorder %v3036_v19, 0.0 }
 0x5df   : > { %v3038_v12 = vpop.f32.mrf.mxu0 }
 0x5e0   : > { %v3039_v38 = vadd.f32 %v3038_v12, %v6701_v42  ;;  %v3111_v42 = vld [vmem:[%s6418_s14 + $0x20] sm:$0xff] }
 0x5e2   : > { %v3084_v52 = vmul.f32 0.01, %v3039_v38  ;;  %vm3068_vm2 = vcmp.gt.f32.partialorder %v3039_v38, 0.0 }
 0x5e4   : > { %v3100_v46 = vsel %vm3068_vm2, %v3039_v38, %v3084_v52  ;;  %v3112_v38 = vld [vmem:[%s6418_s14 + $0x28] sm:$0xff] }
 0x5e5   : > { %v3120_v52 = vld [vmem:[%s6418_s14 + $0x68] sm:$0xff] }
 0x5e7   : > { %v3041_v30 = vpop.f32.mrf.mxu0 }
 0x5e8   : > { %v3042_v8 = vadd.f32 %v3041_v30, %v2967_v1  ;;  %v6702_v30 = vld [vmem:[#allocation38_spill] sm:$0xff] }
 0x5ea   : > { %v3085_v56 = vmul.f32 0.01, %v3042_v8  ;;  %vm3069_vm0 = vcmp.gt.f32.partialorder %v3042_v8, 0.0 }
 0x5ec   : > { %v3101_v12 = vsel %vm3069_vm0, %v3042_v8, %v3085_v56  ;;  %v3116_v56 = vld [vmem:[%s6418_s14 + $0x48] sm:$0xff] }
 0x5ef   : > { %v3044_v3 = vpop.f32.mrf.mxu0 }
 0x5f0   : > { %v3045_v11 = vadd.f32 %v3044_v3, %v2972_v43  ;;  %v3030_v3 = vadd.f32 %v3029_v40, %v6702_v30 }
 0x5f2   : > { %v3086_v33 = vmul.f32 0.01, %v3045_v11  ;;  %vm3070_vm7 = vcmp.gt.f32.partialorder %v3045_v11, 0.0  ;;  %v3081_v43 = vmul.f32 0.01, %v3030_v3  ;;  %vm3065_vm4 = vcmp.gt.f32.partialorder %v3030_v3, 0.0 }
 0x5f4   : > { %v3102_v14 = vsel %vm3070_vm7, %v3045_v11, %v3086_v33  ;;  %v3113_v33 = vld [vmem:[%s6418_s14 + $0x30] sm:$0xff] }
 0x5f7   : > { %v3047_v18 = vpop.f32.mrf.mxu0 }
 0x5f8   : > { %v3048_v5 = vadd.f32 %v3047_v18, %v6700_v0  ;;  %v3083_v18 = vmul.f32 0.01, %v3036_v19 }
 0x5fa   : > { %v3087_v50 = vmul.f32 0.01, %v3048_v5  ;;  %vm3071_vm3 = vcmp.gt.f32.partialorder %v3048_v5, 0.0  ;;  %v3099_v16 = vsel %vm3067_vm12, %v3036_v19, %v3083_v18  ;;  %v3115_v19 = vld [vmem:[%s6418_s14 + $0x40] sm:$0xff] }
 0x5fc   : > { %v3103_v28 = vsel %vm3071_vm3, %v3048_v5, %v3087_v50  ;;  %v6704_v5 = vld [vmem:[#allocation43_spill] sm:$0xff] }
 0x5fd   : > { %v3109_v50 = vld [vmem:[%s6418_s14 + $0x10] sm:$0xff] }
 0x5ff   : > { %v3050_v15 = vpop.f32.mrf.mxu0 }
 0x600   : > { %v3051_v60 = vadd.f32 %v3050_v15, %v2982_v55  ;;  %v3082_v55 = vmul.f32 0.01, %v3033_v59  ;;  %v3024_v15 = vadd.f32 %v6293_v63, %v2937_v51  ;;  %v3122_v51 = vld [vmem:[%s6418_s14 + $0x78] sm:$0xff] }
 0x602   : > { %v3088_v57 = vmul.f32 0.01, %v3051_v60  ;;  %vm3072_vm14 = vcmp.gt.f32.partialorder %v3051_v60, 0.0  ;;  %v3098_v40 = vsel %vm3066_vm1, %v3033_v59, %v3082_v55  ;;  %vm3063_vm9 = vcmp.gt.f32.partialorder %v3024_v15, 0.0  ;;  %v3119_v59 = vld [vmem:[%s6418_s14 + $0x60] sm:$0xff] }
 0x604   : > { %v3104_v45 = vsel %vm3072_vm14, %v3051_v60, %v3088_v57  ;;  %v3079_v60 = vmul.f32 0.01, %v3024_v15 }
 0x607   : > { %v3053_v27 = vpop.f32.mrf.mxu0 }
 0x608   : > { %v3054_v13 = vadd.f32 %v3053_v27, %v2987_v36  ;;  %v3027_v36 = vadd.f32 %v3026_v41, %v2942_v61  ;;  %v6703_v27 = vld [vmem:[#allocation41_spill] sm:$0xff] }
 0x609   : > { %v3021_v1 = vadd.f32 %v6291_v58, %v6703_v27  ;;  %v3012_v58 = vadd.f32 %v6285_v32, %v6704_v5  ;;  %v3108_v32 = vld [vmem:[%s6418_s14 + $0x8] sm:$0xff]  ;;  %v3118_v61 = vld [vmem:[%s6418_s14 + $0x58] sm:$0xff] }
 0x60a   : > { %v3089_v9 = vmul.f32 0.01, %v3054_v13  ;;  %vm3073_vm13 = vcmp.gt.f32.partialorder %v3054_v13, 0.0  ;;  %vm3064_vm11 = vcmp.gt.f32.partialorder %v3027_v36, 0.0 }
 0x60b   : > { %v3078_v21 = vmul.f32 0.01, %v3021_v1  ;;  %vm3062_vm8 = vcmp.gt.f32.partialorder %v3021_v1, 0.0  ;;  %v3075_v11 = vmul.f32 0.01, %v3012_v58  ;;  %vm3059_vm15 = vcmp.gt.f32.partialorder %v3012_v58, 0.0 }
 0x60c   : > { %v3105_v62 = vsel %vm3073_vm13, %v3054_v13, %v3089_v9  ;;  %v3080_v13 = vmul.f32 0.01, %v3027_v36 }
 0x60d   : > { %v3091_v8 = vsel %vm3059_vm15, %v3012_v58, %v3075_v11 }
 0x60e   : > { %v3096_v0 = vsel %vm3064_vm11, %v3027_v36, %v3080_v13 }
 0x60f   : > { %v3056_v53 = vpop.f32.mrf.mxu0 }
 0x610   : > { %v3057_v22 = vadd.f32 %v3056_v53, %v6699_v6  ;;  %v2927_v53 = vpop.permute.xlu2 %2926  ;;  %v3097_v6 = vsel %vm3065_vm4, %v3030_v3, %v3081_v43 }
 0x611   : > { %v3018_v41 = vadd.f32 %v6289_v10, %v2927_v53  ;;  %v3094_v10 = vsel %vm3062_vm8, %v3021_v1, %v3078_v21 }
 0x612   : > { %vm3074_vm5 = vcmp.gt.f32.partialorder %v3057_v22, 0.0  ;;  %v3090_v48 = vmul.f32 0.01, %v3057_v22 }
 0x613   : > { %v3077_v9 = vmul.f32 0.01, %v3018_v41  ;;  %vm3061_vm6 = vcmp.gt.f32.partialorder %v3018_v41, 0.0 }
 0x614   : > { %v3106_v23 = vsel %vm3074_vm5, %v3057_v22, %v3090_v48  ;;  %v2922_v22 = vpop.permute.xlu0 %2921  ;;  %v3095_v48 = vsel %vm3063_vm9, %v3024_v15, %v3079_v60 }
 0x615   : > { %3219 = vmatpush.msra.mxu3 %v3106_v23  ;;  %v3015_v63 = vadd.f32 %v6287_v24, %v2922_v22  ;;  %v3093_v57 = vsel %vm3061_vm6, %v3018_v41, %v3077_v9  ;;  %v3107_v23 = vld [vmem:[%s6418_s14] sm:$0xff] }
 0x617   : > { %3220 = vmatpush.msra.mxu3 %v3105_v62  ;;  %v3076_v7 = vmul.f32 0.01, %v3015_v63  ;;  %vm3060_vm10 = vcmp.gt.f32.partialorder %v3015_v63, 0.0  ;;  %v3110_v62 = vld [vmem:[%s6418_s14 + $0x18] sm:$0xff] }
 0x618   : > { %v3217_v13 = vpop.permute.xlu2 %3216 }
 0x619   : > { %3221 = vmatpush.msra.mxu3 %v3104_v45  ;;  %v3092_v24 = vsel %vm3060_vm10, %v3015_v63, %v3076_v7  ;;  %v3114_v45 = vld [vmem:[%s6418_s14 + $0x38] sm:$0xff] }
 0x61b   : > { %3222 = vmatpush.msra.mxu3 %v3103_v28  ;;  %v3117_v28 = vld [vmem:[%s6418_s14 + $0x50] sm:$0xff] }
 0x61c   : > { %v3212_v53 = vpop.permute.xlu0 %3211 }
 0x61d   : > { %3223 = vmatpush.msra.mxu3 %v3102_v14  ;;  %v3121_v14 = vld [vmem:[%s6418_s14 + $0x70] sm:$0xff] }
 0x61f   : > { %3224 = vmatpush.msra.mxu3 %v3101_v12 }
 0x620   : > { %v3202_v41 = vpop.permute.xlu2 %3201 }
 0x621   : > { %3225 = vmatpush.msra.mxu3 %v3100_v46 }
 0x623   : > { %3226 = vmatpush.msra.mxu3 %v3099_v16 }
 0x625   : > { %3227 = vmatpush.msra.mxu3 %v3098_v40 }
 0x627   : > { %3228 = vmatpush.msra.mxu3 %v3097_v6  ;;  %v3197_v6 = vpop.permute.xlu0 %3196 }
 0x628   : > { %v3187_v63 = vpop.permute.xlu2 %3186 }
 0x629   : > { %3229 = vmatpush.msra.mxu3 %v3096_v0  ;;  %v6705_v0 = vld [vmem:[#allocation45_spill] sm:$0xff] }
 0x62b   : > { %3230 = vmatpush.msra.mxu3 %v3095_v48 }
 0x62d   : > { %3231 = vmatpush.msra.mxu3 %v3094_v10 }
 0x62f   : > { %3232 = vmatpush.msra.mxu3 %v3093_v57  ;;  %v3182_v58 = vpop.permute.xlu0 %3181 }
 0x631   : > { %3233 = vmatpush.msra.mxu3 %v3092_v24 }
 0x633   : > { %3234 = vmatpush.msra.mxu3 %v3091_v8  ;;  %v6706_v8 = vld [vmem:[#allocation48_spill] sm:$0xff] }
 0x634   : > { %3235 = vmatmul.f32.vlgmr.msra.gmra.mxu3 %v3107_v23  ;;  %v3172_v23 = vpop.permute.xlu2 %3171 }
 0x63c   : > { %3238 = vmatmul.f32.gmra.mxu3 %v3108_v32 }
 0x644   : > { %3241 = vmatmul.f32.gmra.mxu3 %v3109_v50 }
 0x64c   : > { %3244 = vmatmul.f32.gmra.mxu3 %v3110_v62 }
 0x654   : > { %3247 = vmatmul.f32.gmra.mxu3 %v3111_v42 }
 0x65c   : > { %3250 = vmatmul.f32.gmra.mxu3 %v3112_v38 }
 0x664   : > { %3253 = vmatmul.f32.gmra.mxu3 %v3113_v33 }
 0x66c   : > { %3256 = vmatmul.f32.gmra.mxu3 %v3114_v45 }
 0x674   : > { %3259 = vmatmul.f32.gmra.mxu3 %v3115_v19 }
 0x67c   : > { %3262 = vmatmul.f32.gmra.mxu3 %v3116_v56 }
 0x684   : > { %3265 = vmatmul.f32.gmra.mxu3 %v3117_v28 }
 0x68c   : > { %3268 = vmatmul.f32.gmra.mxu3 %v3118_v61 }
 0x694   : > { %3271 = vmatmul.f32.gmra.mxu3 %v3119_v59 }
 0x69c   : > { %3274 = vmatmul.f32.gmra.mxu3 %v3120_v52  ;;  %v3167_v52 = vpop.permute.xlu0 %3166 }
 0x6a4   : > { %3277 = vmatmul.f32.gmra.mxu3 %v3121_v14 }
 0x6ac   : > { %3280 = vmatmul.f32.gmra.mxu3 %v3122_v51  ;;  %v6707_v51 = vld [vmem:[#allocation51_spill] sm:$0xff] }
 0x6b7   : > { %v6354_v30 = vpop.f32.mrf.mxu3 }
 0x6bf   : > { %v6356_v3 = vpop.f32.mrf.mxu3 }
 0x6c7   : > { %v6358_v18 = vpop.f32.mrf.mxu3 }
 0x6cf   : > { %v6360_v12 = vpop.f32.mrf.mxu3 }
 0x6d7   : > { %v6362_v36 = vpop.f32.mrf.mxu3 }
 0x6df   : > { %v3251_v55 = vpop.f32.mrf.mxu3 }
 0x6e7   : > { %v3254_v46 = vpop.f32.mrf.mxu3 }
 0x6ef   : > { %v3257_v15 = vpop.f32.mrf.mxu3 }
 0x6f7   : > { %v3260_v43 = vpop.f32.mrf.mxu3 }
 0x6f8   : > { %v3261_v28 = vadd.f32 %v3260_v43, %v3182_v58 }
 0x6fa   : > { %vm3292_vm12 = vcmp.gt.f32.partialorder %v3261_v28, 0.0 }
 0x6ff   : > { %v3263_v16 = vpop.f32.mrf.mxu3 }
 0x700   : > { %v3264_v33 = vadd.f32 %v3263_v16, %v3187_v63  ;;  %v3255_v16 = vadd.f32 %v3254_v46, %v3172_v23 }
 0x702   : > { %vm3293_vm2 = vcmp.gt.f32.partialorder %v3264_v33, 0.0  ;;  %v3306_v63 = vmul.f32 0.01, %v3255_v16  ;;  %vm3290_vm4 = vcmp.gt.f32.partialorder %v3255_v16, 0.0 }
 0x707   : > { %v3266_v27 = vpop.f32.mrf.mxu3 }
 0x708   : > { %v3267_v32 = vadd.f32 %v3266_v27, %v6706_v8  ;;  %v3258_v27 = vadd.f32 %v3257_v15, %v6707_v51  ;;  %v6708_v15 = vld [vmem:[#allocation55_spill] sm:$0xff] }
 0x70a   : > { %v3310_v61 = vmul.f32 0.01, %v3267_v32  ;;  %vm3294_vm0 = vcmp.gt.f32.partialorder %v3267_v32, 0.0  ;;  %vm3291_vm1 = vcmp.gt.f32.partialorder %v3258_v27, 0.0 }
 0x70f   : > { %v3269_v1 = vpop.f32.mrf.mxu3 }
 0x710   : > { %v3270_v11 = vadd.f32 %v3269_v1, %v3197_v6  ;;  %v3309_v1 = vmul.f32 0.01, %v3264_v33 }
 0x712   : > { %v3311_v45 = vmul.f32 0.01, %v3270_v11  ;;  %vm3295_vm7 = vcmp.gt.f32.partialorder %v3270_v11, 0.0  ;;  %v3325_v6 = vsel %vm3293_vm2, %v3264_v33, %v3309_v1 }
 0x713   : > { %v3341_v46 = vadd.f32 %v3325_v6, %v6193_v47 }
 0x717   : > { %v3272_v40 = vpop.f32.mrf.mxu3 }
 0x718   : > { %v3273_v48 = vadd.f32 %v3272_v40, %v3202_v41  ;;  %v3308_v40 = vmul.f32 0.01, %v3261_v28  ;;  %v3252_v41 = vadd.f32 %v3251_v55, %v3167_v52  ;;  %v3152_v55 = vpop.permute.xlu0 %3151 }
 0x71a   : > { %v3312_v50 = vmul.f32 0.01, %v3273_v48  ;;  %vm3296_vm3 = vcmp.gt.f32.partialorder %v3273_v48, 0.0  ;;  %vm3289_vm11 = vcmp.gt.f32.partialorder %v3252_v41, 0.0 }
 0x71c   : > { %v3328_v59 = vsel %vm3296_vm3, %v3273_v48, %v3312_v50  ;;  %v6709_v48 = vld [vmem:[#allocation58_spill] sm:$0xff] }
 0x71d   : > { %v3240_v47 = vadd.f32 %v6356_v3, %v6709_v48 }
 0x71f   : > { %v3275_v60 = vpop.f32.mrf.mxu3  ;;  %v3301_v23 = vmul.f32 0.01, %v3240_v47  ;;  %vm3285_vm10 = vcmp.gt.f32.partialorder %v3240_v47, 0.0 }
 0x720   : > { %v3276_v5 = vadd.f32 %v3275_v60, %v6705_v0  ;;  %v3307_v60 = vmul.f32 0.01, %v3258_v27  ;;  %v3305_v0 = vmul.f32 0.01, %v3252_v41 }
 0x721   : > { %v3317_v50 = vsel %vm3285_vm10, %v3240_v47, %v3301_v23 }
 0x722   : > { %v3313_v57 = vmul.f32 0.01, %v3276_v5  ;;  %vm3297_vm14 = vcmp.gt.f32.partialorder %v3276_v5, 0.0 }
 0x724   : > { %v3329_v19 = vsel %vm3297_vm14, %v3276_v5, %v3313_v57 }
 0x725   : > { %v3345_v14 = vadd.f32 %v3329_v19, %v6175_v35 }
 0x727   : > { %v3278_v22 = vpop.f32.mrf.mxu3 }
 0x728   : > { %v3279_v21 = vadd.f32 %v3278_v22, %v3212_v53  ;;  %v3326_v53 = vsel %vm3294_vm0, %v3267_v32, %v3310_v61  ;;  %v3249_v22 = vadd.f32 %v6362_v36, %v6708_v15 }
 0x729   : > { %v3342_v35 = vadd.f32 %v3326_v53, %v6188_v37  ;;  %v3243_v37 = vadd.f32 %v6358_v18, %v3152_v55 }
 0x72a   : > { %v3314_v7 = vmul.f32 0.01, %v3279_v21  ;;  %vm3298_vm5 = vcmp.gt.f32.partialorder %v3279_v21, 0.0  ;;  %v3304_v58 = vmul.f32 0.01, %v3249_v22  ;;  %vm3288_vm9 = vcmp.gt.f32.partialorder %v3249_v22, 0.0 }
 0x72b   : > { %v3302_v57 = vmul.f32 0.01, %v3243_v37  ;;  %vm3286_vm6 = vcmp.gt.f32.partialorder %v3243_v37, 0.0 }
 0x72c   : > { %v3330_v42 = vsel %vm3298_vm5, %v3279_v21, %v3314_v7  ;;  %v3320_v18 = vsel %vm3288_vm9, %v3249_v22, %v3304_v58 }
 0x72d   : > { %v3346_v56 = vadd.f32 %v3330_v42, %v6170_v29  ;;  %v3157_v29 = vpop.permute.xlu2 %3156  ;;  %v3336_v3 = vadd.f32 %v3320_v18, %v6218_v34  ;;  %v3318_v32 = vsel %vm3286_vm6, %v3243_v37, %v3302_v57  ;;  %v3348_v34 = vld [vmem:[%s6420_s16] sm:$0x1] }
 0x72e   : > { %v3246_v21 = vadd.f32 %v6360_v12, %v3157_v29  ;;  %v3321_v12 = vsel %vm3289_vm11, %v3252_v41, %v3305_v0 }
 0x72f   : > { %v3281_v9 = vpop.f32.mrf.mxu3 }
 0x730   : > { %v3282_v10 = vadd.f32 %v3281_v9, %v3217_v13  ;;  %v3327_v13 = vsel %vm3295_vm7, %v3270_v11, %v3311_v45  ;;  %v3322_v9 = vsel %vm3290_vm4, %v3255_v16, %v3306_v63  ;;  %v3303_v7 = vmul.f32 0.01, %v3246_v21 }
 0x731   : > { %v3343_v43 = vadd.f32 %v3327_v13, %v6183_v49  ;;  %v3323_v49 = vsel %vm3291_vm1, %v3258_v27, %v3307_v60  ;;  %vm3287_vm8 = vcmp.gt.f32.partialorder %v3246_v21, 0.0  ;;  %v3338_v11 = vadd.f32 %v3322_v9, %v6209_v17 }
 0x732   : > { %vm3299_vm13 = vcmp.gt.f32.partialorder %v3282_v10, 0.0  ;;  %v3315_v24 = vmul.f32 0.01, %v3282_v10  ;;  %v3339_v36 = vadd.f32 %v3323_v49, %v6204_v20  ;;  %v3319_v20 = vsel %vm3287_vm8, %v3246_v21, %v3303_v7 }
 0x733   : > { %v3335_v17 = vadd.f32 %v3319_v20, %v6222_v2 }
 0x734   : > { %v3331_v62 = vsel %vm3299_vm13, %v3282_v10, %v3315_v24  ;;  %v3337_v24 = vadd.f32 %v3321_v12, %v6214_v25  ;;  %v3333_v25 = vadd.f32 %v3317_v50, %v6230_v54 }
 0x735   : > { %v3347_v38 = vadd.f32 %v3331_v62, %v6166_v44  ;;  %v3344_v44 = vadd.f32 %v3328_v59, %v6179_v31  ;;  %v3324_v31 = vsel %vm3292_vm12, %v3261_v28, %v3308_v40  ;;  %v3142_v10 = vpop.permute.xlu2 %3141 }
 0x736   : > { %v3340_v5 = vadd.f32 %v3324_v31, %v6198_v26  ;;  %v3237_v26 = vadd.f32 %v6354_v30, %v3142_v10  ;;  %v3334_v30 = vadd.f32 %v3318_v32, %v6226_v4 }
 0x737   : > { %3356 = vmatpush.msrb.mxu2 %v3347_v38  ;;  %v3353_v38 = vpop.permute.xlu0 %3352 }
 0x738   : > { %v3300_v8 = vmul.f32 0.01, %v3237_v26  ;;  %vm3284_vm15 = vcmp.gt.f32.partialorder %v3237_v26, 0.0  ;;  %v3355_v2 = vperm.slane %v3353_v38, 0 }
 0x739   : > { %3357 = vmatpush.msrb.mxu2 %v3346_v56 }
 0x73a   : > { %v3316_v62 = vsel %vm3284_vm15, %v3237_v26, %v3300_v8 }
 0x73b   : > { %3358 = vmatpush.msrb.mxu2 %v3345_v14  ;;  %v3332_v42 = vadd.f32 %v3316_v62, %v6234_v39 }
 0x73d   : > { %3359 = vmatpush.msrb.mxu2 %v3344_v44 }
 0x73f   : > { %3360 = vmatpush.msrb.mxu2 %v3343_v43 }
 0x741   : > { %3361 = vmatpush.msrb.mxu2 %v3342_v35 }
 0x743   : > { %3362 = vmatpush.msrb.mxu2 %v3341_v46 }
 0x745   : > { %3363 = vmatpush.msrb.mxu2 %v3340_v5 }
 0x747   : > { %3364 = vmatpush.msrb.mxu2 %v3339_v36 }
 0x749   : > { %3365 = vmatpush.msrb.mxu2 %v3338_v11 }
 0x74b   : > { %3366 = vmatpush.msrb.mxu2 %v3337_v24 }
 0x74d   : > { %3367 = vmatpush.msrb.mxu2 %v3336_v3 }
 0x74f   : > { %3368 = vmatpush.msrb.mxu2 %v3335_v17 }
 0x751   : > { %3369 = vmatpush.msrb.mxu2 %v3334_v30 }
 0x753   : > { %3370 = vmatpush.msrb.mxu2 %v3333_v25 }
 0x755   : > { %3371 = vmatpush.msrb.mxu2 %v3332_v42 }
 0x756   : > { %3372 = vmatmul.f32.vlgmr.msrb.gmra.mxu2 %v3348_v34 }
 0x7d9   : > { %v3373_v33 = vpop.f32.mrf.mxu2 }
 0x7da   : > { %v3374_v45 = vadd.f32 %v3373_v33, %v3355_v2 }
 0x7dc   : > { %3763 = vtanh.f32 %v3374_v45 }
 0x7e2   : > { %v3764_v4 = vpop.eup %3763 }
 0x7e3   : > { %v3377_v19 = vmul.f32 2.0, %v3764_v4 }
 0x7e5   : > { %v3378_v56 = vmax.f32 %v3377_v19, 0.01 }
 0x7e7   : > { %3379 = vst [vmem:[%s4854_s27] sm:$0x1] %v3378_v56 }
 0x7e8 PF: > { %p30_p9 = scmp.ge.s32.totalorder %s3913_s18, 4   ;;  %s6710_s1 = smov %s3783_s22 }
 0x7e9   : > { %s6711_s22 = smov %s3922_s25  ;;  %s6712_s2 = smov %s3913_s18 }
 0x7ea   :  { %32 = sbr.rel (!%p30_p9) target bundleno = 7 (0x7), region = 215 }

</bundles_post_ra>
